<compile_context>
chip_gen: v7x
topology: tpu7x:2x2x1
jax: 0.10.0
libtpu: 0.0.40
codegen_flags: <defaults>
</compile_context>

<pallas_src>
import math
import functools

import jax
import jax.numpy as jnp
from jax.experimental import pallas as pl
from jax.experimental.pallas import tpu as pltpu


def bert_bi_attention_kernel(
    x1_ref, x2_ref, x3_ref, m13_ref, m12_ref,
    w1_ref, b1_ref, w2_ref, b2_ref, w3_ref, b3_ref,
    ctx1_ref, ctx2_ref, ctx3_ref, p1_ref, p2_ref, p3_ref,
    q1_s, q2_s, q3_s, kc1_s, vc1_s, kc2_s, vc2_s, kc3_s, vc3_s,
    *, num_heads, head_dim, tq,
):
    f32 = jnp.float32
    bf16 = jnp.bfloat16
    H = num_heads
    dh = head_dim // 2
    all_head = H * head_dim
    hdh = H * dh
    L = x1_ref.shape[1]

    # ---------- per-batch prologue: fused projections + per-path K/V concat ----------
    @pl.when(pl.program_id(1) == 0)
    def _():
        def proj(x_ref, w_ref, b_ref):
            # One wide MXU matmul per stream: [ query | key | value ] fused column-wise.
            # Query columns were pre-scaled by 1/sqrt(head_dim) in the wrapper.
            y = jnp.dot(x_ref[0], w_ref[...], preferred_element_type=f32) + b_ref[...]
            y = y.astype(bf16)
            q = y[:, :all_head].reshape(L, H, head_dim)
            k = y[:, all_head:all_head + hdh].reshape(L, H, dh)
            v = y[:, all_head + hdh:].reshape(L, H, dh)
            return q, k, v

        q1, k1, v1 = proj(x1_ref, w1_ref, b1_ref)
        q2, k2, v2 = proj(x2_ref, w2_ref, b2_ref)
        q3, k3, v3 = proj(x3_ref, w3_ref, b3_ref)

        q1_s[...] = q1
        q2_s[...] = q2
        q3_s[...] = q3
        # Per-head channel concat (torch.cat(..., dim=3) after transpose_for_scores_kv),
        # done ONCE per batch element and reused by every query tile.
        kc1_s[...] = jnp.concatenate([k1, k3], axis=-1)   # path1 keys:   [k1 | k3]
        vc1_s[...] = jnp.concatenate([v1, v3], axis=-1)   # path1 values: [v1 | v3]
        kc2_s[...] = jnp.concatenate([k2, k3], axis=-1)   # path2 keys:   [k2 | k3]
        vc2_s[...] = jnp.concatenate([v2, v3], axis=-1)   # path2 values: [v2 | v3]
        kc3_s[...] = jnp.concatenate([k1, k2], axis=-1)   # path3 keys:   [k1 | k2]
        vc3_s[...] = jnp.concatenate([v1, v2], axis=-1)   # path3 values: [v1 | v2]

    # ---------- per-q-tile attention over the full key length ----------
    q_start = pl.multiple_of(pl.program_id(1) * tq, tq)

    def attend(q_s, kc_s, vc_s, mask, p_ref, ctx_ref):
        q = q_s[pl.ds(q_start, tq)]                       # (tq, H, head_dim) bf16, pre-scaled
        s = jnp.einsum('ihc,jhc->hij', q, kc_s[...],
                       preferred_element_type=f32)        # (H, tq, L) f32
        if mask is not None:
            s = s + mask                                  # (1, 1, L) broadcasts over (H, tq, L)
        m = jnp.max(s, axis=-1, keepdims=True)
        e = jnp.exp(s - m)
        inv = pl.reciprocal(jnp.sum(e, axis=-1, keepdims=True), approx=False)
        p = e * inv                                       # f32 softmax probs
        pb = p.astype(bf16)
        p_ref[0] = p.astype(p_ref.dtype)
        # attention dropout: identity in eval mode
        ctx = jnp.einsum('hij,jhc->ihc', pb, vc_s[...],
                         preferred_element_type=f32)      # (tq, H, head_dim)
        ctx_ref[0] = ctx.reshape(tq, all_head).astype(ctx_ref.dtype)   # lane-dense store

    m13 = m13_ref[...]   # additive mask for path 1 (keys from streams 1 & 3)
    m12 = m12_ref[...]   # additive mask for path 3 (keys from streams 1 & 2)

    attend(q2_s, kc1_s, vc1_s, m13, p1_ref, ctx1_ref)    # context1: query stream 2
    attend(q1_s, kc2_s, vc2_s, None, p2_ref, ctx2_ref)   # context2: query stream 1 (no mask)
    attend(q3_s, kc3_s, vc3_s, m12, p3_ref, ctx3_ref)    # context3: query stream 3


def bert_bi_attention(input_tensor1, attention_mask1, input_tensor2, attention_mask2,
                      input_tensor3, attention_mask3, params, num_heads,
                      q_block=256, probs_dtype=jnp.bfloat16):
    B, T, S, Fv = input_tensor1.shape
    L = T * S
    Fp = input_tensor2.shape[-1]
    Fa = input_tensor3.shape[-1]
    all_head = params["wq1"].shape[1]
    head_dim = all_head // num_heads

    bf16 = jnp.bfloat16
    f32 = jnp.float32

    # Query tile size (must divide L; otherwise fall back to one tile per batch element).
    tq = min(q_block, L)
    if L % tq != 0:
        tq = L   # TODO(synk): pad L to a tile multiple and mask padded keys instead.
    nq = L // tq

    x1 = input_tensor1.reshape(B, L, Fv).astype(bf16)
    x2 = input_tensor2.reshape(B, L, Fp).astype(bf16)
    x3 = input_tensor3.reshape(B, L, Fa).astype(bf16)

    m1 = attention_mask1.reshape(B, 1, L).astype(f32)
    m2 = attention_mask2.reshape(B, 1, L).astype(f32)
    m3 = attention_mask3.reshape(B, 1, L).astype(f32)
    # TODO(synk): torch.tensordot(mask_a, mask_b) in the reference is shape-invalid for
    # B>1 / L>1; the standard additive combination of the two key-stream masks is used.
    m13 = m1 + m3
    m12 = m1 + m2

    scale = 1.0 / math.sqrt(head_dim)

    def fuse_stream(s):
        # Fold the softmax scale into the query projection and fuse [q | k | v] weights
        # into a single (F, 2*all_head) bf16 operand + (1, 2*all_head) f32 bias.
        wq = params[f"wq{s}"].astype(f32) * scale
        bq = params[f"bq{s}"].astype(f32) * scale
        w = jnp.concatenate(
            [wq, params[f"wk{s}"].astype(f32), params[f"wv{s}"].astype(f32)], axis=1)
        b = jnp.concatenate(
            [bq, params[f"bk{s}"].astype(f32), params[f"bv{s}"].astype(f32)])
        return w.astype(bf16), b.reshape(1, 2 * all_head).astype(f32)

    w1, b1 = fuse_stream("1")
    w2, b2 = fuse_stream("2")
    w3, b3 = fuse_stream("3")

    in_specs = [
        pl.BlockSpec((1, L, Fv), lambda b, q: (b, 0, 0)),
        pl.BlockSpec((1, L, Fp), lambda b, q: (b, 0, 0)),
        pl.BlockSpec((1, L, Fa), lambda b, q: (b, 0, 0)),
        pl.BlockSpec((1, 1, L), lambda b, q: (b, 0, 0)),
        pl.BlockSpec((1, 1, L), lambda b, q: (b, 0, 0)),
        pl.BlockSpec((Fv, 2 * all_head), lambda b, q: (0, 0)),
        pl.BlockSpec((1, 2 * all_head), lambda b, q: (0, 0)),
        pl.BlockSpec((Fp, 2 * all_head), lambda b, q: (0, 0)),
        pl.BlockSpec((1, 2 * all_head), lambda b, q: (0, 0)),
        pl.BlockSpec((Fa, 2 * all_head), lambda b, q: (0, 0)),
        pl.BlockSpec((1, 2 * all_head), lambda b, q: (0, 0)),
    ]

    ctx_spec = pl.BlockSpec((1, tq, all_head), lambda b, q: (b, q, 0))
    prb_spec = pl.BlockSpec((1, num_heads, tq, L), lambda b, q: (b, 0, q, 0))
    out_specs = [ctx_spec, ctx_spec, ctx_spec, prb_spec, prb_spec, prb_spec]
    out_shape = [
        jax.ShapeDtypeStruct((B, L, all_head), f32),
        jax.ShapeDtypeStruct((B, L, all_head), f32),
        jax.ShapeDtypeStruct((B, L, all_head), f32),
        jax.ShapeDtypeStruct((B, num_heads, L, L), probs_dtype),
        jax.ShapeDtypeStruct((B, num_heads, L, L), probs_dtype),
        jax.ShapeDtypeStruct((B, num_heads, L, L), probs_dtype),
    ]

    # Persistent per-batch Q and concatenated-K/V scratch (bf16, per-head layout).
    scratch_shapes = [pltpu.VMEM((L, num_heads, head_dim), bf16) for _ in range(9)]

    # Explicit scoped-VMEM budget: double-buffered blocks + persistent scratch,
    # floored at 32 MiB and capped at 64 MiB (v7x physical VMEM per TensorCore).
    prob_bytes = jnp.dtype(probs_dtype).itemsize
    est = (
        2 * (L * (Fv + Fp + Fa) * 2 + 2 * L * 4)                                 # inputs+masks
        + 2 * ((Fv + Fp + Fa) * 2 * all_head * 2 + 3 * 2 * all_head * 4)         # weights+bias
        + 2 * (3 * tq * all_head * 4 + 3 * num_heads * tq * L * prob_bytes)      # outputs
        + 9 * L * all_head * 2                                                   # scratch
    )
    vmem_limit = int(min(max(2 * est, 32 * 1024 * 1024), 64 * 1024 * 1024))

    kernel = functools.partial(bert_bi_attention_kernel,
                               num_heads=num_heads, head_dim=head_dim, tq=tq)

    ctx1, ctx2, ctx3, p1, p2, p3 = pl.pallas_call(
        kernel,
        grid=(B, nq),
        in_specs=in_specs,
        out_specs=out_specs,
        out_shape=out_shape,
        scratch_shapes=scratch_shapes,
        compiler_params=pltpu.CompilerParams(
            dimension_semantics=("parallel", "arbitrary"),
            vmem_limit_bytes=vmem_limit),
    )(x1, x2, x3, m13, m12, w1, b1, w2, b2, w3, b3)

    def merge(ctx):
        # (B, L, all_head) is already the reference's head-interleaved layout.
        return ctx.reshape(B, T, S, all_head)

    # Match PyTorch return order:
    # (context_layer2, context_layer1, context_layer3, (probs2, probs1, probs3))
    return merge(ctx2), merge(ctx1), merge(ctx3), (p2, p1, p3)


def _reference(x1, m1, x2, m2, x3, m3, params, num_heads):
    """Pure-JAX f32 reference of the same forward (with the m_a+m_b mask substitution)."""
    B, T, S, Fv = x1.shape
    L = T * S
    all_head = params["wq1"].shape[1]
    head_dim = all_head // num_heads
    dh = head_dim // 2
    f32 = jnp.float32

    def tfs(y, d):
        return y.reshape(B, L, num_heads, d).transpose(0, 2, 1, 3)

    def stream(x, s, fin):
        xf = x.reshape(B, L, fin).astype(f32)
        q = tfs(xf @ params[f"wq{s}"] + params[f"bq{s}"], head_dim)
        k = tfs(xf @ params[f"wk{s}"] + params[f"bk{s}"], dh)
        v = tfs(xf @ params[f"wv{s}"] + params[f"bv{s}"], dh)
        return q, k, v

    q1, k1, v1 = stream(x1, "1", Fv)
    q2, k2, v2 = stream(x2, "2", x2.shape[-1])
    q3, k3, v3 = stream(x3, "3", x3.shape[-1])

    m1 = m1.reshape(B, 1, 1, L).astype(f32)
    m2 = m2.reshape(B, 1, 1, L).astype(f32)
    m3 = m3.reshape(B, 1, 1, L).astype(f32)

    def attend(q, ka, kb, va, vb, mask):
        k = jnp.concatenate([ka, kb], axis=-1)
        v = jnp.concatenate([va, vb], axis=-1)
        s = jnp.einsum('bhid,bhjd->bhij', q, k) / math.sqrt(head_dim)
        if mask is not None:
            s = s + mask
        p = jax.nn.softmax(s, axis=-1)
        c = jnp.einsum('bhij,bhjd->bhid', p, v)
        return c.transpose(0, 2, 1, 3).reshape(B, T, S, all_head), p

    c1, p1 = attend(q2, k1, k3, v1, v3, m1 + m3)
    c2, p2 = attend(q1, k2, k3, v2, v3, None)
    c3, p3 = attend(q3, k1, k2, v1, v2, m1 + m2)
    return c2, c1, c3, (p2, p1, p3)


if __name__ == "__main__":
    # config: bi_hidden_size=32, bi_num_attention_heads=4 (head_dim=8, kv head_dim=4),
    #         v/p/a hidden sizes = 32; inputs (B=2, T=2, S=4, F=32).
    # NOTE: correctness smoke test only -- blocks are far below the (8,128) tile, so
    # timing at these shapes is architecture-floor noise; tune TQ at production shapes.
    B, T, S = 2, 2, 4
    Fv = Fp = Fa = 32
    bi_hidden = 32
    num_heads = 4
    L = T * S
    all_head = bi_hidden
    all_head_kv = all_head // 2

    key = jax.random.PRNGKey(0)
    ks = jax.random.split(key, 32)

    def init(k, shape, scale=0.02):
        return (scale * jax.random.normal(k, shape)).astype(jnp.float32)

    params = {}
    idx = 0
    for s, fin in (("1", Fv), ("2", Fp), ("3", Fa)):
        params[f"wq{s}"] = init(ks[idx], (fin, all_head)); idx += 1
        params[f"bq{s}"] = init(ks[idx], (all_head,)); idx += 1
        params[f"wk{s}"] = init(ks[idx], (fin, all_head_kv)); idx += 1
        params[f"bk{s}"] = init(ks[idx], (all_head_kv,)); idx += 1
        params[f"wv{s}"] = init(ks[idx], (fin, all_head_kv)); idx += 1
        params[f"bv{s}"] = init(ks[idx], (all_head_kv,)); idx += 1

    input1 = jax.random.normal(ks[idx], (B, T, S, Fv), jnp.float32); idx += 1
    input2 = jax.random.normal(ks[idx], (B, T, S, Fp), jnp.float32); idx += 1
    input3 = jax.random.normal(ks[idx], (B, T, S, Fa), jnp.float32); idx += 1

    # BERT-style pre-computed additive masks ((1 - mask) * -10000); all-visible here.
    mask1 = jnp.zeros((B, 1, 1, L), jnp.float32)
    mask2 = jnp.zeros((B, 1, 1, L), jnp.float32)
    mask3 = jnp.zeros((B, 1, 1, L), jnp.float32)

    ctx2, ctx1, ctx3, (p2, p1, p3) = bert_bi_attention(
        input1, mask1, input2, mask2, input3, mask3, params, num_heads)
    jax.block_until_ready((ctx2, ctx1, ctx3, p2, p1, p3))

    assert ctx2.shape == (B, T, S, all_head)
    assert ctx1.shape == (B, T, S, all_head)
    assert ctx3.shape == (B, T, S, all_head)
    assert p1.shape == (B, num_heads, L, L)
    assert p2.shape == (B, num_heads, L, L)
    assert p3.shape == (B, num_heads, L, L)

    # Correctness check against a pure-JAX f32 reference (bf16 MXU path -> loose tol).
    r_ctx2, r_ctx1, r_ctx3, (r_p2, r_p1, r_p3) = _reference(
        input1, mask1, input2, mask2, input3, mask3, params, num_heads)
    for got, ref in ((ctx2, r_ctx2), (ctx1, r_ctx1), (ctx3, r_ctx3),
                     (p2, r_p2), (p1, r_p1), (p3, r_p3)):
        err = float(jnp.max(jnp.abs(got.astype(jnp.float32) - ref)))
        assert err < 2e-2, f"max abs error {err} exceeds tolerance"

    print("KERNEL_OK")
</pallas_src>

<mosaic_0001>
module attributes {stable_mosaic.version = 11 : i64} {
  func.func @bert_bi_attention_kernel(%arg0: i32, %arg1: i32, %arg2: memref<1x8x32xbf16, #tpu.memory_space<vmem>>, %arg3: memref<1x8x32xbf16, #tpu.memory_space<vmem>>, %arg4: memref<1x8x32xbf16, #tpu.memory_space<vmem>>, %arg5: memref<1x1x8xf32, #tpu.memory_space<vmem>>, %arg6: memref<1x1x8xf32, #tpu.memory_space<vmem>>, %arg7: memref<32x64xbf16, #tpu.memory_space<vmem>>, %arg8: memref<1x64xf32, #tpu.memory_space<vmem>>, %arg9: memref<32x64xbf16, #tpu.memory_space<vmem>>, %arg10: memref<1x64xf32, #tpu.memory_space<vmem>>, %arg11: memref<32x64xbf16, #tpu.memory_space<vmem>>, %arg12: memref<1x64xf32, #tpu.memory_space<vmem>>, %arg13: memref<1x8x32xf32, #tpu.memory_space<vmem>>, %arg14: memref<1x8x32xf32, #tpu.memory_space<vmem>>, %arg15: memref<1x8x32xf32, #tpu.memory_space<vmem>>, %arg16: memref<1x4x8x8xbf16, #tpu.memory_space<vmem>>, %arg17: memref<1x4x8x8xbf16, #tpu.memory_space<vmem>>, %arg18: memref<1x4x8x8xbf16, #tpu.memory_space<vmem>>, %arg19: memref<8x4x8xbf16, #tpu.memory_space<vmem>>, %arg20: memref<8x4x8xbf16, #tpu.memory_space<vmem>>, %arg21: memref<8x4x8xbf16, #tpu.memory_space<vmem>>, %arg22: memref<8x4x8xbf16, #tpu.memory_space<vmem>>, %arg23: memref<8x4x8xbf16, #tpu.memory_space<vmem>>, %arg24: memref<8x4x8xbf16, #tpu.memory_space<vmem>>, %arg25: memref<8x4x8xbf16, #tpu.memory_space<vmem>>, %arg26: memref<8x4x8xbf16, #tpu.memory_space<vmem>>, %arg27: memref<8x4x8xbf16, #tpu.memory_space<vmem>>) attributes {dimension_semantics = [#tpu.dimension_semantics<parallel>, #tpu.dimension_semantics<arbitrary>], iteration_bounds = array<i64: 2, 1>, scalar_prefetch = 0 : i64, scratch_operands = 9 : i64, tpu.core_type = #tpu.core_type<tc>, window_params = [{transform_indices = @transform_0, window_bounds = array<i64: 1, 8, 32>}, {transform_indices = @transform_1, window_bounds = array<i64: 1, 8, 32>}, {transform_indices = @transform_2, window_bounds = array<i64: 1, 8, 32>}, {transform_indices = @transform_3, window_bounds = array<i64: 1, 1, 8>}, {transform_indices = @transform_4, window_bounds = array<i64: 1, 1, 8>}, {pipeline_mode = #tpu.pipeline_mode<synchronous>, transform_indices = @transform_5, window_bounds = array<i64: 32, 64>}, {pipeline_mode = #tpu.pipeline_mode<synchronous>, transform_indices = @transform_6, window_bounds = array<i64: 1, 64>}, {pipeline_mode = #tpu.pipeline_mode<synchronous>, transform_indices = @transform_7, window_bounds = array<i64: 32, 64>}, {pipeline_mode = #tpu.pipeline_mode<synchronous>, transform_indices = @transform_8, window_bounds = array<i64: 1, 64>}, {pipeline_mode = #tpu.pipeline_mode<synchronous>, transform_indices = @transform_9, window_bounds = array<i64: 32, 64>}, {pipeline_mode = #tpu.pipeline_mode<synchronous>, transform_indices = @transform_10, window_bounds = array<i64: 1, 64>}, {transform_indices = @transform_11, window_bounds = array<i64: 1, 8, 32>}, {transform_indices = @transform_12, window_bounds = array<i64: 1, 8, 32>}, {transform_indices = @transform_13, window_bounds = array<i64: 1, 8, 32>}, {transform_indices = @transform_14, window_bounds = array<i64: 1, 4, 8, 8>}, {transform_indices = @transform_15, window_bounds = array<i64: 1, 4, 8, 8>}, {transform_indices = @transform_16, window_bounds = array<i64: 1, 4, 8, 8>}]} {
    %c0_i32 = arith.constant 0 : i32
    %0 = arith.cmpi eq, %arg1, %c0_i32 : i32
    %1 = arith.extui %0 : i1 to i32
    %c0_i32_0 = arith.constant 0 : i32
    %2 = arith.cmpi ne, %1, %c0_i32_0 : i32
    scf.if %2 {
      %c0_62 = arith.constant 0 : index
      %c0_63 = arith.constant 0 : index
      %c0_64 = arith.constant 0 : index
      %89 = vector.load %arg2[%c0_62, %c0_63, %c0_64] : memref<1x8x32xbf16, #tpu.memory_space<vmem>>, vector<1x8x32xbf16>
      %90 = vector.shape_cast %89 : vector<1x8x32xbf16> to vector<8x32xbf16>
      %c0_65 = arith.constant 0 : index
      %c0_66 = arith.constant 0 : index
      %91 = vector.load %arg7[%c0_65, %c0_66] : memref<32x64xbf16, #tpu.memory_space<vmem>>, vector<32x64xbf16>
      %cst_67 = arith.constant dense<0.000000e+00> : vector<8x64xf32>
      %92 = tpu.matmul %90, %91, %cst_67 {dimension_numbers = #tpu.dot_dimension_numbers<[1], [0], [0], [1], [0, 0, 1, 1], [], []>} : vector<8x32xbf16>, vector<32x64xbf16>, vector<8x64xf32> -> vector<8x64xf32>
      %c0_68 = arith.constant 0 : index
      %c0_69 = arith.constant 0 : index
      %93 = vector.load %arg8[%c0_68, %c0_69] : memref<1x64xf32, #tpu.memory_space<vmem>>, vector<1x64xf32>
      %94 = vector.broadcast %93 : vector<1x64xf32> to vector<8x64xf32>
      %95 = arith.addf %92, %94 : vector<8x64xf32>
      %96 = arith.truncf %95 : vector<8x64xf32> to vector<8x64xbf16>
      %97 = vector.extract_strided_slice %96 {offsets = [0, 0], sizes = [8, 32], strides = [1, 1]} : vector<8x64xbf16> to vector<8x32xbf16>
      %98 = vector.shape_cast %97 : vector<8x32xbf16> to vector<8x4x8xbf16>
      %99 = vector.extract_strided_slice %96 {offsets = [0, 32], sizes = [8, 16], strides = [1, 1]} : vector<8x64xbf16> to vector<8x16xbf16>
      %100 = vector.shape_cast %99 : vector<8x16xbf16> to vector<8x4x4xbf16>
      %101 = vector.extract_strided_slice %96 {offsets = [0, 48], sizes = [8, 16], strides = [1, 1]} : vector<8x64xbf16> to vector<8x16xbf16>
      %102 = vector.shape_cast %101 : vector<8x16xbf16> to vector<8x4x4xbf16>
      %c0_70 = arith.constant 0 : index
      %c0_71 = arith.constant 0 : index
      %c0_72 = arith.constant 0 : index
      %103 = vector.load %arg3[%c0_70, %c0_71, %c0_72] : memref<1x8x32xbf16, #tpu.memory_space<vmem>>, vector<1x8x32xbf16>
      %104 = vector.shape_cast %103 : vector<1x8x32xbf16> to vector<8x32xbf16>
      %c0_73 = arith.constant 0 : index
      %c0_74 = arith.constant 0 : index
      %105 = vector.load %arg9[%c0_73, %c0_74] : memref<32x64xbf16, #tpu.memory_space<vmem>>, vector<32x64xbf16>
      %cst_75 = arith.constant dense<0.000000e+00> : vector<8x64xf32>
      %106 = tpu.matmul %104, %105, %cst_75 {dimension_numbers = #tpu.dot_dimension_numbers<[1], [0], [0], [1], [0, 0, 1, 1], [], []>} : vector<8x32xbf16>, vector<32x64xbf16>, vector<8x64xf32> -> vector<8x64xf32>
      %c0_76 = arith.constant 0 : index
      %c0_77 = arith.constant 0 : index
      %107 = vector.load %arg10[%c0_76, %c0_77] : memref<1x64xf32, #tpu.memory_space<vmem>>, vector<1x64xf32>
      %108 = vector.broadcast %107 : vector<1x64xf32> to vector<8x64xf32>
      %109 = arith.addf %106, %108 : vector<8x64xf32>
      %110 = arith.truncf %109 : vector<8x64xf32> to vector<8x64xbf16>
      %111 = vector.extract_strided_slice %110 {offsets = [0, 0], sizes = [8, 32], strides = [1, 1]} : vector<8x64xbf16> to vector<8x32xbf16>
      %112 = vector.shape_cast %111 : vector<8x32xbf16> to vector<8x4x8xbf16>
      %113 = vector.extract_strided_slice %110 {offsets = [0, 32], sizes = [8, 16], strides = [1, 1]} : vector<8x64xbf16> to vector<8x16xbf16>
      %114 = vector.shape_cast %113 : vector<8x16xbf16> to vector<8x4x4xbf16>
      %115 = vector.extract_strided_slice %110 {offsets = [0, 48], sizes = [8, 16], strides = [1, 1]} : vector<8x64xbf16> to vector<8x16xbf16>
      %116 = vector.shape_cast %115 : vector<8x16xbf16> to vector<8x4x4xbf16>
      %c0_78 = arith.constant 0 : index
      %c0_79 = arith.constant 0 : index
      %c0_80 = arith.constant 0 : index
      %117 = vector.load %arg4[%c0_78, %c0_79, %c0_80] : memref<1x8x32xbf16, #tpu.memory_space<vmem>>, vector<1x8x32xbf16>
      %118 = vector.shape_cast %117 : vector<1x8x32xbf16> to vector<8x32xbf16>
      %c0_81 = arith.constant 0 : index
      %c0_82 = arith.constant 0 : index
      %119 = vector.load %arg11[%c0_81, %c0_82] : memref<32x64xbf16, #tpu.memory_space<vmem>>, vector<32x64xbf16>
      %cst_83 = arith.constant dense<0.000000e+00> : vector<8x64xf32>
      %120 = tpu.matmul %118, %119, %cst_83 {dimension_numbers = #tpu.dot_dimension_numbers<[1], [0], [0], [1], [0, 0, 1, 1], [], []>} : vector<8x32xbf16>, vector<32x64xbf16>, vector<8x64xf32> -> vector<8x64xf32>
      %c0_84 = arith.constant 0 : index
      %c0_85 = arith.constant 0 : index
      %121 = vector.load %arg12[%c0_84, %c0_85] : memref<1x64xf32, #tpu.memory_space<vmem>>, vector<1x64xf32>
      %122 = vector.broadcast %121 : vector<1x64xf32> to vector<8x64xf32>
      %123 = arith.addf %120, %122 : vector<8x64xf32>
      %124 = arith.truncf %123 : vector<8x64xf32> to vector<8x64xbf16>
      %125 = vector.extract_strided_slice %124 {offsets = [0, 0], sizes = [8, 32], strides = [1, 1]} : vector<8x64xbf16> to vector<8x32xbf16>
      %126 = vector.shape_cast %125 : vector<8x32xbf16> to vector<8x4x8xbf16>
      %127 = vector.extract_strided_slice %124 {offsets = [0, 32], sizes = [8, 16], strides = [1, 1]} : vector<8x64xbf16> to vector<8x16xbf16>
      %128 = vector.shape_cast %127 : vector<8x16xbf16> to vector<8x4x4xbf16>
      %129 = vector.extract_strided_slice %124 {offsets = [0, 48], sizes = [8, 16], strides = [1, 1]} : vector<8x64xbf16> to vector<8x16xbf16>
      %130 = vector.shape_cast %129 : vector<8x16xbf16> to vector<8x4x4xbf16>
      %c0_86 = arith.constant 0 : index
      %c0_87 = arith.constant 0 : index
      %c0_88 = arith.constant 0 : index
      %131 = vector.load %arg19[%c0_86, %c0_87, %c0_88] : memref<8x4x8xbf16, #tpu.memory_space<vmem>>, vector<8x4x8xbf16>
      tpu.vector_store %arg19[%c0_86, %c0_87, %c0_88], %98 {strides = array<i32>} : memref<8x4x8xbf16, #tpu.memory_space<vmem>>, vector<8x4x8xbf16>,
      %c0_89 = arith.constant 0 : index
      %c0_90 = arith.constant 0 : index
      %c0_91 = arith.constant 0 : index
      %132 = vector.load %arg20[%c0_89, %c0_90, %c0_91] : memref<8x4x8xbf16, #tpu.memory_space<vmem>>, vector<8x4x8xbf16>
      tpu.vector_store %arg20[%c0_89, %c0_90, %c0_91], %112 {strides = array<i32>} : memref<8x4x8xbf16, #tpu.memory_space<vmem>>, vector<8x4x8xbf16>,
      %c0_92 = arith.constant 0 : index
      %c0_93 = arith.constant 0 : index
      %c0_94 = arith.constant 0 : index
      %133 = vector.load %arg21[%c0_92, %c0_93, %c0_94] : memref<8x4x8xbf16, #tpu.memory_space<vmem>>, vector<8x4x8xbf16>
      tpu.vector_store %arg21[%c0_92, %c0_93, %c0_94], %126 {strides = array<i32>} : memref<8x4x8xbf16, #tpu.memory_space<vmem>>, vector<8x4x8xbf16>,
      %134 = tpu.concatenate %100, %128 in 2 : vector<8x4x4xbf16>, vector<8x4x4xbf16> -> vector<8x4x8xbf16>
      %c0_95 = arith.constant 0 : index
      %c0_96 = arith.constant 0 : index
      %c0_97 = arith.constant 0 : index
      %135 = vector.load %arg22[%c0_95, %c0_96, %c0_97] : memref<8x4x8xbf16, #tpu.memory_space<vmem>>, vector<8x4x8xbf16>
      tpu.vector_store %arg22[%c0_95, %c0_96, %c0_97], %134 {strides = array<i32>} : memref<8x4x8xbf16, #tpu.memory_space<vmem>>, vector<8x4x8xbf16>,
      %136 = tpu.concatenate %102, %130 in 2 : vector<8x4x4xbf16>, vector<8x4x4xbf16> -> vector<8x4x8xbf16>
      %c0_98 = arith.constant 0 : index
      %c0_99 = arith.constant 0 : index
      %c0_100 = arith.constant 0 : index
      %137 = vector.load %arg23[%c0_98, %c0_99, %c0_100] : memref<8x4x8xbf16, #tpu.memory_space<vmem>>, vector<8x4x8xbf16>
      tpu.vector_store %arg23[%c0_98, %c0_99, %c0_100], %136 {strides = array<i32>} : memref<8x4x8xbf16, #tpu.memory_space<vmem>>, vector<8x4x8xbf16>,
      %138 = tpu.concatenate %114, %128 in 2 : vector<8x4x4xbf16>, vector<8x4x4xbf16> -> vector<8x4x8xbf16>
      %c0_101 = arith.constant 0 : index
      %c0_102 = arith.constant 0 : index
      %c0_103 = arith.constant 0 : index
      %139 = vector.load %arg24[%c0_101, %c0_102, %c0_103] : memref<8x4x8xbf16, #tpu.memory_space<vmem>>, vector<8x4x8xbf16>
      tpu.vector_store %arg24[%c0_101, %c0_102, %c0_103], %138 {strides = array<i32>} : memref<8x4x8xbf16, #tpu.memory_space<vmem>>, vector<8x4x8xbf16>,
      %140 = tpu.concatenate %116, %130 in 2 : vector<8x4x4xbf16>, vector<8x4x4xbf16> -> vector<8x4x8xbf16>
      %c0_104 = arith.constant 0 : index
      %c0_105 = arith.constant 0 : index
      %c0_106 = arith.constant 0 : index
      %141 = vector.load %arg25[%c0_104, %c0_105, %c0_106] : memref<8x4x8xbf16, #tpu.memory_space<vmem>>, vector<8x4x8xbf16>
      tpu.vector_store %arg25[%c0_104, %c0_105, %c0_106], %140 {strides = array<i32>} : memref<8x4x8xbf16, #tpu.memory_space<vmem>>, vector<8x4x8xbf16>,
      %142 = tpu.concatenate %100, %114 in 2 : vector<8x4x4xbf16>, vector<8x4x4xbf16> -> vector<8x4x8xbf16>
      %c0_107 = arith.constant 0 : index
      %c0_108 = arith.constant 0 : index
      %c0_109 = arith.constant 0 : index
      %143 = vector.load %arg26[%c0_107, %c0_108, %c0_109] : memref<8x4x8xbf16, #tpu.memory_space<vmem>>, vector<8x4x8xbf16>
      tpu.vector_store %arg26[%c0_107, %c0_108, %c0_109], %142 {strides = array<i32>} : memref<8x4x8xbf16, #tpu.memory_space<vmem>>, vector<8x4x8xbf16>,
      %144 = tpu.concatenate %102, %116 in 2 : vector<8x4x4xbf16>, vector<8x4x4xbf16> -> vector<8x4x8xbf16>
      %c0_110 = arith.constant 0 : index
      %c0_111 = arith.constant 0 : index
      %c0_112 = arith.constant 0 : index
      %145 = vector.load %arg27[%c0_110, %c0_111, %c0_112] : memref<8x4x8xbf16, #tpu.memory_space<vmem>>, vector<8x4x8xbf16>
      tpu.vector_store %arg27[%c0_110, %c0_111, %c0_112], %144 {strides = array<i32>} : memref<8x4x8xbf16, #tpu.memory_space<vmem>>, vector<8x4x8xbf16>,
    } else {
    }
    %c8_i32 = arith.constant 8 : i32
    %3 = arith.muli %arg1, %c8_i32 : i32
    %4 = tpu.assume_multiple %3, 8 : i32
    %c0 = arith.constant 0 : index
    %c0_1 = arith.constant 0 : index
    %c0_2 = arith.constant 0 : index
    %5 = vector.load %arg5[%c0, %c0_1, %c0_2] : memref<1x1x8xf32, #tpu.memory_space<vmem>>, vector<1x1x8xf32>
    %c0_3 = arith.constant 0 : index
    %c0_4 = arith.constant 0 : index
    %c0_5 = arith.constant 0 : index
    %6 = vector.load %arg6[%c0_3, %c0_4, %c0_5] : memref<1x1x8xf32, #tpu.memory_space<vmem>>, vector<1x1x8xf32>
    %7 = arith.index_cast %4 : i32 to index
    %c0_6 = arith.constant 0 : index
    %c0_7 = arith.constant 0 : index
    %8 = vector.load %arg20[%7, %c0_6, %c0_7] : memref<8x4x8xbf16, #tpu.memory_space<vmem>>, vector<8x4x8xbf16>
    %c0_8 = arith.constant 0 : index
    %c0_9 = arith.constant 0 : index
    %c0_10 = arith.constant 0 : index
    %9 = vector.load %arg22[%c0_8, %c0_9, %c0_10] : memref<8x4x8xbf16, #tpu.memory_space<vmem>>, vector<8x4x8xbf16>
    "tpu.trace_start"() <{level = 10 : i32, message = "ihc,jhc->hij"}> : () -> ()
    %cst = arith.constant dense<0.000000e+00> : vector<4x8x8xf32>
    %10 = tpu.matmul %8, %9, %cst {dimension_numbers = #tpu.dot_dimension_numbers<[2], [2], [0], [0], [0, 1, 0, 0, 1, 0], [1], [1]>} : vector<8x4x8xbf16>, vector<8x4x8xbf16>, vector<4x8x8xf32> -> vector<4x8x8xf32>
    "tpu.trace_stop"() : () -> ()
    %11 = vector.broadcast %5 : vector<1x1x8xf32> to vector<4x8x8xf32>
    %12 = arith.addf %10, %11 : vector<4x8x8xf32>
    %cst_11 = arith.constant dense<0xFF800000> : vector<4x8xf32>
    %13 = vector.multi_reduction <maximumf>, %12, %cst_11 [2] : vector<4x8x8xf32> to vector<4x8xf32>
    %14 = vector.shape_cast %13 : vector<4x8xf32> to vector<4x8x1xf32>
    %15 = vector.broadcast %14 : vector<4x8x1xf32> to vector<4x8x8xf32>
    %16 = arith.subf %12, %15 : vector<4x8x8xf32>
    %17 = math.exp %16 : vector<4x8x8xf32>
    %cst_12 = arith.constant dense<0.000000e+00> : vector<4x8xf32>
    %18 = vector.multi_reduction <add>, %17, %cst_12 [2] : vector<4x8x8xf32> to vector<4x8xf32>
    %19 = vector.shape_cast %18 : vector<4x8xf32> to vector<4x8x1xf32>
    %20 = tpu.reciprocal %19 : vector<4x8x1xf32> -> vector<4x8x1xf32>
    %21 = vector.broadcast %20 : vector<4x8x1xf32> to vector<4x8x8xf32>
    %22 = arith.mulf %17, %21 : vector<4x8x8xf32>
    %23 = arith.truncf %22 : vector<4x8x8xf32> to vector<4x8x8xbf16>
    %24 = arith.truncf %22 : vector<4x8x8xf32> to vector<4x8x8xbf16>
    %c0_13 = arith.constant 0 : index
    %c0_14 = arith.constant 0 : index
    %c0_15 = arith.constant 0 : index
    %c0_16 = arith.constant 0 : index
    %25 = vector.load %arg16[%c0_13, %c0_14, %c0_15, %c0_16] : memref<1x4x8x8xbf16, #tpu.memory_space<vmem>>, vector<1x4x8x8xbf16>
    %26 = vector.shape_cast %25 : vector<1x4x8x8xbf16> to vector<4x8x8xbf16>
    %27 = vector.shape_cast %24 : vector<4x8x8xbf16> to vector<1x4x8x8xbf16>
    tpu.vector_store %arg16[%c0_13, %c0_14, %c0_15, %c0_16], %27 {strides = array<i32>} : memref<1x4x8x8xbf16, #tpu.memory_space<vmem>>, vector<1x4x8x8xbf16>,
    %c0_17 = arith.constant 0 : index
    %c0_18 = arith.constant 0 : index
    %c0_19 = arith.constant 0 : index
    %28 = vector.load %arg23[%c0_17, %c0_18, %c0_19] : memref<8x4x8xbf16, #tpu.memory_space<vmem>>, vector<8x4x8xbf16>
    "tpu.trace_start"() <{level = 10 : i32, message = "hij,jhc->ihc"}> : () -> ()
    %cst_20 = arith.constant dense<0.000000e+00> : vector<4x8x8xf32>
    %29 = tpu.matmul %28, %23, %cst_20 {dimension_numbers = #tpu.dot_dimension_numbers<[0], [2], [2], [1], [0, 1, 0, 2, 1, 1], [1], [0]>} : vector<8x4x8xbf16>, vector<4x8x8xbf16>, vector<4x8x8xf32> -> vector<4x8x8xf32>
    %30 = tpu.transpose %29, [2, 0, 1] : vector<4x8x8xf32> -> vector<8x4x8xf32>
    "tpu.trace_stop"() : () -> ()
    %31 = vector.shape_cast %30 : vector<8x4x8xf32> to vector<8x32xf32>
    %c0_21 = arith.constant 0 : index
    %c0_22 = arith.constant 0 : index
    %c0_23 = arith.constant 0 : index
    %32 = vector.load %arg13[%c0_21, %c0_22, %c0_23] : memref<1x8x32xf32, #tpu.memory_space<vmem>>, vector<1x8x32xf32>
    %33 = vector.shape_cast %32 : vector<1x8x32xf32> to vector<8x32xf32>
    %34 = vector.shape_cast %31 : vector<8x32xf32> to vector<1x8x32xf32>
    tpu.vector_store %arg13[%c0_21, %c0_22, %c0_23], %34 {strides = array<i32>} : memref<1x8x32xf32, #tpu.memory_space<vmem>>, vector<1x8x32xf32>,
    %35 = arith.index_cast %4 : i32 to index
    %c0_24 = arith.constant 0 : index
    %c0_25 = arith.constant 0 : index
    %36 = vector.load %arg19[%35, %c0_24, %c0_25] : memref<8x4x8xbf16, #tpu.memory_space<vmem>>, vector<8x4x8xbf16>
    %c0_26 = arith.constant 0 : index
    %c0_27 = arith.constant 0 : index
    %c0_28 = arith.constant 0 : index
    %37 = vector.load %arg24[%c0_26, %c0_27, %c0_28] : memref<8x4x8xbf16, #tpu.memory_space<vmem>>, vector<8x4x8xbf16>
    "tpu.trace_start"() <{level = 10 : i32, message = "ihc,jhc->hij"}> : () -> ()
    %cst_29 = arith.constant dense<0.000000e+00> : vector<4x8x8xf32>
    %38 = tpu.matmul %36, %37, %cst_29 {dimension_numbers = #tpu.dot_dimension_numbers<[2], [2], [0], [0], [0, 1, 0, 0, 1, 0], [1], [1]>} : vector<8x4x8xbf16>, vector<8x4x8xbf16>, vector<4x8x8xf32> -> vector<4x8x8xf32>
    "tpu.trace_stop"() : () -> ()
    %cst_30 = arith.constant dense<0xFF800000> : vector<4x8xf32>
    %39 = vector.multi_reduction <maximumf>, %38, %cst_30 [2] : vector<4x8x8xf32> to vector<4x8xf32>
    %40 = vector.shape_cast %39 : vector<4x8xf32> to vector<4x8x1xf32>
    %41 = vector.broadcast %40 : vector<4x8x1xf32> to vector<4x8x8xf32>
    %42 = arith.subf %38, %41 : vector<4x8x8xf32>
    %43 = math.exp %42 : vector<4x8x8xf32>
    %cst_31 = arith.constant dense<0.000000e+00> : vector<4x8xf32>
    %44 = vector.multi_reduction <add>, %43, %cst_31 [2] : vector<4x8x8xf32> to vector<4x8xf32>
    %45 = vector.shape_cast %44 : vector<4x8xf32> to vector<4x8x1xf32>
    %46 = tpu.reciprocal %45 : vector<4x8x1xf32> -> vector<4x8x1xf32>
    %47 = vector.broadcast %46 : vector<4x8x1xf32> to vector<4x8x8xf32>
    %48 = arith.mulf %43, %47 : vector<4x8x8xf32>
    %49 = arith.truncf %48 : vector<4x8x8xf32> to vector<4x8x8xbf16>
    %50 = arith.truncf %48 : vector<4x8x8xf32> to vector<4x8x8xbf16>
    %c0_32 = arith.constant 0 : index
    %c0_33 = arith.constant 0 : index
    %c0_34 = arith.constant 0 : index
    %c0_35 = arith.constant 0 : index
    %51 = vector.load %arg17[%c0_32, %c0_33, %c0_34, %c0_35] : memref<1x4x8x8xbf16, #tpu.memory_space<vmem>>, vector<1x4x8x8xbf16>
    %52 = vector.shape_cast %51 : vector<1x4x8x8xbf16> to vector<4x8x8xbf16>
    %53 = vector.shape_cast %50 : vector<4x8x8xbf16> to vector<1x4x8x8xbf16>
    tpu.vector_store %arg17[%c0_32, %c0_33, %c0_34, %c0_35], %53 {strides = array<i32>} : memref<1x4x8x8xbf16, #tpu.memory_space<vmem>>, vector<1x4x8x8xbf16>,
    %c0_36 = arith.constant 0 : index
    %c0_37 = arith.constant 0 : index
    %c0_38 = arith.constant 0 : index
    %54 = vector.load %arg25[%c0_36, %c0_37, %c0_38] : memref<8x4x8xbf16, #tpu.memory_space<vmem>>, vector<8x4x8xbf16>
    "tpu.trace_start"() <{level = 10 : i32, message = "hij,jhc->ihc"}> : () -> ()
    %cst_39 = arith.constant dense<0.000000e+00> : vector<4x8x8xf32>
    %55 = tpu.matmul %54, %49, %cst_39 {dimension_numbers = #tpu.dot_dimension_numbers<[0], [2], [2], [1], [0, 1, 0, 2, 1, 1], [1], [0]>} : vector<8x4x8xbf16>, vector<4x8x8xbf16>, vector<4x8x8xf32> -> vector<4x8x8xf32>
    %56 = tpu.transpose %55, [2, 0, 1] : vector<4x8x8xf32> -> vector<8x4x8xf32>
    "tpu.trace_stop"() : () -> ()
    %57 = vector.shape_cast %56 : vector<8x4x8xf32> to vector<8x32xf32>
    %c0_40 = arith.constant 0 : index
    %c0_41 = arith.constant 0 : index
    %c0_42 = arith.constant 0 : index
    %58 = vector.load %arg14[%c0_40, %c0_41, %c0_42] : memref<1x8x32xf32, #tpu.memory_space<vmem>>, vector<1x8x32xf32>
    %59 = vector.shape_cast %58 : vector<1x8x32xf32> to vector<8x32xf32>
    %60 = vector.shape_cast %57 : vector<8x32xf32> to vector<1x8x32xf32>
    tpu.vector_store %arg14[%c0_40, %c0_41, %c0_42], %60 {strides = array<i32>} : memref<1x8x32xf32, #tpu.memory_space<vmem>>, vector<1x8x32xf32>,
    %61 = arith.index_cast %4 : i32 to index
    %c0_43 = arith.constant 0 : index
    %c0_44 = arith.constant 0 : index
    %62 = vector.load %arg21[%61, %c0_43, %c0_44] : memref<8x4x8xbf16, #tpu.memory_space<vmem>>, vector<8x4x8xbf16>
    %c0_45 = arith.constant 0 : index
    %c0_46 = arith.constant 0 : index
    %c0_47 = arith.constant 0 : index
    %63 = vector.load %arg26[%c0_45, %c0_46, %c0_47] : memref<8x4x8xbf16, #tpu.memory_space<vmem>>, vector<8x4x8xbf16>
    "tpu.trace_start"() <{level = 10 : i32, message = "ihc,jhc->hij"}> : () -> ()
    %cst_48 = arith.constant dense<0.000000e+00> : vector<4x8x8xf32>
    %64 = tpu.matmul %62, %63, %cst_48 {dimension_numbers = #tpu.dot_dimension_numbers<[2], [2], [0], [0], [0, 1, 0, 0, 1, 0], [1], [1]>} : vector<8x4x8xbf16>, vector<8x4x8xbf16>, vector<4x8x8xf32> -> vector<4x8x8xf32>
    "tpu.trace_stop"() : () -> ()
    %65 = vector.broadcast %6 : vector<1x1x8xf32> to vector<4x8x8xf32>
    %66 = arith.addf %64, %65 : vector<4x8x8xf32>
    %cst_49 = arith.constant dense<0xFF800000> : vector<4x8xf32>
    %67 = vector.multi_reduction <maximumf>, %66, %cst_49 [2] : vector<4x8x8xf32> to vector<4x8xf32>
    %68 = vector.shape_cast %67 : vector<4x8xf32> to vector<4x8x1xf32>
    %69 = vector.broadcast %68 : vector<4x8x1xf32> to vector<4x8x8xf32>
    %70 = arith.subf %66, %69 : vector<4x8x8xf32>
    %71 = math.exp %70 : vector<4x8x8xf32>
    %cst_50 = arith.constant dense<0.000000e+00> : vector<4x8xf32>
    %72 = vector.multi_reduction <add>, %71, %cst_50 [2] : vector<4x8x8xf32> to vector<4x8xf32>
    %73 = vector.shape_cast %72 : vector<4x8xf32> to vector<4x8x1xf32>
    %74 = tpu.reciprocal %73 : vector<4x8x1xf32> -> vector<4x8x1xf32>
    %75 = vector.broadcast %74 : vector<4x8x1xf32> to vector<4x8x8xf32>
    %76 = arith.mulf %71, %75 : vector<4x8x8xf32>
    %77 = arith.truncf %76 : vector<4x8x8xf32> to vector<4x8x8xbf16>
    %78 = arith.truncf %76 : vector<4x8x8xf32> to vector<4x8x8xbf16>
    %c0_51 = arith.constant 0 : index
    %c0_52 = arith.constant 0 : index
    %c0_53 = arith.constant 0 : index
    %c0_54 = arith.constant 0 : index
    %79 = vector.load %arg18[%c0_51, %c0_52, %c0_53, %c0_54] : memref<1x4x8x8xbf16, #tpu.memory_space<vmem>>, vector<1x4x8x8xbf16>
    %80 = vector.shape_cast %79 : vector<1x4x8x8xbf16> to vector<4x8x8xbf16>
    %81 = vector.shape_cast %78 : vector<4x8x8xbf16> to vector<1x4x8x8xbf16>
    tpu.vector_store %arg18[%c0_51, %c0_52, %c0_53, %c0_54], %81 {strides = array<i32>} : memref<1x4x8x8xbf16, #tpu.memory_space<vmem>>, vector<1x4x8x8xbf16>,
    %c0_55 = arith.constant 0 : index
    %c0_56 = arith.constant 0 : index
    %c0_57 = arith.constant 0 : index
    %82 = vector.load %arg27[%c0_55, %c0_56, %c0_57] : memref<8x4x8xbf16, #tpu.memory_space<vmem>>, vector<8x4x8xbf16>
    "tpu.trace_start"() <{level = 10 : i32, message = "hij,jhc->ihc"}> : () -> ()
    %cst_58 = arith.constant dense<0.000000e+00> : vector<4x8x8xf32>
    %83 = tpu.matmul %82, %77, %cst_58 {dimension_numbers = #tpu.dot_dimension_numbers<[0], [2], [2], [1], [0, 1, 0, 2, 1, 1], [1], [0]>} : vector<8x4x8xbf16>, vector<4x8x8xbf16>, vector<4x8x8xf32> -> vector<4x8x8xf32>
    %84 = tpu.transpose %83, [2, 0, 1] : vector<4x8x8xf32> -> vector<8x4x8xf32>
    "tpu.trace_stop"() : () -> ()
    %85 = vector.shape_cast %84 : vector<8x4x8xf32> to vector<8x32xf32>
    %c0_59 = arith.constant 0 : index
    %c0_60 = arith.constant 0 : index
    %c0_61 = arith.constant 0 : index
    %86 = vector.load %arg15[%c0_59, %c0_60, %c0_61] : memref<1x8x32xf32, #tpu.memory_space<vmem>>, vector<1x8x32xf32>
    %87 = vector.shape_cast %86 : vector<1x8x32xf32> to vector<8x32xf32>
    %88 = vector.shape_cast %85 : vector<8x32xf32> to vector<1x8x32xf32>
    tpu.vector_store %arg15[%c0_59, %c0_60, %c0_61], %88 {strides = array<i32>} : memref<1x8x32xf32, #tpu.memory_space<vmem>>, vector<1x8x32xf32>,
    return
  }
  func.func @transform_0(%arg0: i32, %arg1: i32) -> (i32, i32, i32) {
    %c0_i32 = arith.constant 0 : i32
    %c0_i32_0 = arith.constant 0 : i32
    %c0_i32_1 = arith.constant 0 : i32
    return %arg0, %c0_i32, %c0_i32_0 : i32, i32, i32
  }
  func.func @transform_1(%arg0: i32, %arg1: i32) -> (i32, i32, i32) {
    %c0_i32 = arith.constant 0 : i32
    %c0_i32_0 = arith.constant 0 : i32
    %c0_i32_1 = arith.constant 0 : i32
    return %arg0, %c0_i32, %c0_i32_0 : i32, i32, i32
  }
  func.func @transform_2(%arg0: i32, %arg1: i32) -> (i32, i32, i32) {
    %c0_i32 = arith.constant 0 : i32
    %c0_i32_0 = arith.constant 0 : i32
    %c0_i32_1 = arith.constant 0 : i32
    return %arg0, %c0_i32, %c0_i32_0 : i32, i32, i32
  }
  func.func @transform_3(%arg0: i32, %arg1: i32) -> (i32, i32, i32) {
    %c0_i32 = arith.constant 0 : i32
    %c0_i32_0 = arith.constant 0 : i32
    %c0_i32_1 = arith.constant 0 : i32
    return %arg0, %c0_i32, %c0_i32_0 : i32, i32, i32
  }
  func.func @transform_4(%arg0: i32, %arg1: i32) -> (i32, i32, i32) {
    %c0_i32 = arith.constant 0 : i32
    %c0_i32_0 = arith.constant 0 : i32
    %c0_i32_1 = arith.constant 0 : i32
    return %arg0, %c0_i32, %c0_i32_0 : i32, i32, i32
  }
  func.func @transform_5(%arg0: i32, %arg1: i32) -> (i32, i32) {
    %c0_i32 = arith.constant 0 : i32
    %c0_i32_0 = arith.constant 0 : i32
    %c0_i32_1 = arith.constant 0 : i32
    return %c0_i32, %c0_i32_0 : i32, i32
  }
  func.func @transform_6(%arg0: i32, %arg1: i32) -> (i32, i32) {
    %c0_i32 = arith.constant 0 : i32
    %c0_i32_0 = arith.constant 0 : i32
    %c0_i32_1 = arith.constant 0 : i32
    return %c0_i32, %c0_i32_0 : i32, i32
  }
  func.func @transform_7(%arg0: i32, %arg1: i32) -> (i32, i32) {
    %c0_i32 = arith.constant 0 : i32
    %c0_i32_0 = arith.constant 0 : i32
    %c0_i32_1 = arith.constant 0 : i32
    return %c0_i32, %c0_i32_0 : i32, i32
  }
  func.func @transform_8(%arg0: i32, %arg1: i32) -> (i32, i32) {
    %c0_i32 = arith.constant 0 : i32
    %c0_i32_0 = arith.constant 0 : i32
    %c0_i32_1 = arith.constant 0 : i32
    return %c0_i32, %c0_i32_0 : i32, i32
  }
  func.func @transform_9(%arg0: i32, %arg1: i32) -> (i32, i32) {
    %c0_i32 = arith.constant 0 : i32
    %c0_i32_0 = arith.constant 0 : i32
    %c0_i32_1 = arith.constant 0 : i32
    return %c0_i32, %c0_i32_0 : i32, i32
  }
  func.func @transform_10(%arg0: i32, %arg1: i32) -> (i32, i32) {
    %c0_i32 = arith.constant 0 : i32
    %c0_i32_0 = arith.constant 0 : i32
    %c0_i32_1 = arith.constant 0 : i32
    return %c0_i32, %c0_i32_0 : i32, i32
  }
  func.func @transform_11(%arg0: i32, %arg1: i32) -> (i32, i32, i32) {
    %c0_i32 = arith.constant 0 : i32
    %c0_i32_0 = arith.constant 0 : i32
    return %arg0, %arg1, %c0_i32 : i32, i32, i32
  }
  func.func @transform_12(%arg0: i32, %arg1: i32) -> (i32, i32, i32) {
    %c0_i32 = arith.constant 0 : i32
    %c0_i32_0 = arith.constant 0 : i32
    return %arg0, %arg1, %c0_i32 : i32, i32, i32
  }
  func.func @transform_13(%arg0: i32, %arg1: i32) -> (i32, i32, i32) {
    %c0_i32 = arith.constant 0 : i32
    %c0_i32_0 = arith.constant 0 : i32
    return %arg0, %arg1, %c0_i32 : i32, i32, i32
  }
  func.func @transform_14(%arg0: i32, %arg1: i32) -> (i32, i32, i32, i32) {
    %c0_i32 = arith.constant 0 : i32
    %c0_i32_0 = arith.constant 0 : i32
    %c0_i32_1 = arith.constant 0 : i32
    return %arg0, %c0_i32, %arg1, %c0_i32_0 : i32, i32, i32, i32
  }
  func.func @transform_15(%arg0: i32, %arg1: i32) -> (i32, i32, i32, i32) {
    %c0_i32 = arith.constant 0 : i32
    %c0_i32_0 = arith.constant 0 : i32
    %c0_i32_1 = arith.constant 0 : i32
    return %arg0, %c0_i32, %arg1, %c0_i32_0 : i32, i32, i32, i32
  }
  func.func @transform_16(%arg0: i32, %arg1: i32) -> (i32, i32, i32, i32) {
    %c0_i32 = arith.constant 0 : i32
    %c0_i32_0 = arith.constant 0 : i32
    %c0_i32_1 = arith.constant 0 : i32
    return %arg0, %c0_i32, %arg1, %c0_i32_0 : i32, i32, i32, i32
  }
}

</mosaic_0001>

<bundles_post_ra>
// kernel: tpu_custom_call.1
= control target key start
LH: loop header
LB: loop body
LE: loop exit
PB: predicated region body
PF: predicated region fallthrough
CT: control target
= control target key end

     0   :  { %s10674_s0 = inlined_call_operand.hbm [shape: bf16[2,8,32], index: 0, kind: input, shape index: {}]   ;;  %s10675_s1 = inlined_call_operand.hbm [shape: bf16[2,8,32], index: 1, kind: input, shape index: {}]   ;;  %s10676_s2 = inlined_call_operand.hbm [shape: bf16[2,8,32], index: 2, kind: input, shape index: {}]   ;;  %s10677_s3 = inlined_call_operand.vmem [shape: f32[2,1,8], index: 3, kind: input, shape index: {}]   ;;  %s10678_s4 = inlined_call_operand.hbm [shape: f32[2,1,8], index: 4, kind: input, shape index: {}]   ;;  %s10679_s5 = inlined_call_operand.vmem [shape: bf16[32,64], index: 5, kind: input, shape index: {}]   ;;  %s10680_s6 = inlined_call_operand.hbm [shape: f32[1,64], index: 6, kind: input, shape index: {}]   ;;  %s10681_s7 = inlined_call_operand.hbm [shape: bf16[32,64], index: 7, kind: input, shape index: {}]   ;;  %s10682_s8 = inlined_call_operand.hbm [shape: f32[1,64], index: 8, kind: input, shape index: {}]   ;;  %s10683_s9 = inlined_call_operand.vmem [shape: bf16[32,64], index: 9, kind: input, shape index: {}]   ;;  %s10684_s10 = inlined_call_operand.vmem [shape: f32[1,64], index: 10, kind: input, shape index: {}]   ;;  %s10685_s11 = inlined_call_operand.hbm [shape: f32[2,8,32], index: 11, kind: output, shape index: {0}]   ;;  %s10686_s12 = inlined_call_operand.hbm [shape: f32[2,8,32], index: 12, kind: output, shape index: {1}]   ;;  %s10687_s13 = inlined_call_operand.hbm [shape: f32[2,8,32], index: 13, kind: output, shape index: {2}]   ;;  %s10688_s14 = inlined_call_operand.hbm [shape: bf16[2,4,8,8], index: 14, kind: output, shape index: {3}]   ;;  %s10689_s15 = inlined_call_operand.hbm [shape: bf16[2,4,8,8], index: 15, kind: output, shape index: {4}]   ;;  %s10690_s16 = inlined_call_operand.hbm [shape: bf16[2,4,8,8], index: 16, kind: output, shape index: {5}]  }
   0x1   :  { %10735 = sst [smem:[#allocation58_spill]] %s10674_s0 }
   0x2   :  { %10736 = sst [smem:[#allocation59_spill]] %s10675_s1 }
   0x3   :  { %10737 = sst [smem:[#allocation60_spill]] %s10677_s3 }
   0x4   :  { %10738 = sst [smem:[#allocation61_spill]] %s10680_s6 }
   0x5   :  { %10739 = sst [smem:[#allocation62_spill]] %s10681_s7 }
   0x6   :  { %10740 = sst [smem:[#allocation63_spill]] %s10683_s9 }
   0x7   :  { %10741 = sst [smem:[#allocation64_spill]] %s10684_s10 }
   0x8   :  { %10742 = sst [smem:[#allocation65_spill]] %s10685_s11 }
   0x9   :  { %10743 = sst [smem:[#allocation66_spill]] %s10686_s12 }
   0xa   :  { %10744 = sst [smem:[#allocation67_spill]] %s10687_s13 }
   0xb   :  { %10745 = sst [smem:[#allocation68_spill]] %s10688_s14 }
   0xc   :  { %10746 = sst [smem:[#allocation69_spill]] %s10689_s15 }
   0xd   :  { %10747 = sst [smem:[#allocation70_spill]] %s10690_s16 }
   0xe   :  { %22 = vsyncpa [#allocation12], 0 }
   0xf   :  { %24 = vsyncpa [#allocation12 + $0x1], 0 }
  0x10   :  { %25 = vsyncpa [#allocation15], 0 }
  0x11   :  { %27 = vsyncpa [#allocation15 + $0x1], 0 }
  0x12   :  { %28 = vsyncpa [#allocation18], 0 }
  0x13   :  { %30 = vsyncpa [#allocation18 + $0x1], 0 }
  0x14   :  { %31 = vsyncpa [#allocation21], 0 }
  0x15   :  { %32 = vsyncpa [#allocation13], 0 }
  0x16   :  { %34 = vsyncpa [#allocation13 + $0x1], 0 }
  0x17   :  { %35 = vsyncpa [#allocation25], 0 }
  0x18   :  { %37 = vsyncpa [#allocation25 + $0x1], 0 }
  0x19   :  { %38 = vsyncpa [#allocation28], 0 }
  0x1a   :  { %40 = vsyncpa [#allocation28 + $0x1], 0 }
  0x1b   :  { %41 = vsyncpa [#allocation31], 0 }
  0x1c   :  { %43 = vsyncpa [#allocation31 + $0x1], 0  ;;  %s8770_s21 = smov 0   ;;  %s8772_s22 = smov 0  }
  0x1d   :  { %s8774_s23 = smov 0   ;;  %s8776_s24 = smov 0  }
  0x1e   :  { %s8778_s25 = smov 0   ;;  %s8780_s26 = smov 0  }
  0x1f LB: > { %10748 = sst [smem:[#allocation41_spill]] %s8631_s21  ;;  %s8801_s27 = sadd.s32 4294967295, %s8651_s26   ;;  %s8651_s26 = sphi %s8780_s26, %s49_s26   ;;  %s8647_s25 = sphi %s8778_s25, %s10831_s25   ;;  %s8643_s24 = sphi %s8776_s24, %s10830_s24   ;;  %s8639_s23 = sphi %s8774_s23, %s10826_s23   ;;  %s8635_s22 = sphi %s8772_s22, %s10829_s22   ;;  %s8631_s21 = sphi %s8770_s21, %s10828_s21  }
  0x20   : > { %10749 = sst [smem:[#allocation42_spill]] %s8639_s23  ;;  %s10692_s28 = sadd.s32 4294967294, %s8651_s26  }
  0x21   : > { %10750 = sst [smem:[#allocation43_spill]] %s8643_s24  ;;  %p81_p0 = scmp.ne.s32.totalorder %s8635_s22, %s8631_s21 }
  0x22   : > { %p10699_p1 = scmp.eq.s32.totalorder %s8801_s27, 0  ;;  %p343_p3 = scmp.eq.s32.totalorder %s10692_s28, 1 }
  0x23   : > { %p7653_p5 = scmp.ge.s32.totalorder %s8651_s26, 1  ;;  %p490_p7 = scmp.lt.s32.totalorder %s8651_s26, 3 }
  0x24   : > { %p8812_p4 = por %p10699_p1, %p81_p0  ;;  %p8817_p6 = por %p343_p3, %p81_p0 }
  0x25   : > { %p8822_p8 = pnand %p7653_p5, %p490_p7  ;;  %s8653_s17 = smov [#allocation19]  }
  0x26   : > { %s10751_s29 = scalar_select %p8812_p4, 1, 0 }
  0x27   : > { %s10752_s30 = scalar_select %p8817_p6, 1, 0 }
  0x28   : > { %s10754_s0 = scalar_select %p8822_p8, 1, 0 }
  0x29   : > { %10753 = sst [smem:[#allocation44_spill]] %s10752_s30  ;;  %s506_s18 = sshll.u32 %s8653_s17, 4  ;;  %s507_s18 = int_to_ptr.vmem [resolvable:$true] %s506_s18 }
  0x2a   : > { %p7999_p10 = pneg %p8822_p8  ;;  %s8654_s19 = smov [#allocation20]  }
  0x2b   : > { %s516_s20 = sshll.u32 %s8654_s19, 4  ;;  %s10756_s6 = sld [smem:[#allocation61_spill]]  ;;  %s8835_s20 = int_to_ptr.vmem [resolvable:$true] %s516_s20 }
  0x2c   : > { %p8831_p11 = pnand %p7999_p10, %p10699_p1 }
  0x2e   : > { %s10755_s28 = scalar_select %p8831_p11, 1, 0 }
  0x2f   : > { %p8845_p13 = pneg %p8831_p11 }
  0x31   : > { %s8197_s13 = scalar_lea.hbm %s10756_s6, 16 }
  0x32   : > { %p8198_p12 = scmp.ne.s32.totalorder %s10756_s6, %s8197_s13  ;;  %p8204_p5 = scmp.lt.u32.totalorder %s8197_s13, %s10756_s6 }
  0x33   : > { %s10757_s12 = scalar_select %p8845_p13, 1, 0 }
  0x34   : > { %p8200_p0 = pnand %p8845_p13, %p8198_p12 }
  0x36   : > { %p8201_p3 = pneg %p8200_p0 }
  0x38   : > { %p8206_p7 = pnand %p8204_p5, %p8201_p3 }
  0x3a   : > { %8209 = shalt.err (!%p8206_p7)
}
  0x3b   : > { %s8210_s21 = scalar_lea.vmem %s507_s18, 16  ;;  %s8217_s11 = scalar_lea.vmem %s507_s18, 32 }
  0x3c   : > { %p8211_p10 = scmp.ne.s32.totalorder %s507_s18, %s8210_s21  ;;  %p8218_p2 = scmp.lt.s32.totalorder %s507_s18, %s507_s18 }
  0x3d   : > { %p8219_p6 = scmp.lt.s32.totalorder %s8217_s11, %s8210_s21 }
  0x3e   : > { %p8213_p9 = pnand %p8211_p10, %p8845_p13 }
  0x3f   : > { %p8220_p4 = por %p8219_p6, %p8218_p2 }
  0x40   : > { %p8214_p1 = pneg %p8213_p9 }
  0x42   : > { %p8221_p8 = pnand %p8220_p4, %p8214_p1 }
  0x44   : > { %8224 = shalt.err (!%p8221_p8)
}
  0x45   : > { %8002 = dma.hbm_to_vmem [thread:$0]  (!%p8831_p11), %s10756_s6, 16, %s507_s18, [#allocation18]  }
  0x46   : > { %s10758_s7 = sld [smem:[#allocation62_spill]] }
  0x4c   : > { %s8225_s19 = scalar_lea.hbm %s10758_s7, 256 }
  0x4d   : > { %p8226_p9 = scmp.ne.s32.totalorder %s10758_s7, %s8225_s19  ;;  %p8232_p1 = scmp.lt.u32.totalorder %s8225_s19, %s10758_s7 }
  0x4f   : > { %p8228_p12 = pnand %p8226_p9, %p8845_p13 }
  0x51   : > { %p8229_p2 = pneg %p8228_p12 }
  0x53   : > { %p8234_p4 = pnand %p8232_p1, %p8229_p2 }
  0x55   : > { %8237 = shalt.err (!%p8234_p4)
}
  0x56   : > { %s8238_s18 = scalar_lea.vmem %s8835_s20, 256  ;;  %p8246_p3 = scmp.lt.s32.totalorder %s8835_s20, %s8835_s20 }
  0x57   : > { %p8239_p6 = scmp.ne.s32.totalorder %s8835_s20, %s8238_s18  ;;  %p8247_p5 = scmp.lt.s32.totalorder %s8238_s18, %s8238_s18 }
  0x59   : > { %p8241_p8 = pnand %p8239_p6, %p8845_p13  ;;  %p8248_p7 = por %p8247_p5, %p8246_p3 }
  0x5b   : > { %p8242_p0 = pneg %p8241_p8 }
  0x5d   : > { %p8249_p10 = pnand %p8248_p7, %p8242_p0 }
  0x5f   : > { %8252 = shalt.err (!%p8249_p10)
}
  0x60   : > { %s8655_s14 = smov 64   ;;  %s8656_s15 = smov 4  }
  0x61   : > { %8005 = dma.hbm_to_vmem [thread:$0]  (!%p8831_p11), %s10758_s7, 256, %s8835_s20, [#allocation21], %s8655_s14, %s8655_s14, %s8656_s15  }
  0x62   : > { %s61_s13 = sadd.s32 1, %s8647_s25  ;;  %s68_s16 = sadd.s32 1, %s8639_s23 }
  0x63   : > { %p63_p9 = scmp.ge.s32.totalorder %s61_s13, 2  ;;  %p75_p12 = scmp.ne.s32.totalorder %s8639_s23, %s8635_s22 }
  0x64   : > { %p76_p2 = scmp.eq.s32.totalorder %s8651_s26, 0  ;;  %p8044_p1 = scmp.lt.s32.totalorder %s8651_s26, 2 }
  0x65   : > { %s10833_s13 = smov (%p63_p9, %s61_s13), 0  ;;  %p10760_p6 = scmp.eq.s32.totalorder %s8801_s27, 1 }
  0x66   : > { %10759 = sst [smem:[#allocation45_spill]] %s10833_s13  ;;  %p77_p4 = por %p76_p2, %p75_p12 }
  0x67   : > { %p8894_p8 = por %p10760_p6, %p75_p12  ;;  %s65_s21 = ssub.s32 %s8647_s25, %s10833_s13 }
  0x68   : > { %s8901_s20 = sand.u32 1, %s8639_s23   ;;  %p66_p0 = scmp.eq.s32.totalorder %s65_s21, 0 }
  0x69   : > { %s10761_s19 = scalar_select %p8894_p8, 1, 0 }
  0x6a   : > { %s8904_s11 = sshll.u32 %s8901_s20, 2  ;;  %s8907_s18 = sshll.u32 %s8647_s25, 6 }
  0x6b   : > { %10762 = sst [smem:[#allocation46_spill]] %s10761_s19  ;;  %p8909_p3 = pnand %p8044_p1, %p77_p4 }
  0x6c   : > { %s8914_s15 = scalar_select %p66_p0, %s8639_s23, %s68_s16  }
  0x6d   : > { %s10763_s14 = scalar_select %p8909_p3, 1, 0 }
  0x6e   : > { %10764 = sst [smem:[#allocation47_spill]] %s8914_s15  ;;  %s10708_s30 = sand.u32 1, %s8651_s26  }
  0x6f   : > { %s10765_s1 = sld [smem:[#allocation59_spill]]  ;;  %s569_s21 = scalar_lea.vmem [#allocation14], %s8904_s11 }
  0x70   : > { %s576_s13 = sshll.u32 %s569_s21, 4  ;;  %s8928_s19 = scalar_lea.sflag [#allocation15], %s10708_s30  ;;  %s8924_s13 = int_to_ptr.vmem [resolvable:$true] %s576_s13 }
  0x71   : > { %p8934_p7 = pneg %p8909_p3 }
  0x75   : > { %s8921_s7 = scalar_lea.hbm %s10765_s1, %s8907_s18  ;;  %s8258_s21 = scalar_lea.hbm %s10765_s1, 128 }
  0x76   : > { %s8253_s3 = scalar_lea.hbm %s8921_s7, 64  ;;  %p8259_p12 = scmp.lt.u32.totalorder %s8921_s7, %s10765_s1 }
  0x77   : > { %p8254_p5 = scmp.ne.s32.totalorder %s8921_s7, %s8253_s3  ;;  %p8260_p2 = scmp.lt.u32.totalorder %s8258_s21, %s8253_s3 }
  0x78   : > { %p8262_p4 = scmp.lt.u32.totalorder %s8253_s3, %s8921_s7 }
  0x79   : > { %p8256_p10 = pnand %p8934_p7, %p8254_p5  ;;  %p8261_p1 = por %p8260_p2, %p8259_p12 }
  0x7b   : > { %p8257_p9 = pneg %p8256_p10  ;;  %p8263_p6 = por %p8262_p4, %p8261_p1 }
  0x7d   : > { %p8264_p0 = pnand %p8263_p6, %p8257_p9 }
  0x7f   : > { %8267 = shalt.err (!%p8264_p0)
}
  0x80   : > { %s8268_s30 = scalar_lea.vmem %s8924_s13, 64  ;;  %s8657_s6 = smov [#allocation14]  }
  0x81   : > { %p8269_p5 = scmp.ne.s32.totalorder %s8924_s13, %s8268_s30  ;;  %s8273_s17 = sshll.u32 %s8657_s6, 4  ;;  %s8274_s17 = int_to_ptr.vmem [resolvable:$false] %s8273_s17 }
  0x82   : > { %s8275_s23 = scalar_lea.vmem %s8274_s17, 128  ;;  %p8276_p11 = scmp.lt.s32.totalorder %s8924_s13, %s8274_s17 }
  0x83   : > { %p8271_p10 = pnand %p8269_p5, %p8934_p7  ;;  %p8277_p13 = scmp.lt.s32.totalorder %s8275_s23, %s8268_s30 }
  0x85   : > { %p8272_p8 = pneg %p8271_p10  ;;  %p8278_p12 = por %p8277_p13, %p8276_p11 }
  0x87   : > { %p8279_p2 = pnand %p8278_p12, %p8272_p8 }
  0x89   : > { %8282 = shalt.err (!%p8279_p2)
}
  0x8a   : > { %8015 = dma.hbm_to_vmem [thread:$0]  (!%p8909_p3), %s8921_s7, 64, %s8924_s13, %s8928_s19  }
  0x8b   : > { %s8658_s3 = smov [#allocation22]   ;;  %s10767_s1 = sld [smem:[#allocation58_spill]] }
  0x8c   : > { %s530_s15 = sshll.u32 %s8658_s3, 4  ;;  %s8283_s23 = scalar_lea.hbm %s10682_s8, 16  ;;  %s531_s15 = int_to_ptr.vmem [resolvable:$true] %s530_s15 }
  0x8d   : > { %p8284_p11 = scmp.ne.s32.totalorder %s10682_s8, %s8283_s23  ;;  %p10768_p13 = scmp.ne.s32.totalorder %s10757_s12, 0 }
  0x8e   : > { %p8290_p1 = scmp.lt.u32.totalorder %s8283_s23, %s10682_s8 }
  0x8f   : > { %p8286_p8 = pnand %p8284_p11, %p10768_p13 }
  0x91   : > { %s8962_s24 = scalar_lea.hbm %s10767_s1, %s8907_s18  ;;  %p8287_p9 = pneg %p8286_p8 }
  0x93   : > { %p8292_p4 = pnand %p8290_p1, %p8287_p9 }
  0x95   : > { %8295 = shalt.err (!%p8292_p4)
}
  0x96   : > { %s8296_s3 = scalar_lea.vmem %s531_s15, 16  ;;  %s8303_s21 = scalar_lea.vmem %s531_s15, 32 }
  0x97   : > { %p8297_p6 = scmp.ne.s32.totalorder %s531_s15, %s8296_s3  ;;  %p8304_p10 = scmp.lt.s32.totalorder %s531_s15, %s531_s15 }
  0x98   : > { %p8305_p12 = scmp.lt.s32.totalorder %s8303_s21, %s8296_s3 }
  0x99   : > { %p8299_p0 = pnand %p8297_p6, %p10768_p13 }
  0x9a   : > { %p8306_p2 = por %p8305_p12, %p8304_p10 }
  0x9b   : > { %p8300_p5 = pneg %p8299_p0 }
  0x9d   : > { %p8307_p3 = pnand %p8306_p2, %p8300_p5 }
  0x9f   : > { %8310 = shalt.err (!%p8307_p3)
}
  0xa0   : > { %p10769_p11 = scmp.ne.s32.totalorder %s10755_s28, 0  ;;  %s551_s12 = scalar_lea.vmem [#allocation11], %s8904_s11 }
  0xa1   : > { %s558_s6 = sshll.u32 %s551_s12, 4  ;;  %s8989_s28 = scalar_lea.hbm %s10676_s2, %s8907_s18  ;;  %s8983_s6 = int_to_ptr.vmem [resolvable:$true] %s558_s6 }
  0xa2   : > { %8008 = dma.hbm_to_vmem [thread:$0]  (!%p10769_p11), %s10682_s8, 16, %s531_s15, [#allocation21]  }
  0xa3   : > { %s548_s23 = scalar_lea.sflag [#allocation12], %s8901_s20  ;;  %s8311_s7 = scalar_lea.hbm %s8962_s24, 64 }
  0xa4   : > { %p8312_p3 = scmp.ne.s32.totalorder %s8962_s24, %s8311_s7  ;;  %s8316_s21 = scalar_lea.hbm %s10767_s1, 128 }
  0xa5   : > { %p8317_p9 = scmp.lt.u32.totalorder %s8962_s24, %s10767_s1  ;;  %p8318_p1 = scmp.lt.u32.totalorder %s8316_s21, %s8311_s7 }
  0xa6   : > { %p8314_p13 = pnand %p8312_p3, %p8934_p7  ;;  %p8320_p6 = scmp.lt.u32.totalorder %s8311_s7, %s8962_s24 }
  0xa7   : > { %p8319_p4 = por %p8318_p1, %p8317_p9 }
  0xa8   : > { %p8315_p8 = pneg %p8314_p13 }
  0xa9   : > { %p8321_p0 = por %p8320_p6, %p8319_p4 }
  0xab   : > { %p8322_p5 = pnand %p8321_p0, %p8315_p8 }
  0xad   : > { %8325 = shalt.err (!%p8322_p5)
}
  0xae   : > { %s8326_s18 = scalar_lea.vmem %s8983_s6, 64  ;;  %s8659_s10 = smov [#allocation11]  }
  0xaf   : > { %p8327_p10 = scmp.ne.s32.totalorder %s8983_s6, %s8326_s18  ;;  %s8331_s12 = sshll.u32 %s8659_s10, 4  ;;  %s8332_s12 = int_to_ptr.vmem [resolvable:$false] %s8331_s12 }
  0xb0   : > { %s8333_s30 = scalar_lea.vmem %s8332_s12, 128  ;;  %p8334_p11 = scmp.lt.s32.totalorder %s8983_s6, %s8332_s12 }
  0xb1   : > { %p8329_p12 = pnand %p8327_p10, %p8934_p7  ;;  %p8335_p3 = scmp.lt.s32.totalorder %s8333_s30, %s8326_s18 }
  0xb3   : > { %p8330_p2 = pneg %p8329_p12  ;;  %p8336_p13 = por %p8335_p3, %p8334_p11 }
  0xb5   : > { %p8337_p9 = pnand %p8336_p13, %p8330_p2 }
  0xb7   : > { %8340 = shalt.err (!%p8337_p9)
}
  0xb8   : > { %p10770_p8 = scmp.ne.s32.totalorder %s10763_s14, 0  ;;  %s587_s17 = scalar_lea.vmem [#allocation16], %s8904_s11 }
  0xb9   : > { %s594_s7 = sshll.u32 %s587_s17, 4  ;;  %s7664_s13 = sshll.u32 %s8647_s25, 4  ;;  %s595_s7 = int_to_ptr.vmem [resolvable:$true] %s594_s7 }
  0xba   : > { %8012 = dma.hbm_to_vmem [thread:$0]  (!%p10770_p8), %s8962_s24, 64, %s8983_s6, %s548_s23  }
  0xbb   : > { %s8341_s3 = scalar_lea.hbm %s8989_s28, 64  ;;  %s8346_s9 = scalar_lea.hbm %s10676_s2, 128 }
  0xbc   : > { %p8342_p1 = scmp.ne.s32.totalorder %s8989_s28, %s8341_s3  ;;  %p8347_p0 = scmp.lt.u32.totalorder %s8989_s28, %s10676_s2 }
  0xbd   : > { %p8348_p5 = scmp.lt.u32.totalorder %s8346_s9, %s8341_s3  ;;  %p8350_p12 = scmp.lt.u32.totalorder %s8341_s3, %s8989_s28 }
  0xbe   : > { %p8344_p4 = pnand %p8342_p1, %p8934_p7 }
  0xbf   : > { %p8349_p10 = por %p8348_p5, %p8347_p0 }
  0xc0   : > { %p8345_p6 = pneg %p8344_p4 }
  0xc1   : > { %p8351_p2 = por %p8350_p12, %p8349_p10 }
  0xc3   : > { %p8352_p11 = pnand %p8351_p2, %p8345_p6 }
  0xc5   : > { %8355 = shalt.err (!%p8352_p11)
}
  0xc6   : > { %s8356_s24 = scalar_lea.vmem %s595_s7, 64  ;;  %s8660_s11 = smov [#allocation16]  }
  0xc7   : > { %p8357_p3 = scmp.ne.s32.totalorder %s595_s7, %s8356_s24  ;;  %s8361_s6 = sshll.u32 %s8660_s11, 4  ;;  %s8362_s6 = int_to_ptr.vmem [resolvable:$false] %s8361_s6 }
  0xc8   : > { %s8363_s23 = scalar_lea.vmem %s8362_s6, 128  ;;  %p8364_p1 = scmp.lt.s32.totalorder %s595_s7, %s8362_s6 }
  0xc9   : > { %p8359_p13 = pnand %p8357_p3, %p8934_p7  ;;  %p8365_p4 = scmp.lt.s32.totalorder %s8363_s23, %s8356_s24 }
  0xcb   : > { %p8360_p9 = pneg %p8359_p13  ;;  %p8366_p8 = por %p8365_p4, %p8364_p1 }
  0xcd   : > { %p8367_p0 = pnand %p8366_p8, %p8360_p9 }
  0xcf   : > { %8370 = shalt.err (!%p8367_p0)
}
  0xd0   : > { %p10771_p5 = scmp.ne.s32.totalorder %s10763_s14, 0  ;;  %s9036_s17 = scalar_lea.hbm %s10678_s4, %s7664_s13 }
  0xd1   : > { %s610_s3 = scalar_lea.vmem [#allocation17], %s8901_s20  ;;  %s10772_s15 = sand.u32 1, %s8651_s26  }
  0xd2   : > { %8018 = dma.hbm_to_vmem [thread:$0]  (!%p10771_p5), %s8989_s28, 64, %s595_s7, %s8928_s19  }
  0xd3   : > { %s617_s21 = sshll.u32 %s610_s3, 4  ;;  %s608_s9 = scalar_lea.sflag [#allocation18], %s10772_s15  ;;  %s618_s21 = int_to_ptr.vmem [resolvable:$true] %s617_s21 }
  0xd4   : > { %s8371_s18 = scalar_lea.hbm %s9036_s17, 16  ;;  %s8376_s7 = scalar_lea.hbm %s10678_s4, 32 }
  0xd5   : > { %p8372_p8 = scmp.ne.s32.totalorder %s9036_s17, %s8371_s18  ;;  %p8377_p12 = scmp.lt.u32.totalorder %s9036_s17, %s10678_s4 }
  0xd6   : > { %p8378_p2 = scmp.lt.u32.totalorder %s8376_s7, %s8371_s18  ;;  %p8380_p3 = scmp.lt.u32.totalorder %s8371_s18, %s9036_s17 }
  0xd7   : > { %p8374_p6 = pnand %p8372_p8, %p8934_p7 }
  0xd8   : > { %p8379_p11 = por %p8378_p2, %p8377_p12 }
  0xd9   : > { %p8375_p10 = pneg %p8374_p6 }
  0xda   : > { %p8381_p13 = por %p8380_p3, %p8379_p11 }
  0xdc   : > { %p8382_p9 = pnand %p8381_p13, %p8375_p10 }
  0xde   : > { %8385 = shalt.err (!%p8382_p9)
}
  0xdf   : > { %s8386_s20 = scalar_lea.vmem %s618_s21, 16  ;;  %s8661_s24 = smov [#allocation17]  }
  0xe0   : > { %p8387_p1 = scmp.ne.s32.totalorder %s618_s21, %s8386_s20  ;;  %s8391_s11 = sshll.u32 %s8661_s24, 4  ;;  %s8392_s11 = int_to_ptr.vmem [resolvable:$false] %s8391_s11 }
  0xe1   : > { %s8393_s6 = scalar_lea.vmem %s8392_s11, 32  ;;  %p8394_p8 = scmp.lt.s32.totalorder %s618_s21, %s8392_s11 }
  0xe2   : > { %p8389_p4 = pnand %p8387_p1, %p8934_p7  ;;  %p8395_p6 = scmp.lt.s32.totalorder %s8393_s6, %s8386_s20 }
  0xe4   : > { %p8390_p0 = pneg %p8389_p4  ;;  %p8396_p5 = por %p8395_p6, %p8394_p8 }
  0xe6   : > { %p8397_p2 = pnand %p8396_p5, %p8390_p0 }
  0xe8   : > { %8400 = shalt.err (!%p8397_p2)
}
  0xe9   : > { %p10773_p12 = scmp.ne.s32.totalorder %s10763_s14, 0  ;;  %p10774_p10 = scmp.ne.s32.totalorder %s10754_s0, 0 }
  0xeb   : > { %8021 = dma.hbm_to_vmem [thread:$0]  (!%p10773_p12), %s9036_s17, 16, %s618_s21, %s608_s9  }
  0xec   : > { %626 = sbr.rel (%p10774_p10) target bundleno = 3666 (0xe52), region = 64 }
  0xf3   : > { %s9061_s16 = sand.u32 1, %s8635_s22   ;;  %p10775_p7 = scmp.ne.s32.totalorder %s10751_s29, 0 }
  0xf4   : > { %s9064_s23 = sshll.u32 %s9061_s16, 2  ;;  %s629_s12 = scalar_lea.sflag [#allocation12], %s9061_s16 }
  0xf5   : > { %s632_s30 = scalar_lea.vmem [#allocation11], %s9064_s23 }
  0xf6   : > { %8594 = dma.done.wait (%p10775_p7), %s629_s12, 64  }
  0xf7   : > { %8596 = vsyncadd (%p10775_p7), %s629_s12, 4294967232  ;;  %s9073_s0 = sand.u32 1, %s8801_s27   ;;  %s641_s17 = scalar_lea.vmem [#allocation14], %s9064_s23 }
  0xf8   : > { %s638_s14 = scalar_lea.sflag [#allocation15], %s9073_s0 }
  0xf9   : > { %8598 = dma.done.wait (%p10775_p7), %s638_s14, 128  }
  0xfa   : > { %8600 = vsyncadd (%p10775_p7), %s638_s14, 4294967168  ;;  %s650_s3 = scalar_lea.vmem [#allocation16], %s9064_s23  ;;  %s656_s21 = scalar_lea.sflag [#allocation18], %s9073_s0 }
  0xfb   : > { %s658_s15 = scalar_lea.vmem [#allocation17], %s9061_s16 }
  0xfc   : > { %8602 = dma.done.wait (%p10775_p7), %s656_s21, 16  }
  0xfd   : > { %8604 = vsyncadd (%p10775_p7), %s656_s21, 4294967280  ;;  %p10776_p5 = scmp.eq.s32.totalorder %s8801_s27, 0 }
  0xff   : > { %8606 = dma.done.wait (%p10776_p5), [#allocation18], 16   ;;  %p10777_p11 = pmov %p10776_p5 }
 0x100   : > { %p10778_p3 = pmov %p10776_p5 }
 0x101   : > { %8608 = vsyncadd (%p10777_p11), [#allocation18], 4294967280 }
 0x102   : > { %8610 = dma.done.wait (%p10778_p3), [#allocation21], 272   ;;  %p10779_p13 = pmov %p10778_p3 }
 0x103   : > { %v10717_v0 = vmov 0.0   ;;  %vm8663_vm0 = vmmov 0   ;;  %v8119_v1 = vld [vmem:[%s10679_s5] sm:$0xff]   ;;  %v8120_v2 = vld [vmem:[%s10679_s5 + $0x8] sm:$0xff]   ;;  %v769_v3 = vld [vmem:[%s632_s30] sm:$0xf]  ;;  %v848_v32 = vlaneseq }
 0x104   : > { %8612 = vsyncadd (%p10779_p13), [#allocation21], 4294967024  ;;  %7799 = vmatprep.subr.bf16.mxu0 %v10717_v0  ;;  %7803 = vmatprep.mubr.msk.bf16.mxu0 %vm8663_vm0, %v10717_v0  ;;  %vm793_vm1 = vcmask 261120   ;;  %s10780_s7 = sld [smem:[#allocation63_spill]]  ;;  %v1526_v6 = vld [vmem:[%s650_s3] sm:$0xf] }
 0x105   : > { %7807 = vmatprep.subr.bf16.mxu1 %v10717_v0  ;;  %7811 = vmatprep.mubr.msk.bf16.mxu1 %vm8663_vm0, %v10717_v0  ;;  %s10781_s11 = sld [smem:[#allocation64_spill]]  ;;  %v7678_v12 = vld [vmem:[#allocation19] ss:$0 sm:$0xff]  ;;  %s8664_s6 = smov 116   ;;  %v8123_v21 = vld [vmem:[#allocation20] sm:$0xff]   ;;  %v8124_v22 = vld [vmem:[#allocation20 + $0x8] sm:$0xff]  }
 0x106   : > { %7800 = vmatpush3.bf16.msra.mxu0 %v8119_v1  ;;  %s8665_s12 = smov 120   ;;  %s8666_s30 = smov 124   ;;  %7808 = vmatpush3.bf16.msra.mxu1 %v8123_v21  ;;  %v1148_v23 = vld [vmem:[%s641_s17] sm:$0xf]  ;;  %v8668_v30 = vmov 1983009808  }
 0x107   : > { %7801 = vmatprep.subr.bf16.mxu0 %v10717_v0  ;;  %7809 = vmatprep.subr.bf16.mxu1 %v10717_v0  ;;  %s8667_s14 = smov 96   ;;  %v846_v31 = vunpack.c.l.s4 %v8668_v30  ;;  %v849_v35 = vshrl.u32 %v848_v32, 7  ;;  %v8669_v36 = vmov 1934713408   ;;  %s8670_s23 = smov 4   ;;  %v10719_v61 = vmov 0  }
 0x108   : > { %v863_v37 = vunpack.c.l.s4 %v8669_v36  ;;  %vm1945_vm2 = vcmask 31744   ;;  %vm1904_vm3 = vcmask 58368   ;;  %s8672_s17 = smov 104   ;;  %s8673_s3 = smov 112   ;;  %vm2719_vm4 = vcmask 1043456  }
 0x109   : > { %v847_v34 = vunpack.c.0.s8 %v846_v31  ;;  %s8674_s21 = smov 80   ;;  %vm2715_vm5 = vcmask 64512   ;;  %s10793_s29 = sld [smem:[#allocation43_spill]]  ;;  %vm2973_vm6 = vcmask 60416  }
 0x10a   : > { %7802 = vmatpush3.bf16.msra.mxu0 %v8120_v2  ;;  %v8121_v4 = vld [vmem:[%s10780_s7] sm:$0xff]   ;;  %v8122_v5 = vld [vmem:[%s10780_s7 + $0x8] sm:$0xff]   ;;  %7810 = vmatpush3.bf16.msra.mxu1 %v8124_v22  ;;  %v864_v40 = vunpack.c.0.s8 %v863_v37  ;;  %s10794_s19 = sld [smem:[#allocation60_spill]]  ;;  %s9709_s13 = sshll.u32 %s9061_s16, 4 }
 0x10b   : > { %7815 = vmatprep.subr.bf16.mxu0 %v10717_v0  ;;  %v7686_v11 = vld [vmem:[%s10781_s11] ss:$0 sm:$0xff]  ;;  %7823 = vmatprep.subr.bf16.mxu1 %v10717_v0  ;;  %v9178_v39 = vsub.s32 %v847_v34, %v849_v35  ;;  %s9721_s10 = scalar_lea.vmem [#allocation27], %s9709_s13  ;;  %s10071_s20 = scalar_lea.vmem [#allocation29], %s9709_s13 }
 0x10c   : > { %v9182_v44 = vsub.s32 %v864_v40, %v849_v35  ;;  %s8675_s24 = smov 8   ;;  %s10733_s11 = smov 16  }
 0x10d   : > { %7804 = vmatmul.mubr.msk.bf16.vlgmr.msra.gmra.mrb[0].mxu0 %vm793_vm1, %v769_v3  ;;  %7812 = vmatmul.mubr.msk.bf16.vlgmr.msra.gmra.mrb[0].mxu1 %vm793_vm1, %v1148_v23  ;;  %s10407_s27 = sshll.u32 %s9061_s16, 3 }
 0x10e   : > { %7816 = vmatpush3.bf16.msra.mxu0 %v8121_v4  ;;  %7819 = vmatprep.mubr.msk.bf16.mxu0 %vm8663_vm0, %v10717_v0 }
 0x10f   : > { %7817 = vmatprep.subr.bf16.mxu0 %v10717_v0  ;;  %7825 = vmatprep.mubr.msk.bf16.mxu1 %vm8663_vm0, %v10717_v0  ;;  %p761_p9 = scmp.lt.s32.totalorder %s10793_s29, 1 }
 0x111   : > { %s762_s9 = scalar_select %p761_p9, %s10793_s29, 1 }
 0x112   : > { %7818 = vmatpush3.bf16.msra.mxu0 %v8122_v5 }
 0x113   : > { %7829 = vmatprep.subr.bf16.mxu0 %v10717_v0  ;;  %s763_s28 = scalar_lea.vmem %s10794_s19, %s762_s9  ;;  %s10808_s9 = sld [smem:[#allocation68_spill]] }
 0x114   : > { %s7201_s19 = scalar_lea.sflag [#allocation28], %s9073_s0 }
 0x115   : > { %7820 = vmatmul.mubr.msk.bf16.vlgmr.msra.gmra.mrb[4].mxu0 %vm793_vm1, %v1526_v6 }
 0x116   : > { %7831 = vmatprep.mubr.msk.bf16.mxu0 %vm8663_vm0, %v10717_v0 }
 0x1e0   : > { %v831_v7 = vpop.f32.mrb[0].mxu0 }
 0x1e1   : > { %v7805_v8 = vpop.f32.mrb[1].mxu0  ;;  %v832_v17 = vadd.f32 %v7678_v12, %v831_v7 }
 0x1e2   : > { %v834_v9 = vpop.f32.mrb[2].mxu0 }
 0x1e3   : > { %v7806_v10 = vpop.f32.mrb[3].mxu0  ;;  %v9133_v20 = vpack.c.bf16 %v832_v17, %v832_v17 }
 0x1e8   : > { %v1587_v13 = vpop.f32.mrb[4].mxu0 }
 0x1e9   : > { %v1588_v14 = vadd.f32 %v7686_v11, %v1587_v13  ;;  %v7821_v15 = vpop.f32.mrb[5].mxu0 }
 0x1ea   : > { %v1590_v16 = vpop.f32.mrb[6].mxu0 }
 0x1eb   : > { %v9127_v18 = vpack.c.bf16 %v1588_v14, %v1588_v14  ;;  %v7822_v19 = vpop.f32.mrb[7].mxu0  ;;  %v9201_v14 = vpop.f32.mrb[0].mxu1 }
 0x1ec   : > { %v7813_v15 = vpop.f32.mrb[1].mxu1 }
 0x1ed   : > { %10782 = vst [vmem:[#allocation48_spill] sm:$0xff] %v9127_v18  ;;  %1702 = vrot.lane.b32.xlu1 %v9127_v18, %s8664_s6  ;;  %1595 = vrot.lane.b32.xlu0 %v9127_v18, %s8665_s12  ;;  %v1212_v16 = vpop.f32.mrb[2].mxu1 }
 0x1ee   : > { %v7814_v17 = vpop.f32.mrb[3].mxu1 }
 0x1f1   : > { %839 = vrot.lane.b32.xlu1 %v9133_v20, %s8665_s12  ;;  %1700 = vrot.lane.b32.xlu0 %v9127_v18, %s8666_s30 }
 0x1f5   : > { %946 = vrot.lane.b32.xlu1 %v9133_v20, %s8664_s6  ;;  %944 = vrot.lane.b32.xlu0 %v9133_v20, %s8666_s30 }
 0x1f9   : > { %1704 = vrot.lane.b32.xlu0 %v9127_v18, %s8667_s14 }
 0x25f   : > { %v9152_v24 = vpop.permute.xlu0 %1595  ;;  %v9156_v25 = vpop.permute.xlu1 %1702 }
 0x260   : > { %10783 = vst [vmem:[#allocation49_spill] sm:$0xff] %v9152_v24  ;;  %1708 = vrot.lane.b32.xlu0 %v9152_v24, %s8667_s14 }
 0x263   : > { %v9158_v26 = vpop.permute.xlu0 %1700  ;;  %v9164_v27 = vpop.permute.xlu1 %839 }
 0x264   : > { %948 = vrot.lane.b32.xlu0 %v9133_v20, %s8667_s14  ;;  %1706 = vrot.lane.b32.xlu1 %v9158_v26, %s8667_s14 }
 0x267   : > { %v9170_v28 = vpop.permute.xlu0 %944  ;;  %v9174_v29 = vpop.permute.xlu1 %946 }
 0x268   : > { %952 = vrot.lane.b32.xlu0 %v9164_v27, %s8667_s14  ;;  %1710 = vrot.lane.b32.xlu1 %v9156_v25, %s8667_s14 }
 0x26b   : > { %v1705_v33 = vpop.permute.xlu0 %1704 }
 0x26c   : > { %950 = vrot.lane.b32.xlu1 %v9170_v28, %s8667_s14  ;;  %v1719_v43 = vrot.slane %v1705_v33, %v9178_v39 }
 0x270   : > { %954 = vrot.lane.b32.xlu1 %v9174_v29, %s8667_s14 }
 0x2d2   : > { %v1709_v38 = vpop.permute.xlu0 %1708 }
 0x2d3   : > { %v1727_v41 = vrot.slane %v1709_v38, %v9178_v39 }
 0x2d5   : > { %v1728_v45 = vcombine.low %v1719_v43, %v1727_v41  ;;  %v1729_v49 = vcombine.high %v1719_v43, %v1727_v41 }
 0x2d6   : > { %v1707_v42 = vpop.permute.xlu1 %1706  ;;  %v949_v21 = vpop.permute.xlu0 %948 }
 0x2d7   : > { %v1753_v47 = vrot.slane %v1707_v42, %v9178_v39  ;;  %v1736_v50 = vrot.slane %v1728_v45, %v9182_v44  ;;  %v1743_v55 = vrot.slane %v1729_v49, %v9182_v44  ;;  %v963_v33 = vrot.slane %v949_v21, %v9178_v39 }
 0x2d9   : > { %v1783_v57 = vshrl.u32 %v1736_v50, 16  ;;  %v1795_v1 = vshrl.u32 %v1743_v55, 16  ;;  %v1744_v2 = vcombine.high %v1736_v50, %v10719_v61  ;;  %v1745_v8 = vcombine.high %v1743_v55, %v10719_v61 }
 0x2da   : > { %v1711_v46 = vpop.permute.xlu1 %1710  ;;  %v953_v23 = vpop.permute.xlu0 %952 }
 0x2db   : > { %v1761_v48 = vrot.slane %v1711_v46, %v9178_v39  ;;  %v1789_v7 = vshrl.u32 %v1744_v2, 16  ;;  %v1801_v12 = vshrl.u32 %v1745_v8, 16  ;;  %v971_v31 = vrot.slane %v953_v23, %v9178_v39  ;;  %v7682_v23 = vld [vmem:[#allocation22] ss:$0 sm:$0xff] }
 0x2dd   : > { %v1762_v51 = vcombine.low %v1753_v47, %v1761_v48  ;;  %v1763_v52 = vcombine.high %v1753_v47, %v1761_v48  ;;  %v972_v35 = vcombine.low %v963_v33, %v971_v31  ;;  %v973_v38 = vcombine.high %v963_v33, %v971_v31 }
 0x2de   : > { %v951_v19 = vpop.permute.xlu1 %950 }
 0x2df   : > { %v1770_v53 = vrot.slane %v1762_v51, %v9182_v44  ;;  %v1777_v54 = vrot.slane %v1763_v52, %v9182_v44  ;;  %v997_v32 = vrot.slane %v951_v19, %v9178_v39  ;;  %v980_v40 = vrot.slane %v972_v35, %v9182_v44 }
 0x2e0   : > { %v987_v43 = vrot.slane %v973_v38, %v9182_v44 }
 0x2e1   : > { %v1782_v56 = vpack.i.b16 %v1770_v53, %v1736_v50  ;;  %v1784_v58 = vshrl.u32 %v1770_v53, 16  ;;  %v1796_v60 = vshrl.u32 %v1777_v54, 16  ;;  %v1778_v62 = vcombine.high %v1770_v53, %v10719_v61 }
 0x2e2   : > { %v1794_v63 = vpack.i.b16 %v1777_v54, %v1743_v55  ;;  %v1779_v5 = vcombine.high %v1777_v54, %v10719_v61  ;;  %v955_v22 = vpop.permute.xlu1 %954  ;;  %v1027_v46 = vshrl.u32 %v980_v40, 16  ;;  %v1039_v55 = vshrl.u32 %v987_v43, 16 }
 0x2e3   : > { %1929 = vrot.lane.b32.xlu0 %v1782_v56, %s8670_s23  ;;  %v1785_v59 = vpack.i.b16 %v1784_v58, %v1783_v57  ;;  %v1797_v3 = vpack.i.b16 %v1796_v60, %v1795_v1  ;;  %v1790_v4 = vshrl.u32 %v1778_v62, 16  ;;  %v1788_v6 = vpack.i.b16 %v1778_v62, %v1744_v2 }
 0x2e4   : > { %v1802_v10 = vshrl.u32 %v1779_v5, 16  ;;  %v1800_v11 = vpack.i.b16 %v1779_v5, %v1745_v8  ;;  %v1005_v30 = vrot.slane %v955_v22, %v9178_v39  ;;  %v988_v56 = vcombine.high %v980_v40, %v10719_v61 }
 0x2e5   : > { %1931 = vrot.lane.b32.xlu1 %v1785_v59, %s8670_s23  ;;  %v1791_v9 = vpack.i.b16 %v1790_v4, %v1789_v7  ;;  %v989_v4 = vcombine.high %v987_v43, %v10719_v61 }
 0x2e6   : > { %v1803_v13 = vpack.i.b16 %v1802_v10, %v1801_v12  ;;  %v1006_v34 = vcombine.low %v997_v32, %v1005_v30  ;;  %v1007_v36 = vcombine.high %v997_v32, %v1005_v30  ;;  %v1210_v32 = vadd.f32 %v7682_v23, %v9201_v14 }
 0x2e7   : > { %1937 = vrot.lane.b32.xlu0 %v1794_v63, %s8670_s23 }
 0x2e8   : > { %v1014_v37 = vrot.slane %v1006_v34, %v9182_v44  ;;  %v1021_v41 = vrot.slane %v1007_v36, %v9182_v44  ;;  %v9281_v35 = vpack.c.bf16 %v1210_v32, %v1210_v32 }
 0x2e9   : > { %1939 = vrot.lane.b32.xlu1 %v1797_v3, %s8670_s23  ;;  %v1033_v3 = vshrl.u32 %v988_v56, 16 }
 0x2ea   : > { %v1028_v42 = vshrl.u32 %v1014_v37, 16  ;;  %v9212_v45 = vpack.i.b16 %v1014_v37, %v980_v40  ;;  %v1040_v50 = vshrl.u32 %v1021_v41, 16  ;;  %v1022_v51 = vcombine.high %v1014_v37, %v10719_v61 }
 0x2eb   : > { %1933 = vrot.lane.b32.xlu0 %v1788_v6, %s8670_s23  ;;  %v9228_v54 = vpack.i.b16 %v1021_v41, %v987_v43  ;;  %v1023_v62 = vcombine.high %v1021_v41, %v10719_v61 }
 0x2ec   : > { %v9219_v49 = vpack.i.b16 %v1028_v42, %v1027_v46  ;;  %v9237_v59 = vpack.i.b16 %v1040_v50, %v1039_v55  ;;  %v1034_v60 = vshrl.u32 %v1022_v51, 16  ;;  %v9246_v2 = vpack.i.b16 %v1022_v51, %v988_v56 }
 0x2ed   : > { %1935 = vrot.lane.b32.xlu1 %v1791_v9, %s8670_s23  ;;  %v1046_v9 = vshrl.u32 %v1023_v62, 16  ;;  %v9263_v12 = vpack.i.b16 %v1023_v62, %v989_v4 }
 0x2ee   : > { %v9255_v7 = vpack.i.b16 %v1034_v60, %v1033_v3 }
 0x2ef   : > { %1941 = vrot.lane.b32.xlu0 %v1800_v11, %s8670_s23 }
 0x2f1   : > { %1943 = vrot.lane.b32.xlu1 %v1803_v13, %s8670_s23  ;;  %v1045_v13 = vshrl.u32 %v989_v4, 16 }
 0x2f3   : > { %v9271_v17 = vpack.i.b16 %v1046_v9, %v1045_v13 }
 0x355   : > { %v9214_v47 = vpop.permute.xlu0 %1929 }
 0x356   : > { %v1948_v48 = vsel %vm1945_vm2, %v9212_v45, %v9214_v47 }
 0x357   : > { %1978 = vst.msk [vmem:[#allocation5] sm:$0x3] %vm1904_vm3, %v1948_v48  ;;  %v9223_v52 = vpop.permute.xlu1 %1931 }
 0x358   : > { %v1952_v53 = vsel %vm1945_vm2, %v9219_v49, %v9223_v52 }
 0x359   : > { %1979 = vst.msk [vmem:[#allocation5 + $0x2] sm:$0x3] %vm1904_vm3, %v1952_v53  ;;  %v9232_v57 = vpop.permute.xlu0 %1937 }
 0x35a   : > { %v1964_v58 = vsel %vm1945_vm2, %v9228_v54, %v9232_v57 }
 0x35b   : > { %1982 = vst.msk [vmem:[#allocation5 + $0x8] sm:$0x3] %vm1904_vm3, %v1964_v58  ;;  %v9241_v63 = vpop.permute.xlu1 %1939 }
 0x35c   : > { %v1968_v1 = vsel %vm1945_vm2, %v9237_v59, %v9241_v63 }
 0x35d   : > { %1983 = vst.msk [vmem:[#allocation5 + $0xa] sm:$0x3] %vm1904_vm3, %v1968_v1  ;;  %v9250_v5 = vpop.permute.xlu0 %1933 }
 0x35e   : > { %v1956_v6 = vsel %vm1945_vm2, %v9246_v2, %v9250_v5  ;;  %v2215_v8 = vld [vmem:[#allocation5] sm:$0x3] }
 0x35f   : > { %1980 = vst.msk [vmem:[#allocation5 + $0x4] sm:$0x3] %vm1904_vm3, %v1956_v6  ;;  %v9258_v10 = vpop.permute.xlu1 %1935  ;;  %2289 = vxpose.xlu0.c.b16.start.end [1/1] (short) (narrow) %v2215_v8, 16 }
 0x360   : > { %v1960_v11 = vsel %vm1945_vm2, %v9255_v7, %v9258_v10  ;;  %v2216_v30 = vld [vmem:[#allocation5 + $0x2] sm:$0x3] }
 0x361   : > { %1981 = vst.msk [vmem:[#allocation5 + $0x6] sm:$0x3] %vm1904_vm3, %v1960_v11  ;;  %v9266_v15 = vpop.permute.xlu0 %1941 }
 0x362   : > { %v1972_v16 = vsel %vm1945_vm2, %v9263_v12, %v9266_v15  ;;  %v2219_v19 = vld [vmem:[#allocation5 + $0x8] sm:$0x3] }
 0x363   : > { %1984 = vst.msk [vmem:[#allocation5 + $0xc] sm:$0x3] %vm1904_vm3, %v1972_v16  ;;  %v9274_v21 = vpop.permute.xlu1 %1943  ;;  %2353 = vxpose.xlu1.c.b16.start.end [1/1] (short) (narrow) %v2219_v19, 16 }
 0x364   : > { %v1976_v22 = vsel %vm1945_vm2, %v9271_v17, %v9274_v21  ;;  %v2220_v33 = vld [vmem:[#allocation5 + $0xa] sm:$0x3] }
 0x365   : > { %1985 = vst.msk [vmem:[#allocation5 + $0xe] sm:$0x3] %vm1904_vm3, %v1976_v22 }
 0x366   : > { %v2217_v31 = vld [vmem:[#allocation5 + $0x4] sm:$0x3] }
 0x367   : > { %2305 = vxpose.xlu1.c.b16.start.end [1/1] (short) (narrow) %v2216_v30, 16  ;;  %2321 = vxpose.xlu0.c.b16.start.end [1/1] (short) (narrow) %v2217_v31, 16 }
 0x368   : > { %v2218_v36 = vld [vmem:[#allocation5 + $0x6] sm:$0x3] }
 0x36a   : > { %v2221_v34 = vld [vmem:[#allocation5 + $0xc] sm:$0x3] }
 0x36b   : > { %2369 = vxpose.xlu0.c.b16.start.end [1/1] (short) (narrow) %v2220_v33, 16  ;;  %2385 = vxpose.xlu1.c.b16.start.end [1/1] (short) (narrow) %v2221_v34, 16 }
 0x36c   : > { %v2222_v37 = vld [vmem:[#allocation5 + $0xe] sm:$0x3] }
 0x36f   : > { %2337 = vxpose.xlu0.c.b16.start.end [1/1] (short) (narrow) %v2218_v36, 16  ;;  %1217 = vrot.lane.b32.xlu1 %v9281_v35, %s8665_s12  ;;  %s10807_s12 = sld [smem:[#allocation46_spill]] }
 0x373   : > { %2401 = vxpose.xlu0.c.b16.start.end [1/1] (short) (narrow) %v2222_v37, 16  ;;  %1221 = vrot.lane.b32.xlu1 %v9281_v35, %s8672_s17 }
 0x375   : > { %p10809_p4 = scmp.ne.s32.totalorder %s10807_s12, 0 }
 0x37c   : > { %1219 = vrot.lane.b32.xlu0 %v9281_v35, %s8673_s3 }
 0x3c5   : > { %v2297_v14 = vpop.trf.xlu0 }
 0x3c9   : > { %v2361_v38 = vpop.trf.xlu1 }
 0x3ca   : > { %v2417_v50 = vcombine.low %v2297_v14, %v2361_v38 }
 0x3cc   : > { %v2424_v56 = vrot.slane %v2417_v50, %v9178_v39 }
 0x3cd   : > { %v2313_v40 = vpop.trf.xlu1  ;;  %v2329_v41 = vpop.trf.xlu0 }
 0x3d1   : > { %v2393_v42 = vpop.trf.xlu1  ;;  %v2377_v43 = vpop.trf.xlu0 }
 0x3d2   : > { %v2425_v46 = vcombine.low %v2329_v41, %v2393_v42  ;;  %v2451_v53 = vcombine.low %v2313_v40, %v2377_v43 }
 0x3d4   : > { %v2432_v51 = vrot.slane %v2425_v46, %v9178_v39  ;;  %v2458_v1 = vrot.slane %v2451_v53, %v9178_v39 }
 0x3d5   : > { %v2345_v48 = vpop.trf.xlu0 }
 0x3d6   : > { %v2433_v60 = vcombine.low %v2424_v56, %v2432_v51  ;;  %v2434_v62 = vcombine.high %v2424_v56, %v2432_v51 }
 0x3d8   : > { %v2441_v8 = vrot.slane %v2433_v60, %v9182_v44  ;;  %v2448_v9 = vrot.slane %v2434_v62, %v9182_v44 }
 0x3d9   : > { %v2409_v55 = vpop.trf.xlu0 }
 0x3da   : > { %v2459_v58 = vcombine.low %v2345_v48, %v2409_v55  ;;  %v2489_v32 = vshrl.u32 %v2441_v8, 16  ;;  %v2505_v33 = vshrl.u32 %v2448_v9, 16  ;;  %v2449_v34 = vcombine.high %v2441_v8, %v10719_v61 }
 0x3db   : > { %v2450_v48 = vcombine.high %v2448_v9, %v10719_v61 }
 0x3dc   : > { %v2466_v3 = vrot.slane %v2459_v58, %v9178_v39  ;;  %v2497_v43 = vshrl.u32 %v2449_v34, 16 }
 0x3dd   : > { %v2513_v58 = vshrl.u32 %v2450_v48, 16 }
 0x3de   : > { %v2467_v4 = vcombine.low %v2458_v1, %v2466_v3  ;;  %v2468_v6 = vcombine.high %v2458_v1, %v2466_v3 }
 0x3e0   : > { %v2475_v11 = vrot.slane %v2467_v4, %v9182_v44  ;;  %v2482_v13 = vrot.slane %v2468_v6, %v9182_v44  ;;  %v1229_v4 = vrot.slane %v9281_v35, %v9178_v39 }
 0x3e1   : > { %v9297_v16 = vpop.permute.xlu1 %1217 }
 0x3e2   : > { %v2503_v19 = vpack.i.b16 %v2482_v13, %v2448_v9  ;;  %v2487_v22 = vpack.i.b16 %v2475_v11, %v2441_v8  ;;  %v2490_v23 = vshrl.u32 %v2475_v11, 16  ;;  %v2506_v30 = vshrl.u32 %v2482_v13, 16 }
 0x3e3   : > { %v2483_v31 = vcombine.high %v2475_v11, %v10719_v61  ;;  %v1263_v36 = vrot.slane %v9297_v16, %v9178_v39  ;;  %v2484_v14 = vcombine.high %v2482_v13, %v10719_v61 }
 0x3e4   : > { %2581 = vxpose.xlu0.c.b16.start.end [1/1] (short) (narrow) %v2503_v19, 16  ;;  %2517 = vxpose.xlu1.c.b16.start.end [1/1] (short) (narrow) %v2487_v22, 16  ;;  %v2491_v38 = vpack.i.b16 %v2490_v23, %v2489_v32  ;;  %v2507_v40 = vpack.i.b16 %v2506_v30, %v2505_v33 }
 0x3e5   : > { %v1222_v37 = vpop.permute.xlu1 %1221  ;;  %v2498_v41 = vshrl.u32 %v2483_v31, 16  ;;  %v2495_v51 = vpack.i.b16 %v2483_v31, %v2449_v34  ;;  %v2514_v55 = vshrl.u32 %v2484_v14, 16  ;;  %v2511_v3 = vpack.i.b16 %v2484_v14, %v2450_v48 }
 0x3e6   : > { %v1271_v42 = vrot.slane %v1222_v37, %v9178_v39 }
 0x3e7   : > { %v2499_v50 = vpack.i.b16 %v2498_v41, %v2497_v43  ;;  %v2515_v1 = vpack.i.b16 %v2514_v55, %v2513_v58 }
 0x3e8   : > { %2533 = vxpose.xlu0.c.b16.start.end [1/1] (short) (narrow) %v2491_v38, 16  ;;  %2597 = vxpose.xlu1.c.b16.start.end [1/1] (short) (narrow) %v2507_v40, 16  ;;  %v1272_v46 = vcombine.low %v1263_v36, %v1271_v42  ;;  %v1273_v53 = vcombine.high %v1263_v36, %v1271_v42 }
 0x3ea   : > { %v1280_v56 = vrot.slane %v1272_v46, %v9182_v44  ;;  %v1287_v60 = vrot.slane %v1273_v53, %v9182_v44 }
 0x3ec   : > { %2565 = vxpose.xlu1.c.b16.start.end [1/1] (short) (narrow) %v2499_v50, 16  ;;  %2549 = vxpose.xlu0.c.b16.start.end [1/1] (short) (narrow) %v2495_v51, 16  ;;  %v1288_v8 = vcombine.high %v1280_v56, %v10719_v61  ;;  %v1289_v13 = vcombine.high %v1287_v60, %v10719_v61  ;;  %v1295_v19 = vshrl.u32 %v1280_v56, 16  ;;  %v1311_v31 = vshrl.u32 %v1287_v60, 16 }
 0x3ee   : > { %v1220_v62 = vpop.permute.xlu0 %1219  ;;  %v1303_v30 = vshrl.u32 %v1288_v8, 16  ;;  %v1319_v37 = vshrl.u32 %v1289_v13, 16 }
 0x3ef   : > { %v1237_v6 = vrot.slane %v1220_v62, %v9178_v39 }
 0x3f0   : > { %2629 = vxpose.xlu1.c.b16.start.end [1/1] (short) (narrow) %v2515_v1, 16  ;;  %2613 = vxpose.xlu0.c.b16.start.end [1/1] (short) (narrow) %v2511_v3, 16 }
 0x3f1   : > { %v1238_v9 = vcombine.low %v1229_v4, %v1237_v6  ;;  %v1239_v11 = vcombine.high %v1229_v4, %v1237_v6 }
 0x3f3   : > { %v1246_v22 = vrot.slane %v1238_v9, %v9182_v44  ;;  %v1253_v23 = vrot.slane %v1239_v11, %v9182_v44 }
 0x3f4   : > { %1806 = vrot.lane.b32.xlu1 %v9158_v26, %s8674_s21 }
 0x3f5   : > { %v1254_v32 = vcombine.high %v1246_v22, %v10719_v61  ;;  %v1255_v33 = vcombine.high %v1253_v23, %v10719_v61  ;;  %v1292_v34 = vpack.i.b16 %v1280_v56, %v1246_v22  ;;  %v1294_v36 = vshrl.u32 %v1246_v22, 16 }
 0x3f6   : > { %v1308_v14 = vpack.i.b16 %v1287_v60, %v1253_v23  ;;  %v1310_v38 = vshrl.u32 %v1253_v23, 16 }
 0x3f7   : > { %v1296_v40 = vpack.i.b16 %v1295_v19, %v1294_v36  ;;  %v1300_v41 = vpack.i.b16 %v1288_v8, %v1254_v32  ;;  %v1302_v42 = vshrl.u32 %v1254_v32, 16  ;;  %v1316_v43 = vpack.i.b16 %v1289_v13, %v1255_v33  ;;  %1913 = vst.msk [vmem:[#allocation3] sm:$0x3] %vm1904_vm3, %v1292_v34 }
 0x3f8   : > { %v1312_v46 = vpack.i.b16 %v1311_v31, %v1310_v38  ;;  %v1318_v48 = vshrl.u32 %v1255_v33, 16  ;;  %1917 = vst.msk [vmem:[#allocation3 + $0x8] sm:$0x3] %vm1904_vm3, %v1308_v14  ;;  %1808 = vrot.lane.b32.xlu1 %v9152_v24, %s8674_s21 }
 0x3f9   : > { %v1304_v26 = vpack.i.b16 %v1303_v30, %v1302_v42  ;;  %1914 = vst.msk [vmem:[#allocation3 + $0x2] sm:$0x3] %vm1904_vm3, %v1296_v40  ;;  %1915 = vst.msk [vmem:[#allocation3 + $0x4] sm:$0x3] %vm1904_vm3, %v1300_v41  ;;  %1804 = vrot.lane.b32.xlu0 %v9127_v18, %s8674_s21 }
 0x3fa   : > { %1919 = vst.msk [vmem:[#allocation3 + $0xc] sm:$0x3] %vm1904_vm3, %v1316_v43  ;;  %v1320_v50 = vpack.i.b16 %v1319_v37, %v1318_v48  ;;  %1918 = vst.msk [vmem:[#allocation3 + $0xa] sm:$0x3] %vm1904_vm3, %v1312_v46 }
 0x3fb   : > { %1916 = vst.msk [vmem:[#allocation3 + $0x6] sm:$0x3] %vm1904_vm3, %v1304_v26 }
 0x3fc   : > { %1920 = vst.msk [vmem:[#allocation3 + $0xe] sm:$0x3] %vm1904_vm3, %v1320_v50  ;;  %1322 = vrot.lane.b32.xlu1 %v9281_v35, %s8666_s30  ;;  %s7284_s30 = sshll.u32 %s10071_s20, 4  ;;  %s10442_s30 = int_to_ptr.vmem [resolvable:$true] %s7284_s30 }
 0x3fd   : > { %1810 = vrot.lane.b32.xlu0 %v9156_v25, %s8674_s21 }
 0x400   : > { %1050 = vrot.lane.b32.xlu1 %v9170_v28, %s8674_s21  ;;  %v8187_v62 = vld.sshfl [vmem:[#allocation3] sm:$0x33 pattern:$0x73516240] }
 0x401   : > { %1324 = vrot.lane.b32.xlu0 %v9281_v35, %s8664_s6  ;;  %v8188_v1 = vld.sshfl [vmem:[#allocation3 + $0x8] sm:$0x33 pattern:$0x73516240]  ;;  %v2268_v36 = vshrl.u32 %v8187_v62, 16  ;;  %v2237_v48 = vcombine.high %v8187_v62, %v10719_v61  ;;  %s10732_s6 = smov 24  }
 0x402   : > { %v8185_v28 = vld.sshfl [vmem:[#allocation3 + $0x2] sm:$0x33 pattern:$0x73516240]  ;;  %v2280_v37 = vshrl.u32 %v8188_v1, 16  ;;  %v2255_v26 = vcombine.high %v8188_v1, %v10719_v61 }
 0x403   : > { %v8186_v56 = vld.sshfl [vmem:[#allocation3 + $0xa] sm:$0x33 pattern:$0x73516240]  ;;  %v2269_v23 = vshrl.u32 %v8185_v28, 16  ;;  %v2267_v31 = vpack.i.b16 %v8185_v28, %v8187_v62  ;;  %v2246_v14 = vcombine.high %v8185_v28, %v10719_v61 }
 0x404   : > { %1052 = vrot.lane.b32.xlu1 %v9164_v27, %s8674_s21  ;;  %v2281_v30 = vshrl.u32 %v8186_v56, 16  ;;  %v2279_v32 = vpack.i.b16 %v8186_v56, %v8188_v1  ;;  %v2264_v38 = vcombine.high %v8186_v56, %v10719_v61  ;;  %v2274_v1 = vshrl.u32 %v2237_v48, 16 }
 0x405   : > { %1048 = vrot.lane.b32.xlu0 %v9133_v20, %s8674_s21  ;;  %v2270_v42 = vpack.i.b16 %v2269_v23, %v2268_v36  ;;  %v2275_v28 = vshrl.u32 %v2246_v14, 16 }
 0x406   : > { %v2282_v43 = vpack.i.b16 %v2281_v30, %v2280_v37  ;;  %v2707_v46 = vcombine.low %v2267_v31, %v2279_v32  ;;  %v2287_v56 = vshrl.u32 %v2264_v38, 16 }
 0x407   : > { %v2276_v30 = vpack.i.b16 %v2275_v28, %v2274_v1 }
 0x409   : > { %1054 = vrot.lane.b32.xlu0 %v9174_v29, %s8674_s21 }
 0x40d   : > { %1326 = vrot.lane.b32.xlu0 %v9281_v35, %s8667_s14 }
 0x44a   : > { %v2525_v51 = vpop.trf.xlu1  ;;  %v2589_v25 = vpop.trf.xlu0 }
 0x44b   : > { %v2645_v3 = vcombine.low %v2525_v51, %v2589_v25 }
 0x44d   : > { %v2652_v9 = vrot.slane %v2645_v3, %v9178_v39  ;;  %v2763_v3 = vcombine.low %v2270_v42, %v2282_v43 }
 0x44e   : > { %v2605_v53 = vpop.trf.xlu1  ;;  %v2541_v55 = vpop.trf.xlu0 }
 0x44f   : > { %v2670_v4 = vcombine.low %v2541_v55, %v2605_v53  ;;  %v2770_v23 = vrot.slane %v2763_v3, %v9178_v39 }
 0x451   : > { %v2677_v29 = vrot.slane %v2670_v4, %v9178_v39 }
 0x452   : > { %v2573_v58 = vpop.trf.xlu1  ;;  %v2557_v60 = vpop.trf.xlu0 }
 0x456   : > { %v2637_v6 = vpop.trf.xlu1  ;;  %v2621_v8 = vpop.trf.xlu0 }
 0x457   : > { %v2678_v11 = vcombine.low %v2573_v58, %v2637_v6  ;;  %v2653_v13 = vcombine.low %v2557_v60, %v2621_v8  ;;  %v2273_v8 = vpack.i.b16 %v2246_v14, %v2237_v48 }
 0x459   : > { %v2685_v19 = vrot.slane %v2678_v11, %v9178_v39  ;;  %v2660_v22 = vrot.slane %v2653_v13, %v9178_v39  ;;  %v2285_v11 = vpack.i.b16 %v2264_v38, %v2255_v26  ;;  %v2286_v13 = vshrl.u32 %v2255_v26, 16 }
 0x45b   : > { %v2686_v33 = vcombine.low %v2677_v29, %v2685_v19  ;;  %v2661_v34 = vcombine.low %v2652_v9, %v2660_v22  ;;  %v2714_v29 = vrot.slane %v2707_v46, %v9178_v39  ;;  %v2288_v31 = vpack.i.b16 %v2287_v56, %v2286_v13 }
 0x45d   : > { %v2693_v40 = vrot.slane %v2686_v33, %v9182_v44  ;;  %v2668_v41 = vrot.slane %v2661_v34, %v9182_v44  ;;  %v2817_v34 = vcombine.low %v2273_v8, %v2285_v11  ;;  %v2871_v36 = vcombine.low %v2276_v30, %v2288_v31 }
 0x45f   : > { %v2697_v50 = vpack.i.b16 %v2693_v40, %v2668_v41  ;;  %v2698_v51 = vshrl.u32 %v2668_v41, 16  ;;  %v2699_v25 = vshrl.u32 %v2693_v40, 16  ;;  %v2669_v53 = vcombine.high %v2668_v41, %v10719_v61 }
 0x460   : > { %v2694_v55 = vcombine.high %v2693_v40, %v10719_v61  ;;  %v2824_v40 = vrot.slane %v2817_v34, %v9178_v39  ;;  %v2878_v42 = vrot.slane %v2871_v36, %v9178_v39 }
 0x461   : > { %v2721_v58 = vsel %vm2719_vm4, %v2697_v50, 0  ;;  %v2700_v60 = vpack.i.b16 %v2699_v25, %v2698_v51  ;;  %v2704_v4 = vshrl.u32 %v2669_v53, 16 }
 0x462   : > { %7824 = vmatpush3.bf16.msra.mxu1 %v2721_v58  ;;  %v2703_v6 = vpack.i.b16 %v2694_v55, %v2669_v53  ;;  %v2705_v62 = vshrl.u32 %v2694_v55, 16 }
 0x463   : > { %v2775_v9 = vsel %vm2719_vm4, %v2700_v60, 0  ;;  %7835 = vmatprep.subr.bf16.mxu1 %v10717_v0 }
 0x464   : > { %7830 = vmatpush3.bf16.msra.mxu0 %v2775_v9  ;;  %v2829_v19 = vsel %vm2719_vm4, %v2703_v6, 0  ;;  %v2706_v22 = vpack.i.b16 %v2705_v62, %v2704_v4 }
 0x465   : > { %7826 = vmatmul.mubr.msk.bf16.vlgmr.msra.gmra.mrb[4].mxu1 %vm2715_vm5, %v2714_v29  ;;  %7841 = vmatprep.subr.bf16.mxu0 %v10717_v0 }
 0x466   : > { %v1807_v32 = vpop.permute.xlu1 %1806  ;;  %7836 = vmatpush3.bf16.msra.mxu1 %v2829_v19  ;;  %v2883_v33 = vsel %vm2719_vm4, %v2706_v22, 0  ;;  %7837 = vmatprep.mubr.msk.bf16.mxu1 %vm8663_vm0, %v10717_v0 }
 0x467   : > { %7832 = vmatmul.mubr.msk.bf16.vlgmr.msra.gmra.mrb[8].mxu0 %vm2715_vm5, %v2770_v23  ;;  %7847 = vmatprep.subr.bf16.mxu1 %v10717_v0  ;;  %v1853_v26 = vrot.slane %v1807_v32, %v9178_v39 }
 0x468   : > { %7842 = vmatpush3.bf16.msra.mxu0 %v2883_v33  ;;  %7843 = vmatprep.mubr.msk.bf16.mxu0 %vm8663_vm0, %v10717_v0 }
 0x469   : > { %7853 = vmatprep.subr.bf16.mxu0 %v10717_v0 }
 0x46a   : > { %v1809_v37 = vpop.permute.xlu1 %1808 }
 0x46b   : > { %v1827_v14 = vrot.slane %v1809_v37, %v9178_v39  ;;  %v1805_v38 = vpop.permute.xlu0 %1804 }
 0x46c   : > { %v1819_v41 = vrot.slane %v1805_v38, %v9178_v39 }
 0x46d   : > { %7838 = vmatmul.mubr.msk.bf16.vlgmr.msra.gmra.mrb[8].mxu1 %vm2715_vm5, %v2824_v40 }
 0x46e   : > { %v1828_v43 = vcombine.low %v1819_v41, %v1827_v14  ;;  %v9380_v46 = vpop.permute.xlu1 %1322  ;;  %7849 = vmatprep.mubr.msk.bf16.mxu1 %vm8663_vm0, %v10717_v0  ;;  %v1829_v56 = vcombine.high %v1819_v41, %v1827_v14 }
 0x46f   : > { %1328 = vrot.lane.b32.xlu1 %v9380_v46, %s8667_s14  ;;  %7844 = vmatmul.mubr.msk.bf16.vlgmr.msra.gmra.mrb[12].mxu0 %vm2715_vm5, %v2878_v42  ;;  %v1811_v48 = vpop.permute.xlu0 %1810 }
 0x470   : > { %v1861_v50 = vrot.slane %v1811_v48, %v9178_v39  ;;  %7855 = vmatprep.mubr.msk.bf16.mxu0 %vm8663_vm0, %v10717_v0  ;;  %v1836_v51 = vrot.slane %v1828_v43, %v9182_v44  ;;  %v1843_v9 = vrot.slane %v1829_v56, %v9182_v44 }
 0x472   : > { %v1862_v25 = vcombine.low %v1853_v26, %v1861_v50  ;;  %v1863_v55 = vcombine.high %v1853_v26, %v1861_v50  ;;  %v1883_v58 = vshrl.u32 %v1836_v51, 16  ;;  %v1844_v4 = vcombine.high %v1836_v51, %v10719_v61  ;;  %v1051_v14 = vpop.permute.xlu1 %1050 }
 0x473   : > { %1330 = vrot.lane.b32.xlu1 %v9297_v16, %s8667_s14  ;;  %v9394_v53 = vpop.permute.xlu0 %1324  ;;  %v1895_v30 = vshrl.u32 %v1843_v9, 16  ;;  %v1845_v31 = vcombine.high %v1843_v9, %v10719_v61  ;;  %v1097_v26 = vrot.slane %v1051_v14, %v9178_v39 }
 0x474   : > { %v1870_v28 = vrot.slane %v1862_v25, %v9182_v44  ;;  %1332 = vrot.lane.b32.xlu0 %v9394_v53, %s8667_s14  ;;  %v1877_v62 = vrot.slane %v1863_v55, %v9182_v44  ;;  %v1889_v11 = vshrl.u32 %v1844_v4, 16  ;;  %s10394_s14 = sshll.u32 %s10793_s29, 8 }
 0x475   : > { %v1901_v36 = vshrl.u32 %v1845_v31, 16  ;;  %s10402_s18 = scalar_lea.hbm %s10808_s9, %s10394_s14 }
 0x476   : > { %v1882_v60 = vpack.i.b16 %v1870_v28, %v1836_v51  ;;  %v1884_v3 = vshrl.u32 %v1870_v28, 16  ;;  %v1878_v6 = vcombine.high %v1870_v28, %v10719_v61  ;;  %v1896_v19 = vshrl.u32 %v1877_v62, 16  ;;  %v1053_v40 = vpop.permute.xlu1 %1052 }
 0x477   : > { %v1879_v22 = vcombine.high %v1877_v62, %v10719_v61  ;;  %v1894_v23 = vpack.i.b16 %v1877_v62, %v1843_v9  ;;  %v1049_v38 = vpop.permute.xlu0 %1048  ;;  %v1071_v42 = vrot.slane %v1053_v40, %v9178_v39 }
 0x478   : > { %1986 = vrot.lane.b32.xlu1 %v1882_v60, %s8670_s23  ;;  %v1885_v8 = vpack.i.b16 %v1884_v3, %v1883_v58  ;;  %v1890_v1 = vshrl.u32 %v1878_v6, 16  ;;  %v1888_v29 = vpack.i.b16 %v1878_v6, %v1844_v4  ;;  %v1897_v32 = vpack.i.b16 %v1896_v19, %v1895_v30 }
 0x479   : > { %v1902_v33 = vshrl.u32 %v1879_v22, 16  ;;  %v1900_v34 = vpack.i.b16 %v1879_v22, %v1845_v31  ;;  %v1063_v43 = vrot.slane %v1049_v38, %v9178_v39 }
 0x47a   : > { %1988 = vrot.lane.b32.xlu0 %v1885_v8, %s8670_s23  ;;  %v1891_v13 = vpack.i.b16 %v1890_v1, %v1889_v11 }
 0x47b   : > { %v1903_v37 = vpack.i.b16 %v1902_v33, %v1901_v36  ;;  %v1055_v41 = vpop.permute.xlu0 %1054  ;;  %v1072_v50 = vcombine.low %v1063_v43, %v1071_v42  ;;  %v1073_v25 = vcombine.high %v1063_v43, %v1071_v42 }
 0x47c   : > { %1990 = vrot.lane.b32.xlu1 %v1888_v29, %s8670_s23  ;;  %v1105_v48 = vrot.slane %v1055_v41, %v9178_v39 }
 0x47d   : > { %v1080_v28 = vrot.slane %v1072_v50, %v9182_v44  ;;  %v1087_v58 = vrot.slane %v1073_v25, %v9182_v44 }
 0x47e   : > { %1992 = vrot.lane.b32.xlu0 %v1891_v13, %s8670_s23  ;;  %v1106_v51 = vcombine.low %v1097_v26, %v1105_v48  ;;  %v1107_v55 = vcombine.high %v1097_v26, %v1105_v48 }
 0x47f   : > { %v1327_v4 = vpop.permute.xlu0 %1326  ;;  %v1088_v6 = vcombine.high %v1080_v28, %v10719_v61  ;;  %v1127_v1 = vshrl.u32 %v1080_v28, 16  ;;  %v1139_v29 = vshrl.u32 %v1087_v58, 16 }
 0x480   : > { %1994 = vrot.lane.b32.xlu1 %v1894_v23, %s8670_s23  ;;  %v1114_v56 = vrot.slane %v1106_v51, %v9182_v44  ;;  %v1121_v3 = vrot.slane %v1107_v55, %v9182_v44  ;;  %v1341_v11 = vrot.slane %v1327_v4, %v9178_v39  ;;  %v9426_v23 = vcombine.high %v1087_v58, %v10719_v61 }
 0x482   : > { %1996 = vrot.lane.b32.xlu0 %v1897_v32, %s8670_s23  ;;  %v1122_v62 = vcombine.high %v1114_v56, %v10719_v61  ;;  %v1128_v9 = vshrl.u32 %v1114_v56, 16  ;;  %v1140_v22 = vshrl.u32 %v1121_v3, 16  ;;  %v1133_v32 = vshrl.u32 %v1088_v6, 16 }
 0x483   : > { %v9432_v14 = vpack.i.b16 %v1121_v3, %v1087_v58  ;;  %v9437_v42 = vcombine.high %v1121_v3, %v10719_v61 }
 0x484   : > { %1998 = vrot.lane.b32.xlu1 %v1900_v34, %s8670_s23  ;;  %v1134_v33 = vshrl.u32 %v1122_v62, 16  ;;  %v9434_v41 = vpack.i.b16 %v1128_v9, %v1127_v1  ;;  %v9443_v50 = vpack.i.b16 %v1122_v62, %v1088_v6  ;;  %v9445_v51 = vpack.i.b16 %v1140_v22, %v1139_v29 }
 0x485   : > { %10785 = vst [vmem:[#allocation51_spill] sm:$0xff] %v9432_v14 }
 0x486   : > { %2000 = vrot.lane.b32.xlu0 %v1903_v37, %s8670_s23  ;;  %v9430_v37 = vpack.i.b16 %v1114_v56, %v1080_v28  ;;  %10786 = vst [vmem:[#allocation52_spill] sm:$0xff] %v9434_v41  ;;  %10787 = vst [vmem:[#allocation53_spill] sm:$0xff] %v9443_v50  ;;  %v9452_v56 = vpack.i.b16 %v1134_v33, %v1133_v32 }
 0x487   : > { %10788 = vst [vmem:[#allocation54_spill] sm:$0xff] %v9445_v51 }
 0x488   : > { %10784 = vst [vmem:[#allocation50_spill] sm:$0xff] %v9430_v37  ;;  %10789 = vst [vmem:[#allocation55_spill] sm:$0xff] %v9452_v56 }
 0x4e1   : > { %v1329_v60 = vpop.permute.xlu1 %1328 }
 0x4e2   : > { %v1375_v30 = vrot.slane %v1329_v60, %v9178_v39 }
 0x4e5   : > { %v1331_v8 = vpop.permute.xlu1 %1330 }
 0x4e6   : > { %v1349_v13 = vrot.slane %v1331_v8, %v9178_v39  ;;  %v1333_v19 = vpop.permute.xlu0 %1332 }
 0x4e7   : > { %v1383_v31 = vrot.slane %v1333_v19, %v9178_v39 }
 0x4e8   : > { %v1350_v34 = vcombine.low %v1341_v11, %v1349_v13  ;;  %v1351_v36 = vcombine.high %v1341_v11, %v1349_v13 }
 0x4e9   : > { %v1384_v38 = vcombine.low %v1375_v30, %v1383_v31  ;;  %v1385_v40 = vcombine.high %v1375_v30, %v1383_v31 }
 0x4ea   : > { %v1358_v43 = vrot.slane %v1350_v34, %v9182_v44  ;;  %v1365_v48 = vrot.slane %v1351_v36, %v9182_v44  ;;  %v9441_v26 = vpop.permute.xlu1 %1986 }
 0x4eb   : > { %v1392_v25 = vrot.slane %v1384_v38, %v9182_v44  ;;  %v1399_v55 = vrot.slane %v1385_v40, %v9182_v44  ;;  %v2004_v28 = vsel %vm1945_vm2, %v9430_v37, %v9441_v26 }
 0x4ec   : > { %v1366_v58 = vcombine.high %v1358_v43, %v10719_v61  ;;  %v1367_v60 = vcombine.high %v1365_v48, %v10719_v61  ;;  %v1405_v3 = vshrl.u32 %v1358_v43, 16  ;;  %v1417_v4 = vshrl.u32 %v1365_v48, 16  ;;  %2034 = vst.msk [vmem:[#allocation6] sm:$0x3] %vm1904_vm3, %v2004_v28  ;;  %v9457_v6 = vpop.permute.xlu0 %1988 }
 0x4ed   : > { %v1400_v62 = vcombine.high %v1392_v25, %v10719_v61  ;;  %v1401_v8 = vcombine.high %v1399_v55, %v10719_v61  ;;  %v9461_v1 = vpack.i.b16 %v1392_v25, %v1358_v43  ;;  %v1406_v9 = vshrl.u32 %v1392_v25, 16 }
 0x4ee   : > { %v1411_v29 = vshrl.u32 %v1366_v58, 16  ;;  %v1423_v11 = vshrl.u32 %v1367_v60, 16  ;;  %v9463_v13 = vpack.i.b16 %v1399_v55, %v1365_v48  ;;  %v1418_v19 = vshrl.u32 %v1399_v55, 16  ;;  %v9465_v22 = vpop.permute.xlu1 %1990 }
 0x4ef   : > { %v9467_v30 = vpack.i.b16 %v1406_v9, %v1405_v3  ;;  %v9469_v31 = vpack.i.b16 %v1400_v62, %v1366_v58  ;;  %v1412_v32 = vshrl.u32 %v1400_v62, 16  ;;  %v9471_v33 = vpack.i.b16 %v1401_v8, %v1367_v60 }
 0x4f0   : > { %v9473_v34 = vpack.i.b16 %v1418_v19, %v1417_v4  ;;  %v1424_v36 = vshrl.u32 %v1401_v8, 16  ;;  %v2043_v38 = vsel %vm1945_vm2, %v9461_v1, %v9214_v47  ;;  %v2055_v40 = vsel %vm1945_vm2, %v9463_v13, %v9232_v57  ;;  %v9481_v43 = vpop.permute.xlu0 %1992 }
 0x4f1   : > { %v9483_v48 = vpack.i.b16 %v1412_v32, %v1411_v29  ;;  %v2046_v25 = vsel %vm1945_vm2, %v9467_v30, %v9223_v52  ;;  %v2049_v55 = vsel %vm1945_vm2, %v9469_v31, %v9250_v5  ;;  %v2061_v47 = vsel %vm1945_vm2, %v9471_v33, %v9266_v15  ;;  %2066 = vst.msk [vmem:[#allocation7] sm:$0x3] %vm1904_vm3, %v2043_v38 }
 0x4f2   : > { %2070 = vst.msk [vmem:[#allocation7 + $0x8] sm:$0x3] %vm1904_vm3, %v2055_v40  ;;  %v9496_v57 = vpack.i.b16 %v1424_v36, %v1423_v11  ;;  %v2058_v28 = vsel %vm1945_vm2, %v9473_v34, %v9241_v63  ;;  %2067 = vst.msk [vmem:[#allocation7 + $0x2] sm:$0x3] %vm1904_vm3, %v2046_v25  ;;  %v2008_v52 = vsel %vm1945_vm2, %v9434_v41, %v9457_v6  ;;  %v9510_v15 = vpop.permute.xlu1 %1994  ;;  %v1146_v4 = vshrl.u32 %v9437_v42, 16 }
 0x4f3   : > { %2068 = vst.msk [vmem:[#allocation7 + $0x4] sm:$0x3] %vm1904_vm3, %v2049_v55  ;;  %2072 = vst.msk [vmem:[#allocation7 + $0xc] sm:$0x3] %vm1904_vm3, %v2061_v47  ;;  %v2012_v5 = vsel %vm1945_vm2, %v9443_v50, %v9465_v22  ;;  %v2052_v63 = vsel %vm1945_vm2, %v9483_v48, %v9258_v10  ;;  %v2016_v58 = vsel %vm1945_vm2, %v9452_v56, %v9481_v43  ;;  %v2978_v3 = vld [vmem:[#allocation6] sm:$0x3] }
 0x4f4   : > { %2071 = vst.msk [vmem:[#allocation7 + $0xa] sm:$0x3] %vm1904_vm3, %v2058_v28  ;;  %2035 = vst.msk [vmem:[#allocation6 + $0x2] sm:$0x3] %vm1904_vm3, %v2008_v52  ;;  %v2020_v60 = vsel %vm1945_vm2, %v9432_v14, %v9510_v15  ;;  %v2064_v10 = vsel %vm1945_vm2, %v9496_v57, %v9274_v21  ;;  %2986 = vxpose.xlu1.c.b16.start.end [1/1] (short) (narrow) %v2978_v3, 16  ;;  %v9531_v62 = vpop.permute.xlu0 %1996  ;;  %v9539_v9 = vpack.i.b16 %v9437_v42, %v9426_v23 }
 0x4f5   : > { %2036 = vst.msk [vmem:[#allocation6 + $0x4] sm:$0x3] %vm1904_vm3, %v2012_v5  ;;  %2069 = vst.msk [vmem:[#allocation7 + $0x6] sm:$0x3] %vm1904_vm3, %v2052_v63  ;;  %v2024_v8 = vsel %vm1945_vm2, %v9445_v51, %v9531_v62  ;;  %v1145_v21 = vshrl.u32 %v9426_v23, 16 }
 0x4f6   : > { %2037 = vst.msk [vmem:[#allocation6 + $0x6] sm:$0x3] %vm1904_vm3, %v2016_v58  ;;  %2038 = vst.msk [vmem:[#allocation6 + $0x8] sm:$0x3] %vm1904_vm3, %v2020_v60  ;;  %v9543_v29 = vpop.permute.xlu1 %1998 }
 0x4f7   : > { %2073 = vst.msk [vmem:[#allocation7 + $0xe] sm:$0x3] %vm1904_vm3, %v2064_v10  ;;  %10790 = vst [vmem:[#allocation56_spill] sm:$0xff] %v9539_v9  ;;  %v2028_v11 = vsel %vm1945_vm2, %v9539_v9, %v9543_v29  ;;  %v9548_v19 = vpack.i.b16 %v1146_v4, %v1145_v21  ;;  %v10792_v9 = vmov 0  }
 0x4f8   : > { %2039 = vst.msk [vmem:[#allocation6 + $0xa] sm:$0x3] %vm1904_vm3, %v2024_v8  ;;  %2040 = vst.msk [vmem:[#allocation6 + $0xc] sm:$0x3] %vm1904_vm3, %v2028_v11  ;;  %v9551_v32 = vpop.permute.xlu0 %2000  ;;  %v3881_v52 = vld [vmem:[#allocation7] sm:$0x3] }
 0x4f9   : > { %10791 = vst [vmem:[#allocation57_spill] sm:$0xff] %v9548_v19  ;;  %v2032_v42 = vsel %vm1945_vm2, %v9548_v19, %v9551_v32  ;;  %v3882_v28 = vld [vmem:[#allocation7 + $0x2] sm:$0x3]  ;;  %v3885_v60 = vld [vmem:[#allocation7 + $0x8] sm:$0x3] }
 0x4fa   : > { %2041 = vst.msk [vmem:[#allocation6 + $0xe] sm:$0x3] %vm1904_vm3, %v2032_v42  ;;  %v3883_v63 = vld [vmem:[#allocation7 + $0x4] sm:$0x3]  ;;  %v3887_v4 = vld [vmem:[#allocation7 + $0xc] sm:$0x3] }
 0x4fb   : > { %v2979_v36 = vld [vmem:[#allocation6 + $0x2] sm:$0x3]  ;;  %v3886_v58 = vld [vmem:[#allocation7 + $0xa] sm:$0x3] }
 0x4fc   : > { %3002 = vxpose.xlu0.c.b16.start.end [1/1] (short) (narrow) %v2979_v36, 16  ;;  %v2980_v40 = vld [vmem:[#allocation6 + $0x4] sm:$0x3]  ;;  %v3884_v5 = vld [vmem:[#allocation7 + $0x6] sm:$0x3] }
 0x4fd   : > { %v2981_v23 = vld [vmem:[#allocation6 + $0x6] sm:$0x3]  ;;  %v2982_v55 = vld [vmem:[#allocation6 + $0x8] sm:$0x3] }
 0x4fe   : > { %3034 = vxpose.xlu1.c.b16.start.end [1/1] (short) (narrow) %v2981_v23, 16  ;;  %v3888_v3 = vld [vmem:[#allocation7 + $0xe] sm:$0x3] }
 0x4ff   : > { %v2983_v38 = vld [vmem:[#allocation6 + $0xa] sm:$0x3]  ;;  %v2984_v47 = vld [vmem:[#allocation6 + $0xc] sm:$0x3] }
 0x500   : > { %3018 = vxpose.xlu0.c.b16.start.end [1/1] (short) (narrow) %v2980_v40, 16 }
 0x501   : > { %v2985_v25 = vld [vmem:[#allocation6 + $0xe] sm:$0x3] }
 0x502   : > { %3066 = vxpose.xlu1.c.b16.start.end [1/1] (short) (narrow) %v2983_v38, 16 }
 0x504   : > { %3050 = vxpose.xlu0.c.b16.start.end [1/1] (short) (narrow) %v2982_v55, 16 }
 0x506   : > { %3098 = vxpose.xlu1.c.b16.start.end [1/1] (short) (narrow) %v2985_v25, 16 }
 0x508   : > { %3082 = vxpose.xlu0.c.b16.start.end [1/1] (short) (narrow) %v2984_v47, 16 }
 0x50a   : > { %3965 = vxpose.xlu1.c.b16.start.end [1/1] (short) (narrow) %v3882_v28, 16 }
 0x50c   : > { %3949 = vxpose.xlu0.c.b16.start.end [1/1] (short) (narrow) %v3881_v52, 16 }
 0x50e   : > { %3997 = vxpose.xlu1.c.b16.start.end [1/1] (short) (narrow) %v3884_v5, 16 }
 0x510   : > { %3981 = vxpose.xlu0.c.b16.start.end [1/1] (short) (narrow) %v3883_v63, 16 }
 0x512   : > { %4029 = vxpose.xlu1.c.b16.start.end [1/1] (short) (narrow) %v3886_v58, 16 }
 0x514   : > { %4013 = vxpose.xlu0.c.b16.start.end [1/1] (short) (narrow) %v3885_v60, 16 }
 0x516   : > { %4061 = vxpose.xlu1.c.b16.start.end [1/1] (short) (narrow) %v3888_v3, 16 }
 0x518   : > { %4045 = vxpose.xlu0.c.b16.start.end [1/1] (short) (narrow) %v3887_v4, 16 }
 0x538   : > { %v9557_v10 = vpop.f32.mrb[4].mxu1 }
 0x539   : > { %v7827_v8 = vpop.f32.mrb[5].mxu1 }
 0x53a   : > { %v2760_v21 = vpop.f32.mrb[6].mxu1  ;;  %v9559_v11 = vpop.f32.mrb[8].mxu0 }
 0x53b   : > { %v7828_v42 = vpop.f32.mrb[7].mxu1  ;;  %v7833_v36 = vpop.f32.mrb[9].mxu0 }
 0x53c   : > { %v2814_v23 = vpop.f32.mrb[10].mxu0 }
 0x53d   : > { %v7834_v38 = vpop.f32.mrb[11].mxu0 }
 0x540   : > { %v9561_v40 = vpop.f32.mrb[8].mxu1 }
 0x541   : > { %v7839_v25 = vpop.f32.mrb[9].mxu1 }
 0x542   : > { %v2868_v55 = vpop.f32.mrb[10].mxu1  ;;  %v9563_v47 = vpop.f32.mrb[12].mxu0 }
 0x543   : > { %v7840_v28 = vpop.f32.mrb[11].mxu1  ;;  %v7845_v52 = vpop.f32.mrb[13].mxu0 }
 0x544   : > { %v2922_v5 = vpop.f32.mrb[14].mxu0 }
 0x545   : > { %v7846_v63 = vpop.f32.mrb[15].mxu0 }
 0x55a   : > { %v2994_v58 = vpop.trf.xlu1 }
 0x562   : > { %v3010_v60 = vpop.trf.xlu0 }
 0x564   : > { %v3042_v3 = vpop.trf.xlu1 }
 0x566   : > { %v3026_v4 = vpop.trf.xlu0 }
 0x568   : > { %v3074_v8 = vpop.trf.xlu1 }
 0x569   : > { %v3148_v21 = vcombine.low %v3010_v60, %v3074_v8 }
 0x56a   : > { %v3058_v42 = vpop.trf.xlu0 }
 0x56b   : > { %v3114_v38 = vcombine.low %v2994_v58, %v3058_v42  ;;  %v3155_v0 = vrot.slane %v3148_v21, %v9178_v39 }
 0x56c   : > { %v3106_v36 = vpop.trf.xlu1 }
 0x56d   : > { %v3156_v23 = vcombine.low %v3042_v3, %v3106_v36  ;;  %v3121_v63 = vrot.slane %v3114_v38, %v9178_v39 }
 0x56e   : > { %v3090_v55 = vpop.trf.xlu0 }
 0x56f   : > { %v3163_v25 = vrot.slane %v3156_v23, %v9178_v39  ;;  %v3122_v61 = vcombine.low %v3026_v4, %v3090_v55 }
 0x570   : > { %v3973_v28 = vpop.trf.xlu1 }
 0x571   : > { %v3164_v52 = vcombine.low %v3155_v0, %v3163_v25  ;;  %v3165_v5 = vcombine.high %v3155_v0, %v3163_v25  ;;  %v3129_v19 = vrot.slane %v3122_v61, %v9178_v39 }
 0x572   : > { %v3957_v51 = vpop.trf.xlu0 }
 0x573   : > { %v3172_v60 = vrot.slane %v3164_v52, %v9182_v44  ;;  %v3179_v8 = vrot.slane %v3165_v5, %v9182_v44  ;;  %v3130_v3 = vcombine.low %v3121_v63, %v3129_v19  ;;  %v3131_v58 = vcombine.high %v3121_v63, %v3129_v19 }
 0x574   : > { %v4005_v42 = vpop.trf.xlu1 }
 0x575   : > { %v3145_v21 = vrot.slane %v3131_v58, %v9182_v44  ;;  %v3138_v36 = vrot.slane %v3130_v3, %v9182_v44  ;;  %v3187_v4 = vshrl.u32 %v3172_v60, 16  ;;  %v3203_v56 = vshrl.u32 %v3179_v8, 16 }
 0x576   : > { %v3989_v23 = vpop.trf.xlu0  ;;  %v3180_v5 = vcombine.high %v3172_v60, %v10792_v9 }
 0x577   : > { %v3184_v55 = vpack.i.b16 %v3172_v60, %v3138_v36  ;;  %v3186_v25 = vshrl.u32 %v3138_v36, 16  ;;  %v3202_v38 = vshrl.u32 %v3145_v21, 16  ;;  %v3146_v52 = vcombine.high %v3138_v36, %v10792_v9 }
 0x578   : > { %v4037_v0 = vpop.trf.xlu1  ;;  %v3147_v60 = vcombine.high %v3145_v21, %v10792_v9 }
 0x579   : > { %3214 = vxpose.xlu1.c.b16.start.end [1/1] (short) (narrow) %v3184_v55, 16  ;;  %v3188_v61 = vpack.i.b16 %v3187_v4, %v3186_v25  ;;  %v4111_v14 = vcombine.low %v3973_v28, %v4037_v0  ;;  %v3204_v63 = vpack.i.b16 %v3203_v56, %v3202_v38  ;;  %v3192_v41 = vpack.i.b16 %v3180_v5, %v3146_v52 }
 0x57a   : > { %v4021_v19 = vpop.trf.xlu0  ;;  %v3181_v28 = vcombine.high %v3179_v8, %v10792_v9 }
 0x57b   : > { %3230 = vxpose.xlu0.c.b16.start.end [1/1] (short) (narrow) %v3188_v61, 16  ;;  %v4077_v3 = vcombine.low %v3957_v51, %v4021_v19  ;;  %v4118_v37 = vrot.slane %v4111_v14, %v9178_v39  ;;  %v3195_v61 = vshrl.u32 %v3180_v5, 16 }
 0x57c   : > { %v4069_v58 = vpop.trf.xlu1 }
 0x57d   : > { %v4119_v50 = vcombine.low %v4005_v42, %v4069_v58  ;;  %3294 = vxpose.xlu1.c.b16.start.end [1/1] (short) (narrow) %v3204_v63, 16  ;;  %v4084_v56 = vrot.slane %v4077_v3, %v9178_v39  ;;  %v3200_v42 = vpack.i.b16 %v3179_v8, %v3145_v21 }
 0x57e   : > { %v4053_v18 = vpop.trf.xlu0 }
 0x57f   : > { %v4126_v24 = vrot.slane %v4119_v50, %v9178_v39  ;;  %v4085_v55 = vcombine.low %v3989_v23, %v4053_v18  ;;  %3246 = vxpose.xlu0.c.b16.start.end [1/1] (short) (narrow) %v3192_v41, 16  ;;  %v3208_v41 = vpack.i.b16 %v3181_v28, %v3147_v60 }
 0x581   : > { %v4127_v4 = vcombine.low %v4118_v37, %v4126_v24  ;;  %v4128_v36 = vcombine.high %v4118_v37, %v4126_v24  ;;  %v4092_v51 = vrot.slane %v4085_v55, %v9178_v39 }
 0x583   : > { %v4135_v0 = vrot.slane %v4127_v4, %v9182_v44  ;;  %v9583_v14 = vrot.slane %v4128_v36, %v9182_v44  ;;  %v4093_v50 = vcombine.low %v4084_v56, %v4092_v51  ;;  %v4094_v18 = vcombine.high %v4084_v56, %v4092_v51  ;;  %3278 = vxpose.xlu0.c.b16.start.end [1/1] (short) (narrow) %v3200_v42, 16 }
 0x584   : > { %v3194_v4 = vshrl.u32 %v3146_v52, 16 }
 0x585   : > { %v9587_v24 = vcombine.high %v9583_v14, %v10792_v9  ;;  %v4101_v37 = vrot.slane %v4093_v50, %v9182_v44  ;;  %v9591_v23 = vrot.slane %v4094_v18, %v9182_v44  ;;  %v4150_v25 = vshrl.u32 %v4135_v0, 16 }
 0x586   : > { %v4166_v8 = vshrl.u32 %v9583_v14, 16  ;;  %v3196_v42 = vpack.i.b16 %v3195_v61, %v3194_v4  ;;  %v3210_v50 = vshrl.u32 %v3147_v60, 16  ;;  %v3211_v18 = vshrl.u32 %v3181_v28, 16 }
 0x587   : > { %3310 = vxpose.xlu0.c.b16.start.end [1/1] (short) (narrow) %v3208_v41, 16  ;;  %v4149_v21 = vshrl.u32 %v4101_v37, 16  ;;  %v4165_v38 = vshrl.u32 %v9591_v23, 16  ;;  %v9598_v19 = vcombine.high %v9591_v23, %v10792_v9  ;;  %v4174_v63 = vshrl.u32 %v9587_v24, 16  ;;  %v7690_v41 = vld [vmem:[%s763_s28] ss:$0 sm:$0xff] }
 0x588   : > { %v4163_v58 = vpack.i.b16 %v9583_v14, %v9591_v23  ;;  %v4147_v55 = vpack.i.b16 %v4135_v0, %v4101_v37  ;;  %v3212_v52 = vpack.i.b16 %v3211_v18, %v3210_v50  ;;  %v2866_v28 = vadd.f32 %v7690_v41, %v9561_v40 }
 0x589   : > { %v4151_v3 = vpack.i.b16 %v4150_v25, %v4149_v21  ;;  %v9603_v36 = vpack.i.b16 %v4166_v8, %v4165_v38  ;;  %v4173_v56 = vshrl.u32 %v9598_v19, 16  ;;  %v2812_v25 = vadd.f32 %v7690_v41, %v9559_v11 }
 0x58a   : > { %v2920_v8 = vadd.f32 %v7690_v41, %v9563_v47  ;;  %v2758_v38 = vadd.f32 %v7690_v41, %v9557_v10  ;;  %v4109_v11 = vcombine.high %v4101_v37, %v10792_v9  ;;  %v4143_v47 = vcombine.high %v4135_v0, %v10792_v9 }
 0x58b   : > { %4193 = vxpose.xlu1.c.b16.start.end [1/1] (short) (narrow) %v4151_v3, 16  ;;  %4177 = vxpose.xlu0.c.b16.start.end [1/1] (short) (narrow) %v4147_v55, 16  ;;  %v9611_v5 = vpack.i.b16 %v4174_v63, %v4173_v56  ;;  %v2928_v21 = vsel %vm2715_vm5, %v2812_v25, -inf  ;;  %v2931_v63 = vsel %vm2715_vm5, %v2866_v28, -inf }
 0x58c   : > { %v2934_v60 = vsel %vm2715_vm5, %v2920_v8, -inf  ;;  %v2925_v61 = vsel %vm2715_vm5, %v2758_v38, -inf  ;;  %v4155_v3 = vpack.i.b16 %v4143_v47, %v4109_v11  ;;  %v4157_v55 = vshrl.u32 %v4109_v11, 16 }
 0x58d   : > { %v4158_v4 = vshrl.u32 %v4143_v47, 16 }
 0x58f   : > { %3262 = vxpose.xlu1.c.b16.start.end [1/1] (short) (narrow) %v3196_v42, 16  ;;  %v4159_v10 = vpack.i.b16 %v4158_v4, %v4157_v55 }
 0x593   : > { %3326 = vxpose.xlu1.c.b16.start.end [1/1] (short) (narrow) %v3212_v52, 16 }
 0x598   : > { %2929 = vmax.xlane.f32.xlu0 %v2928_v21 }
 0x59c   : > { %2935 = vmax.xlane.f32.xlu0 %v2934_v60 }
 0x5a0   : > { %2926 = vmax.xlane.f32.xlu1 %v2925_v61 }
 0x5a4   : > { %2932 = vmax.xlane.f32.xlu1 %v2931_v63 }
 0x5c9   : > { %4209 = vxpose.xlu0.c.b16.start.end [1/1] (short) (narrow) %v4155_v3, 16 }
 0x5d1   : > { %4225 = vxpose.xlu1.c.b16.start.end [1/1] (short) (narrow) %v4159_v10, 16 }
 0x5df   : > { %v9630_v40 = vpop.trf.xlu1 }
 0x5e1   : > { %v9626_v56 = vpop.trf.xlu0 }
 0x5e3   : > { %v3302_v18 = vpop.trf.xlu1 }
 0x5e5   : > { %v9628_v42 = vpop.trf.xlu0 }
 0x5e9   : > { %v3286_v50 = vpop.trf.xlu0 }
 0x5ed   : > { %v3318_v52 = vpop.trf.xlu0 }
 0x5f1   : > { %v9632_v41 = vpop.trf.xlu1  ;;  %v9634_v37 = vpop.trf.xlu0 }
 0x5f5   : > { %v3270_v0 = vpop.trf.xlu1 }
 0x5f9   : > { %v3334_v63 = vpop.trf.xlu1 }
 0x625   : > { %v2930_v21 = vpop.xlane.xlu0 %2929 }
 0x626   : > { %v2938_v60 = vsub.f32 %v2812_v25, %v2930_v21 }
 0x628   : > { %v2943_v61 = vmul.f32 1.442695, %v2938_v60 }
 0x629   : > { %v2936_v25 = vpop.xlane.xlu0 %2935 }
 0x62a   : > { %8137 = vpow2.f32 %v2943_v61 }
 0x62d   : > { %v2927_v11 = vpop.xlane.xlu1 %2926 }
 0x62e   : > { %v2937_v47 = vsub.f32 %v2758_v38, %v2927_v11  ;;  %v2940_v38 = vsub.f32 %v2920_v8, %v2936_v25  ;;  %v10795_v8 = vpack.i.b16 %v9587_v24, %v9598_v19 }
 0x630   : > { %v2941_v3 = vmul.f32 1.442695, %v2937_v47  ;;  %v2947_v21 = vmul.f32 1.442695, %v2940_v38 }
 0x631   : > { %v2933_v60 = vpop.xlane.xlu1 %2932 }
 0x632   : > { %8139 = vpow2.f32 %v2941_v3  ;;  %v2939_v61 = vsub.f32 %v2866_v28, %v2933_v60 }
 0x633   : > { %8141 = vpow2.f32 %v2947_v21 }
 0x634   : > { %v9636_v55 = vpop.eup %8137  ;;  %v2945_v11 = vmul.f32 1.442695, %v2939_v61 }
 0x635   : > { %v2952_v4 = vsel %vm2715_vm5, %v9636_v55, 0.0 }
 0x636   : > { %2953 = vadd.xlane.f32.xlu1 %v2952_v4  ;;  %8143 = vpow2.f32 %v2945_v11 }
 0x63c   : > { %v9640_v10 = vpop.eup %8139 }
 0x63d   : > { %v2949_v51 = vsel %vm2715_vm5, %v9640_v10, 0.0  ;;  %v9648_v47 = vpop.eup %8141 }
 0x63e   : > { %2950 = vadd.xlane.f32.xlu0 %v2949_v51  ;;  %v2958_v3 = vsel %vm2715_vm5, %v9648_v47, 0.0 }
 0x640   : > { %v9652_v51 = vpop.eup %8143 }
 0x641   : > { %v2955_v4 = vsel %vm2715_vm5, %v9652_v51, 0.0 }
 0x647   : > { %843 = vrot.lane.b32.xlu1 %v9133_v20, %s8672_s17 }
 0x654   : > { %841 = vrot.lane.b32.xlu0 %v9133_v20, %s8673_s3 }
 0x66b   : > { %2959 = vadd.xlane.f32.xlu1 %v2958_v3 }
 0x673   : > { %2956 = vadd.xlane.f32.xlu0 %v2955_v4 }
 0x698   : > { %4257 = vxpose.xlu1.c.b16.start.end [1/1] (short) (narrow) %v9603_v36, 16 }
 0x69c   : > { %4289 = vxpose.xlu1.c.b16.start.end [1/1] (short) (narrow) %v9611_v5, 16 }
 0x6a0   : > { %4241 = vxpose.xlu0.c.b16.start.end [1/1] (short) (narrow) %v4163_v58, 16  ;;  %1428 = vrot.lane.b32.xlu1 %v9380_v46, %s8674_s21  ;;  %v3342_v46 = vcombine.low %v9630_v40, %v3286_v50 }
 0x6a4   : > { %4273 = vxpose.xlu0.c.b16.start.end [1/1] (short) (narrow) %v10795_v8, 16  ;;  %1430 = vrot.lane.b32.xlu1 %v9297_v16, %s8674_s21  ;;  %v9686_v16 = vpop.trf.xlu1 }
 0x6a8   : > { %2108 = vrot.lane.b32.xlu1 %v9467_v30, %s8670_s23 }
 0x6ac   : > { %2110 = vrot.lane.b32.xlu1 %v9469_v31, %s8670_s23  ;;  %v3349_v31 = vrot.slane %v3342_v46, %v9178_v39  ;;  %v10796_v46 = vmov 0.0  }
 0x6ad   : > { %1426 = vrot.lane.b32.xlu0 %v9281_v35, %s8674_s21  ;;  %v3367_v35 = vcombine.low %v9626_v56, %v3302_v18 }
 0x6b0   : > { %2114 = vrot.lane.b32.xlu1 %v9463_v13, %s8670_s23  ;;  %v3375_v13 = vcombine.low %v3270_v0, %v3334_v63 }
 0x6b1   : > { %1432 = vrot.lane.b32.xlu0 %v9394_v53, %s8674_s21  ;;  %v3350_v53 = vcombine.low %v9628_v42, %v3318_v52 }
 0x6b4   : > { %2118 = vrot.lane.b32.xlu1 %v9471_v33, %s8670_s23  ;;  %v3382_v33 = vrot.slane %v3375_v13, %v9178_v39 }
 0x6b5   : > { %2106 = vrot.lane.b32.xlu0 %v9461_v1, %s8670_s23  ;;  %v3374_v1 = vrot.slane %v3367_v35, %v9178_v39 }
 0x6b7   : > { %v3383_v23 = vcombine.low %v3374_v1, %v3382_v33 }
 0x6b9   : > { %2112 = vrot.lane.b32.xlu0 %v9483_v48, %s8670_s23  ;;  %v9697_v48 = vpop.trf.xlu0  ;;  %v9703_v5 = vrot.slane %v3383_v23, %v9182_v44 }
 0x6bb   : > { %v3396_v0 = vshrl.u32 %v9703_v5, 16 }
 0x6bd   : > { %2116 = vrot.lane.b32.xlu0 %v9473_v34, %s8670_s23  ;;  %v3357_v34 = vrot.slane %v3350_v53, %v9178_v39 }
 0x6bf   : > { %v3358_v19 = vcombine.low %v3349_v31, %v3357_v34 }
 0x6c1   : > { %2120 = vrot.lane.b32.xlu0 %v9496_v57, %s8670_s23  ;;  %v885_v57 = vrot.slane %v9164_v27, %v9178_v39  ;;  %v9706_v28 = vrot.slane %v3358_v19, %v9182_v44  ;;  %v851_v27 = vrot.slane %v9133_v20, %v9178_v39 }
 0x6c3   : > { %v2954_v30 = vpop.xlane.xlu1 %2953  ;;  %v3395_v63 = vshrl.u32 %v9706_v28, 16 }
 0x6c4   : > { %8145 = vrcp.f32 %v2954_v30 }
 0x6c5   : > { %v3397_v35 = vpack.i.b16 %v3396_v0, %v3395_v63 }
 0x6c7   : > { %v844_v14 = vpop.permute.xlu1 %843 }
 0x6c8   : > { %v893_v24 = vrot.slane %v844_v14, %v9178_v39 }
 0x6ca   : > { %v894_v58 = vcombine.low %v885_v57, %v893_v24  ;;  %v895_v56 = vcombine.high %v885_v57, %v893_v24 }
 0x6cb   : > { %v2951_v36 = vpop.xlane.xlu0 %2950 }
 0x6cc   : > { %8147 = vrcp.f32 %v2951_v36  ;;  %v902_v40 = vrot.slane %v894_v58, %v9182_v44  ;;  %v909_v25 = vrot.slane %v895_v56, %v9182_v44 }
 0x6ce   : > { %v8146_v42 = vpop.eup %8145  ;;  %v910_v61 = vcombine.high %v902_v40, %v10792_v9  ;;  %v911_v3 = vcombine.high %v909_v25, %v10792_v9  ;;  %v917_v4 = vshrl.u32 %v902_v40, 16  ;;  %v933_v8 = vshrl.u32 %v909_v25, 16 }
 0x6cf   : > { %v842_v50 = vpop.permute.xlu0 %841  ;;  %v2966_v18 = vmul.f32 %v8146_v42, %v9636_v55 }
 0x6d0   : > { %v859_v52 = vrot.slane %v842_v50, %v9178_v39  ;;  %v925_v33 = vshrl.u32 %v910_v61, 16  ;;  %v941_v36 = vshrl.u32 %v911_v3, 16 }
 0x6d1   : > { %v2970_v38 = vpack.c.bf16 %v2966_v18, %v2966_v18 }
 0x6d2   : > { %v860_v21 = vcombine.low %v851_v27, %v859_v52  ;;  %v861_v60 = vcombine.high %v851_v27, %v859_v52  ;;  %v3394_v27 = vpack.i.b16 %v9703_v5, %v9706_v28 }
 0x6d3   : > { %2975 = vst.msk [vmem:[%s9721_s10 + $0x4] sm:$0xf] %vm2973_vm6, %v2970_v38  ;;  %v3454_v20 = vsel %vm2715_vm5, %v2970_v38, 0 }
 0x6d4   : > { %v868_v55 = vrot.slane %v860_v21, %v9182_v44  ;;  %v875_v11 = vrot.slane %v861_v60, %v9182_v44  ;;  %7854 = vmatpush3.bf16.xpose.msra.mxu0 %v3454_v20 }
 0x6d5   : > { %7865 = vmatprep.subr.bf16.mxu0 %v10796_v46 }
 0x6d6   : > { %v8148_v13 = vpop.eup %8147  ;;  %v876_v53 = vcombine.high %v868_v55, %v10792_v9  ;;  %v877_v30 = vcombine.high %v875_v11, %v10792_v9  ;;  %v914_v1 = vpack.i.b16 %v902_v40, %v868_v55  ;;  %v916_v31 = vshrl.u32 %v868_v55, 16 }
 0x6d7   : > { %v930_v34 = vpack.i.b16 %v909_v25, %v875_v11  ;;  %v932_v14 = vshrl.u32 %v875_v11, 16  ;;  %v2965_v24 = vmul.f32 %v8148_v13, %v9640_v10 }
 0x6d8   : > { %v918_v23 = vpack.i.b16 %v917_v4, %v916_v31  ;;  %v922_v19 = vpack.i.b16 %v910_v61, %v876_v53  ;;  %v924_v57 = vshrl.u32 %v876_v53, 16  ;;  %v938_v58 = vpack.i.b16 %v911_v3, %v877_v30  ;;  %1905 = vst.msk [vmem:[#allocation2] sm:$0x3] %vm1904_vm3, %v914_v1 }
 0x6d9   : > { %v934_v56 = vpack.i.b16 %v933_v8, %v932_v14  ;;  %v940_v42 = vshrl.u32 %v877_v30, 16  ;;  %1909 = vst.msk [vmem:[#allocation2 + $0x8] sm:$0x3] %vm1904_vm3, %v930_v34  ;;  %v2969_v50 = vpack.c.bf16 %v2965_v24, %v2965_v24  ;;  %v9763_v3 = vcombine.high %v9703_v5, %v10792_v9 }
 0x6da   : > { %v926_v40 = vpack.i.b16 %v925_v33, %v924_v57  ;;  %1906 = vst.msk [vmem:[#allocation2 + $0x2] sm:$0x3] %vm1904_vm3, %v918_v23  ;;  %1907 = vst.msk [vmem:[#allocation2 + $0x4] sm:$0x3] %vm1904_vm3, %v922_v19  ;;  %v3366_v4 = vcombine.high %v9706_v28, %v10792_v9 }
 0x6db   : > { %1911 = vst.msk [vmem:[#allocation2 + $0xc] sm:$0x3] %vm1904_vm3, %v938_v58  ;;  %v942_v10 = vpack.i.b16 %v941_v36, %v940_v42  ;;  %1910 = vst.msk [vmem:[#allocation2 + $0xa] sm:$0x3] %vm1904_vm3, %v934_v56  ;;  %7856 = vmatmul.mubr.msk.bf16.vlgmr.msra.gmra.mrb[16].mxu0 %vm2715_vm5, %v3397_v35  ;;  %v3408_v18 = vsel %vm2715_vm5, %v2969_v50, 0  ;;  %v3402_v28 = vshrl.u32 %v9763_v3, 16 }
 0x6dc   : > { %2974 = vst.msk [vmem:[%s9721_s10] sm:$0xf] %vm2973_vm6, %v2969_v50  ;;  %7848 = vmatpush3.bf16.xpose.msra.mxu1 %v3408_v18  ;;  %7867 = vmatprep.mubr.msk.bf16.mxu0 %vm8663_vm0, %v10796_v46  ;;  %v3401_v1 = vshrl.u32 %v3366_v4, 16 }
 0x6dd   : > { %1908 = vst.msk [vmem:[#allocation2 + $0x6] sm:$0x3] %vm1904_vm3, %v926_v40  ;;  %1912 = vst.msk [vmem:[#allocation2 + $0xe] sm:$0x3] %vm1904_vm3, %v942_v10  ;;  %7859 = vmatprep.subr.bf16.mxu1 %v10796_v46 }
 0x6de   : > { %v3403_v57 = vpack.i.b16 %v3402_v28, %v3401_v1 }
 0x6e3   : > { %7850 = vmatmul.mubr.msk.bf16.vlgmr.msra.gmra.mrb[12].mxu1 %vm2715_vm5, %v3394_v27 }
 0x6e4   : > { %7861 = vmatprep.mubr.msk.bf16.mxu1 %vm8663_vm0, %v10796_v46  ;;  %v9756_v20 = vld.sshfl [vmem:[#allocation2 + $0x2] sm:$0x33 pattern:$0x73516240] }
 0x6e5   : > { %v9759_v11 = vld.sshfl [vmem:[#allocation2 + $0xa] sm:$0x33 pattern:$0x73516240]  ;;  %v3929_v14 = vshrl.u32 %v9756_v20, 16  ;;  %v9793_v50 = vcombine.high %v9756_v20, %v10792_v9 }
 0x6e6   : > { %v3941_v19 = vshrl.u32 %v9759_v11, 16  ;;  %v9797_v40 = vcombine.high %v9759_v11, %v10792_v9 }
 0x6f8   : > { %v2960_v52 = vpop.xlane.xlu1 %2959 }
 0x6f9   : > { %8149 = vrcp.f32 %v2960_v52 }
 0x6fe   : > { %v4265_v0 = vpop.trf.xlu1 }
 0x6ff   : > { %v4330_v21 = vcombine.low %v9632_v41, %v4265_v0  ;;  %v9767_v41 = vld.sshfl [vmem:[#allocation2] sm:$0x33 pattern:$0x73516240] }
 0x700   : > { %v2957_v63 = vpop.xlane.xlu0 %2956  ;;  %v3928_v36 = vshrl.u32 %v9767_v41, 16  ;;  %v3897_v0 = vcombine.high %v9767_v41, %v10792_v9 }
 0x701   : > { %8151 = vrcp.f32 %v2957_v63 }
 0x702   : > { %v4297_v25 = vpop.trf.xlu1 }
 0x703   : > { %v8150_v38 = vpop.eup %8149  ;;  %v4338_v60 = vcombine.low %v9686_v16, %v4297_v25  ;;  %v4337_v16 = vrot.slane %v4330_v21, %v9178_v39 }
 0x704   : > { %v2968_v61 = vmul.f32 %v8150_v38, %v9648_v47  ;;  %v9770_v47 = vld.sshfl [vmem:[#allocation2 + $0x8] sm:$0x33 pattern:$0x73516240] }
 0x705   : > { %v4345_v55 = vrot.slane %v4338_v60, %v9178_v39  ;;  %v3940_v42 = vshrl.u32 %v9770_v47, 16  ;;  %v3915_v21 = vcombine.high %v9770_v47, %v10792_v9  ;;  %v3939_v1 = vpack.i.b16 %v9759_v11, %v9770_v47 }
 0x706   : > { %v4249_v8 = vpop.trf.xlu0  ;;  %v2972_v35 = vpack.c.bf16 %v2968_v61, %v2968_v61  ;;  %v3935_v61 = vshrl.u32 %v9793_v50, 16 }
 0x707   : > { %v4346_v53 = vcombine.low %v4337_v16, %v4345_v55  ;;  %v4305_v30 = vcombine.low %v9634_v37, %v4249_v8  ;;  %v3942_v18 = vpack.i.b16 %v3941_v19, %v3940_v42  ;;  %v3947_v55 = vshrl.u32 %v9797_v40, 16 }
 0x708   : > { %2977 = vst.msk [vmem:[%s9721_s10 + $0xc] sm:$0xf] %vm2973_vm6, %v2972_v35  ;;  %v3546_v13 = vsel %vm2715_vm5, %v2972_v35, 0 }
 0x709   : > { %7866 = vmatpush3.bf16.xpose.msra.mxu0 %v3546_v13  ;;  %v4353_v24 = vrot.slane %v4346_v53, %v9182_v44  ;;  %v4312_v23 = vrot.slane %v4305_v30, %v9178_v39  ;;  %v3400_v30 = vpack.i.b16 %v9763_v3, %v3366_v4 }
 0x70a   : > { %v4281_v5 = vpop.trf.xlu0  ;;  %7877 = vmatprep.subr.bf16.mxu0 %v10796_v46 }
 0x70b   : > { %v8152_v31 = vpop.eup %8151  ;;  %v4313_v33 = vcombine.low %v9697_v48, %v4281_v5  ;;  %v3930_v48 = vpack.i.b16 %v3929_v14, %v3928_v36  ;;  %v4354_v27 = vcombine.high %v4353_v24, %v10792_v9  ;;  %v4359_v25 = vshrl.u32 %v4353_v24, 16 }
 0x70c   : > { %v2967_v34 = vmul.f32 %v8152_v31, %v9652_v51  ;;  %v3927_v5 = vpack.i.b16 %v9756_v20, %v9767_v41 }
 0x70d   : > { %v4320_v37 = vrot.slane %v4313_v33, %v9178_v39  ;;  %v4421_v35 = vcombine.low %v3930_v48, %v3942_v18  ;;  %v4365_v13 = vshrl.u32 %v4354_v27, 16  ;;  %v3934_v33 = vshrl.u32 %v3897_v0, 16 }
 0x70e   : > { %v2971_v58 = vpack.c.bf16 %v2967_v34, %v2967_v34  ;;  %v3946_v34 = vshrl.u32 %v3915_v21, 16  ;;  %v4367_v11 = vcombine.low %v3927_v5, %v3939_v1 }
 0x70f   : > { %v4321_v56 = vcombine.low %v4312_v23, %v4320_v37  ;;  %v3936_v3 = vpack.i.b16 %v3935_v61, %v3934_v33 }
 0x710   : > { %7868 = vmatmul.mubr.msk.bf16.vlgmr.msra.gmra.mrb[20].mxu0 %vm2715_vm5, %v3403_v57  ;;  %2976 = vst.msk [vmem:[%s9721_s10 + $0x8] sm:$0xf] %vm2973_vm6, %v2971_v58  ;;  %v3500_v51 = vsel %vm2715_vm5, %v2971_v58, 0  ;;  %v3948_v20 = vpack.i.b16 %v3947_v55, %v3946_v34  ;;  %v4374_v57 = vrot.slane %v4367_v11, %v9178_v39  ;;  %v3933_v58 = vpack.i.b16 %v9793_v50, %v3897_v0 }
 0x711   : > { %v4328_v10 = vrot.slane %v4321_v56, %v9182_v44  ;;  %7860 = vmatpush3.bf16.xpose.msra.mxu1 %v3500_v51  ;;  %7879 = vmatprep.mubr.msk.bf16.mxu0 %vm8663_vm0, %v10796_v46 }
 0x712   : > { %v9803_v52 = vpop.permute.xlu1 %1428  ;;  %7871 = vmatprep.subr.bf16.mxu1 %v10796_v46  ;;  %v4529_v37 = vcombine.low %v3936_v3, %v3948_v20 }
 0x713   : > { %v4358_v63 = vshrl.u32 %v4328_v10, 16  ;;  %v4329_v38 = vcombine.high %v4328_v10, %v10792_v9  ;;  %v4357_v60 = vpack.i.b16 %v4353_v24, %v4328_v10  ;;  %v4428_v24 = vrot.slane %v4421_v35, %v9178_v39 }
 0x714   : > { %v4536_v10 = vrot.slane %v4529_v37, %v9178_v39 }
 0x715   : > { %v4360_v8 = vpack.i.b16 %v4359_v25, %v4358_v63  ;;  %v4364_v16 = vshrl.u32 %v4329_v38, 16  ;;  %v4379_v14 = vsel %vm2719_vm4, %v4357_v60, 0  ;;  %v4363_v23 = vpack.i.b16 %v4354_v27, %v4329_v38 }
 0x716   : > { %v1431_v53 = vpop.permute.xlu1 %1430 }
 0x717   : > { %v4433_v28 = vsel %vm2719_vm4, %v4360_v8, 0  ;;  %v4366_v31 = vpack.i.b16 %v4365_v13, %v4364_v16  ;;  %v1449_v42 = vrot.slane %v1431_v53, %v9178_v39  ;;  %v4487_v48 = vsel %vm2719_vm4, %v4363_v23, 0 }
 0x718   : > { %7862 = vmatmul.mubr.msk.bf16.vlgmr.msra.gmra.mrb[16].mxu1 %vm2715_vm5, %v3400_v30  ;;  %7878 = vmatpush3.bf16.msra.mxu0 %v4433_v28 }
 0x719   : > { %7872 = vmatpush3.bf16.msra.mxu1 %v4379_v14  ;;  %7889 = vmatprep.subr.bf16.mxu0 %v10796_v46  ;;  %v4541_v47 = vsel %vm2719_vm4, %v4366_v31, 0 }
 0x71a   : > { %v2109_v4 = vpop.permute.xlu1 %2108  ;;  %7873 = vmatprep.mubr.msk.bf16.mxu1 %vm8663_vm0, %v10796_v46  ;;  %7883 = vmatprep.subr.bf16.mxu1 %v10796_v46 }
 0x71b   : > { %v2126_v41 = vsel %vm1945_vm2, %v9219_v49, %v2109_v4  ;;  %7880 = vmatmul.mubr.msk.bf16.vlgmr.msra.gmra.mrb[24].mxu0 %vm2715_vm5, %v4428_v24  ;;  %v3945_v49 = vpack.i.b16 %v9797_v40, %v3915_v21  ;;  %v1475_v21 = vrot.slane %v9803_v52, %v9178_v39 }
 0x71c   : > { %2147 = vst.msk [vmem:[#allocation9 + $0x2] sm:$0x3] %vm1904_vm3, %v2126_v41  ;;  %7890 = vmatpush3.bf16.msra.mxu0 %v4541_v47  ;;  %7891 = vmatprep.mubr.msk.bf16.mxu0 %vm8663_vm0, %v10796_v46 }
 0x71d   : > { %7901 = vmatprep.subr.bf16.mxu0 %v10796_v46  ;;  %v4475_v18 = vcombine.low %v3933_v58, %v3945_v49 }
 0x71e   : > { %v2111_v19 = vpop.permute.xlu1 %2110 }
 0x71f   : > { %v2129_v36 = vsel %vm1945_vm2, %v9246_v2, %v2111_v19  ;;  %v1427_v56 = vpop.permute.xlu0 %1426  ;;  %v4482_v61 = vrot.slane %v4475_v18, %v9178_v39 }
 0x720   : > { %2148 = vst.msk [vmem:[#allocation9 + $0x4] sm:$0x3] %vm1904_vm3, %v2129_v36  ;;  %v1441_v51 = vrot.slane %v1427_v56, %v9178_v39  ;;  %7874 = vmatmul.mubr.msk.bf16.vlgmr.msra.gmra.mrb[20].mxu1 %vm2715_vm5, %v4374_v57 }
 0x721   : > { %7884 = vmatpush3.bf16.msra.mxu1 %v4487_v48  ;;  %7885 = vmatprep.mubr.msk.bf16.mxu1 %vm8663_vm0, %v10796_v46 }
 0x722   : > { %v1450_v50 = vcombine.low %v1441_v51, %v1449_v42  ;;  %v1451_v40 = vcombine.high %v1441_v51, %v1449_v42  ;;  %v2115_v2 = vpop.permute.xlu1 %2114  ;;  %7895 = vmatprep.subr.bf16.mxu1 %v10796_v46 }
 0x723   : > { %v2135_v27 = vsel %vm1945_vm2, %v9228_v54, %v2115_v2  ;;  %7892 = vmatmul.mubr.msk.bf16.vlgmr.msra.gmra.mrb[28].mxu0 %vm2715_vm5, %v4536_v10  ;;  %v1433_v0 = vpop.permute.xlu0 %1432  ;;  %v5536_v2 = vld [vmem:[#allocation9 + $0x2] sm:$0x3] }
 0x724   : > { %v1458_v63 = vrot.slane %v1450_v50, %v9182_v44  ;;  %v1465_v25 = vrot.slane %v1451_v40, %v9182_v44  ;;  %2150 = vst.msk [vmem:[#allocation9 + $0x8] sm:$0x3] %vm1904_vm3, %v2135_v27  ;;  %v1483_v38 = vrot.slane %v1433_v0, %v9178_v39  ;;  %7903 = vmatprep.mubr.msk.bf16.mxu0 %vm8663_vm0, %v10796_v46 }
 0x726   : > { %v1466_v60 = vcombine.high %v1458_v63, %v10792_v9  ;;  %v2119_v54 = vpop.permute.xlu1 %2118  ;;  %v1484_v55 = vcombine.low %v1475_v21, %v1483_v38  ;;  %v1485_v8 = vcombine.high %v1475_v21, %v1483_v38  ;;  %v1467_v13 = vcombine.high %v1465_v25, %v10792_v9 }
 0x727   : > { %v2141_v35 = vsel %vm1945_vm2, %v9263_v12, %v2119_v54  ;;  %v2107_v16 = vpop.permute.xlu0 %2106  ;;  %v1505_v12 = vshrl.u32 %v1458_v63, 16  ;;  %v1517_v1 = vshrl.u32 %v1465_v25, 16  ;;  %v5537_v27 = vld [vmem:[#allocation9 + $0x4] sm:$0x3] }
 0x728   : > { %2152 = vst.msk [vmem:[#allocation9 + $0xc] sm:$0x3] %vm1904_vm3, %v2141_v35  ;;  %v2123_v53 = vsel %vm1945_vm2, %v9212_v45, %v2107_v16  ;;  %7886 = vmatmul.mubr.msk.bf16.vlgmr.msra.gmra.mrb[24].mxu1 %vm2715_vm5, %v4482_v61  ;;  %v1492_v52 = vrot.slane %v1484_v55, %v9182_v44  ;;  %v1499_v30 = vrot.slane %v1485_v8, %v9182_v44  ;;  %v1511_v5 = vshrl.u32 %v1466_v60, 16 }
 0x729   : > { %2146 = vst.msk [vmem:[#allocation9] sm:$0x3] %vm1904_vm3, %v2123_v53  ;;  %7897 = vmatprep.mubr.msk.bf16.mxu1 %vm8663_vm0, %v10796_v46  ;;  %v1523_v14 = vshrl.u32 %v1467_v13, 16 }
 0x72a   : > { %v1500_v28 = vcombine.high %v1492_v52, %v10792_v9  ;;  %v1501_v31 = vcombine.high %v1499_v30, %v10792_v9  ;;  %v9875_v33 = vpack.i.b16 %v1492_v52, %v1458_v63  ;;  %v1506_v45 = vshrl.u32 %v1492_v52, 16 }
 0x72b   : > { %v2113_v34 = vpop.permute.xlu0 %2112  ;;  %v9877_v24 = vpack.i.b16 %v1499_v30, %v1465_v25  ;;  %v1518_v3 = vshrl.u32 %v1499_v30, 16  ;;  %v5539_v63 = vld [vmem:[#allocation9 + $0x8] sm:$0x3] }
 0x72c   : > { %v2132_v20 = vsel %vm1945_vm2, %v9255_v7, %v2113_v34  ;;  %v9881_v4 = vpack.i.b16 %v1506_v45, %v1505_v12  ;;  %v9883_v11 = vpack.i.b16 %v1500_v28, %v1466_v60  ;;  %v1512_v41 = vshrl.u32 %v1500_v28, 16 }
 0x72d   : > { %v9885_v47 = vpack.i.b16 %v1501_v31, %v1467_v13  ;;  %2149 = vst.msk [vmem:[#allocation9 + $0x6] sm:$0x3] %vm1904_vm3, %v2132_v20  ;;  %v9888_v23 = vpack.i.b16 %v1518_v3, %v1517_v1  ;;  %v1524_v37 = vshrl.u32 %v1501_v31, 16  ;;  %v2075_v19 = vsel %vm1945_vm2, %v9875_v33, %v9441_v26 }
 0x72e   : > { %v2087_v7 = vsel %vm1945_vm2, %v9877_v24, %v9510_v15  ;;  %v9896_v57 = vpack.i.b16 %v1512_v41, %v1511_v5  ;;  %v2078_v58 = vsel %vm1945_vm2, %v9881_v4, %v9457_v6  ;;  %v2081_v49 = vsel %vm1945_vm2, %v9883_v11, %v9465_v22  ;;  %2098 = vst.msk [vmem:[#allocation8] sm:$0x3] %vm1904_vm3, %v2075_v19 }
 0x72f   : > { %v2093_v36 = vsel %vm1945_vm2, %v9885_v47, %v9543_v29  ;;  %2102 = vst.msk [vmem:[#allocation8 + $0x8] sm:$0x3] %vm1904_vm3, %v2087_v7  ;;  %v2117_v26 = vpop.permute.xlu0 %2116  ;;  %v9909_v15 = vpack.i.b16 %v1524_v37, %v1523_v14  ;;  %v2090_v56 = vsel %vm1945_vm2, %v9888_v23, %v9531_v62  ;;  %2099 = vst.msk [vmem:[#allocation8 + $0x2] sm:$0x3] %vm1904_vm3, %v2078_v58  ;;  %v5541_v38 = vld [vmem:[#allocation9 + $0xc] sm:$0x3] }
 0x730   : > { %2100 = vst.msk [vmem:[#allocation8 + $0x4] sm:$0x3] %vm1904_vm3, %v2081_v49  ;;  %2104 = vst.msk [vmem:[#allocation8 + $0xc] sm:$0x3] %vm1904_vm3, %v2093_v36  ;;  %v2138_v6 = vsel %vm1945_vm2, %v9237_v59, %v2117_v26  ;;  %v2084_v22 = vsel %vm1945_vm2, %v9896_v57, %v9481_v43 }
 0x731   : > { %2103 = vst.msk [vmem:[#allocation8 + $0xa] sm:$0x3] %vm1904_vm3, %v2090_v56  ;;  %2151 = vst.msk [vmem:[#allocation9 + $0xa] sm:$0x3] %vm1904_vm3, %v2138_v6  ;;  %v2096_v62 = vsel %vm1945_vm2, %v9909_v15, %v9551_v32 }
 0x732   : > { %2101 = vst.msk [vmem:[#allocation8 + $0x6] sm:$0x3] %vm1904_vm3, %v2084_v22  ;;  %2105 = vst.msk [vmem:[#allocation8 + $0xe] sm:$0x3] %vm1904_vm3, %v2096_v62 }
 0x733   : > { %v2121_v29 = vpop.permute.xlu0 %2120 }
 0x734   : > { %v2144_v59 = vsel %vm1945_vm2, %v9271_v17, %v2121_v29  ;;  %v5535_v17 = vld [vmem:[#allocation9] sm:$0x3]  ;;  %v5538_v18 = vld [vmem:[#allocation9 + $0x6] sm:$0x3] }
 0x735   : > { %2153 = vst.msk [vmem:[#allocation9 + $0xe] sm:$0x3] %vm1904_vm3, %v2144_v59  ;;  %v4635_v42 = vld [vmem:[#allocation8] sm:$0x3] }
 0x736   : > { %4643 = vxpose.xlu1.c.b16.start.end [1/1] (short) (narrow) %v4635_v42, 16  ;;  %v4636_v43 = vld [vmem:[#allocation8 + $0x2] sm:$0x3]  ;;  %v4639_v32 = vld [vmem:[#allocation8 + $0x8] sm:$0x3] }
 0x737   : > { %4659 = vxpose.xlu0.c.b16.start.end [1/1] (short) (narrow) %v4636_v43, 16  ;;  %v4637_v48 = vld [vmem:[#allocation8 + $0x4] sm:$0x3]  ;;  %v4641_v40 = vld [vmem:[#allocation8 + $0xc] sm:$0x3] }
 0x738   : > { %v4640_v10 = vld [vmem:[#allocation8 + $0xa] sm:$0x3]  ;;  %v5540_v0 = vld [vmem:[#allocation9 + $0xa] sm:$0x3] }
 0x739   : > { %v4638_v51 = vld [vmem:[#allocation8 + $0x6] sm:$0x3]  ;;  %v4642_v50 = vld [vmem:[#allocation8 + $0xe] sm:$0x3] }
 0x73a   : > { %4691 = vxpose.xlu1.c.b16.start.end [1/1] (short) (narrow) %v4638_v51, 16 }
 0x73b   : > { %4675 = vxpose.xlu0.c.b16.start.end [1/1] (short) (narrow) %v4637_v48, 16 }
 0x73c   : > { %v5542_v25 = vld [vmem:[#allocation9 + $0xe] sm:$0x3] }
 0x73e   : > { %4723 = vxpose.xlu1.c.b16.start.end [1/1] (short) (narrow) %v4640_v10, 16 }
 0x73f   : > { %4707 = vxpose.xlu0.c.b16.start.end [1/1] (short) (narrow) %v4639_v32, 16 }
 0x742   : > { %4755 = vxpose.xlu1.c.b16.start.end [1/1] (short) (narrow) %v4642_v50, 16 }
 0x743   : > { %4739 = vxpose.xlu0.c.b16.start.end [1/1] (short) (narrow) %v4641_v40, 16 }
 0x746   : > { %5625 = vxpose.xlu1.c.b16.start.end [1/1] (short) (narrow) %v5536_v2, 16 }
 0x747   : > { %5609 = vxpose.xlu0.c.b16.start.end [1/1] (short) (narrow) %v5535_v17, 16 }
 0x74a   : > { %5657 = vxpose.xlu1.c.b16.start.end [1/1] (short) (narrow) %v5538_v18, 16 }
 0x74b   : > { %5641 = vxpose.xlu0.c.b16.start.end [1/1] (short) (narrow) %v5537_v27, 16 }
 0x74e   : > { %5689 = vxpose.xlu1.c.b16.start.end [1/1] (short) (narrow) %v5540_v0, 16 }
 0x74f   : > { %5673 = vxpose.xlu0.c.b16.start.end [1/1] (short) (narrow) %v5539_v63, 16 }
 0x752   : > { %5721 = vxpose.xlu1.c.b16.start.end [1/1] (short) (narrow) %v5542_v25, 16 }
 0x753   : > { %5705 = vxpose.xlu0.c.b16.start.end [1/1] (short) (narrow) %v5541_v38, 16 }
 0x79c   : > { %v4651_v21 = vpop.trf.xlu1 }
 0x79d   : > { %v4667_v60 = vpop.trf.xlu0 }
 0x7a0   : > { %v4699_v54 = vpop.trf.xlu1 }
 0x7a1   : > { %v4683_v61 = vpop.trf.xlu0 }
 0x7a4   : > { %v4731_v55 = vpop.trf.xlu1 }
 0x7a5   : > { %v4805_v8 = vcombine.low %v4667_v60, %v4731_v55  ;;  %v4715_v35 = vpop.trf.xlu0 }
 0x7a6   : > { %v4771_v16 = vcombine.low %v4651_v21, %v4715_v35 }
 0x7a7   : > { %v4812_v53 = vrot.slane %v4805_v8, %v9178_v39 }
 0x7a8   : > { %v4763_v13 = vpop.trf.xlu1  ;;  %v4778_v12 = vrot.slane %v4771_v16, %v9178_v39 }
 0x7a9   : > { %v4813_v52 = vcombine.low %v4699_v54, %v4763_v13  ;;  %v4747_v30 = vpop.trf.xlu0 }
 0x7aa   : > { %v4779_v5 = vcombine.low %v4683_v61, %v4747_v30 }
 0x7ab   : > { %v4820_v1 = vrot.slane %v4813_v52, %v9178_v39 }
 0x7ac   : > { %v4786_v28 = vrot.slane %v4779_v5, %v9178_v39  ;;  %v5633_v31 = vpop.trf.xlu1 }
 0x7ad   : > { %v4821_v34 = vcombine.low %v4812_v53, %v4820_v1  ;;  %v4822_v14 = vcombine.high %v4812_v53, %v4820_v1  ;;  %v5617_v3 = vpop.trf.xlu0 }
 0x7ae   : > { %v9936_v45 = vpop.f32.mrb[16].mxu0  ;;  %v4787_v41 = vcombine.low %v4778_v12, %v4786_v28  ;;  %v4788_v37 = vcombine.high %v4778_v12, %v4786_v28 }
 0x7af   : > { %v7857_v20 = vpop.f32.mrb[17].mxu0  ;;  %v4829_v7 = vrot.slane %v4821_v34, %v9182_v44  ;;  %v4836_v58 = vrot.slane %v4822_v14, %v9182_v44 }
 0x7b0   : > { %v3493_v19 = vpop.f32.mrb[18].mxu0  ;;  %v4795_v36 = vrot.slane %v4787_v41, %v9182_v44  ;;  %v4802_v26 = vrot.slane %v4788_v37, %v9182_v44  ;;  %v5665_v56 = vpop.trf.xlu1 }
 0x7b1   : > { %v7858_v49 = vpop.f32.mrb[19].mxu0  ;;  %v4844_v6 = vshrl.u32 %v4829_v7, 16  ;;  %v4837_v22 = vcombine.high %v4829_v7, %v10792_v9  ;;  %v5649_v62 = vpop.trf.xlu0  ;;  %v4860_v51 = vshrl.u32 %v4836_v58, 16  ;;  %v4838_v48 = vcombine.high %v4836_v58, %v10792_v9 }
 0x7b2   : > { %v4843_v29 = vshrl.u32 %v4795_v36, 16  ;;  %v4841_v59 = vpack.i.b16 %v4829_v7, %v4795_v36  ;;  %v4803_v42 = vcombine.high %v4795_v36, %v10792_v9  ;;  %v4859_v50 = vshrl.u32 %v4802_v26, 16 }
 0x7b3   : > { %v4852_v43 = vshrl.u32 %v4837_v22, 16  ;;  %v4804_v40 = vcombine.high %v4802_v26, %v10792_v9  ;;  %v4868_v55 = vshrl.u32 %v4838_v48, 16  ;;  %v4857_v53 = vpack.i.b16 %v4836_v58, %v4802_v26 }
 0x7b4   : > { %v4845_v10 = vpack.i.b16 %v4844_v6, %v4843_v29  ;;  %4871 = vxpose.xlu1.c.b16.start.end [1/1] (short) (narrow) %v4841_v59, 16  ;;  %v4851_v32 = vshrl.u32 %v4803_v42, 16  ;;  %v5697_v2 = vpop.trf.xlu1  ;;  %v4849_v63 = vpack.i.b16 %v4837_v22, %v4803_v42  ;;  %v4861_v54 = vpack.i.b16 %v4860_v51, %v4859_v50 }
 0x7b5   : > { %v5771_v18 = vcombine.low %v5633_v31, %v5697_v2  ;;  %v5681_v27 = vpop.trf.xlu0  ;;  %v4867_v61 = vshrl.u32 %v4804_v40, 16  ;;  %v4865_v34 = vpack.i.b16 %v4838_v48, %v4804_v40 }
 0x7b6   : > { %v9946_v17 = vpop.f32.mrb[12].mxu1  ;;  %4887 = vxpose.xlu0.c.b16.start.end [1/1] (short) (narrow) %v4845_v10, 16  ;;  %v4853_v25 = vpack.i.b16 %v4852_v43, %v4851_v32  ;;  %v5737_v38 = vcombine.low %v5617_v3, %v5681_v27 }
 0x7b7   : > { %v7851_v0 = vpop.f32.mrb[13].mxu1  ;;  %v5778_v35 = vrot.slane %v5771_v18, %v9178_v39  ;;  %v4869_v5 = vpack.i.b16 %v4868_v55, %v4867_v61 }
 0x7b8   : > { %v3447_v21 = vpop.f32.mrb[14].mxu1  ;;  %4919 = vxpose.xlu1.c.b16.start.end [1/1] (short) (narrow) %v4853_v25, 16  ;;  %v5729_v8 = vpop.trf.xlu1  ;;  %v5744_v52 = vrot.slane %v5737_v38, %v9178_v39 }
 0x7b9   : > { %v7852_v60 = vpop.f32.mrb[15].mxu1  ;;  %v5779_v16 = vcombine.low %v5665_v56, %v5729_v8  ;;  %v5713_v13 = vpop.trf.xlu0 }
 0x7ba   : > { %4903 = vxpose.xlu0.c.b16.start.end [1/1] (short) (narrow) %v4849_v63, 16  ;;  %v5745_v30 = vcombine.low %v5649_v62, %v5713_v13 }
 0x7bb   : > { %v5786_v12 = vrot.slane %v5779_v16, %v9178_v39 }
 0x7bc   : > { %4951 = vxpose.xlu1.c.b16.start.end [1/1] (short) (narrow) %v4861_v54, 16  ;;  %v5752_v1 = vrot.slane %v5745_v30, %v9178_v39 }
 0x7bd   : > { %v5787_v28 = vcombine.low %v5778_v35, %v5786_v12  ;;  %v5788_v31 = vcombine.high %v5778_v35, %v5786_v12 }
 0x7be   : > { %4935 = vxpose.xlu0.c.b16.start.end [1/1] (short) (narrow) %v4857_v53, 16  ;;  %v5753_v14 = vcombine.low %v5744_v52, %v5752_v1  ;;  %v5754_v3 = vcombine.high %v5744_v52, %v5752_v1 }
 0x7bf   : > { %v5795_v20 = vrot.slane %v5787_v28, %v9182_v44  ;;  %v9954_v41 = vrot.slane %v5788_v31, %v9182_v44 }
 0x7c0   : > { %4983 = vxpose.xlu1.c.b16.start.end [1/1] (short) (narrow) %v4869_v5, 16  ;;  %v5761_v37 = vrot.slane %v5753_v14, %v9182_v44  ;;  %v9958_v19 = vrot.slane %v5754_v3, %v9182_v44 }
 0x7c1   : > { %v5810_v7 = vshrl.u32 %v5795_v20, 16  ;;  %v5803_v58 = vcombine.high %v5795_v20, %v10792_v9  ;;  %v5826_v49 = vshrl.u32 %v9954_v41, 16  ;;  %v9964_v36 = vcombine.high %v9954_v41, %v10792_v9 }
 0x7c2   : > { %4967 = vxpose.xlu0.c.b16.start.end [1/1] (short) (narrow) %v4865_v34, 16  ;;  %v5807_v26 = vpack.i.b16 %v5795_v20, %v5761_v37  ;;  %v5809_v56 = vshrl.u32 %v5761_v37, 16  ;;  %v5769_v6 = vcombine.high %v5761_v37, %v10792_v9  ;;  %v5825_v22 = vshrl.u32 %v9958_v19, 16 }
 0x7c3   : > { %v5818_v62 = vshrl.u32 %v5803_v58, 16  ;;  %v9970_v29 = vcombine.high %v9958_v19, %v10792_v9  ;;  %v5834_v59 = vshrl.u32 %v9964_v36, 16  ;;  %v5823_v42 = vpack.i.b16 %v9954_v41, %v9958_v19 }
 0x7c4   : > { %v5811_v43 = vpack.i.b16 %v5810_v7, %v5809_v56  ;;  %v5815_v51 = vpack.i.b16 %v5803_v58, %v5769_v6  ;;  %v5817_v48 = vshrl.u32 %v5769_v6, 16  ;;  %v9975_v10 = vpack.i.b16 %v5826_v49, %v5825_v22 }
 0x7c5   : > { %v5833_v32 = vshrl.u32 %v9970_v29, 16  ;;  %v5831_v50 = vpack.i.b16 %v9964_v36, %v9970_v29 }
 0x7c6   : > { %5837 = vxpose.xlu0.c.b16.start.end [1/1] (short) (narrow) %v5807_v26, 16  ;;  %5853 = vxpose.xlu1.c.b16.start.end [1/1] (short) (narrow) %v5811_v43, 16  ;;  %v5819_v40 = vpack.i.b16 %v5818_v62, %v5817_v48 }
 0x7c7   : > { %v9980_v2 = vpack.i.b16 %v5834_v59, %v5833_v32 }
 0x7e3   : > { %v9982_v18 = vpop.f32.mrb[20].mxu0 }
 0x7e4   : > { %v7869_v27 = vpop.f32.mrb[21].mxu0 }
 0x7e5   : > { %v3585_v0 = vpop.f32.mrb[22].mxu0 }
 0x7e6   : > { %v7870_v63 = vpop.f32.mrb[23].mxu0 }
 0x7eb   : > { %v9984_v25 = vpop.f32.mrb[16].mxu1 }
 0x7ec   : > { %v7863_v38 = vpop.f32.mrb[17].mxu1 }
 0x7ed   : > { %v3539_v21 = vpop.f32.mrb[18].mxu1 }
 0x7ee   : > { %v7864_v60 = vpop.f32.mrb[19].mxu1  ;;  %v4469_v54 = vpop.f32.mrb[24].mxu0 }
 0x7ef   : > { %v7881_v61 = vpop.f32.mrb[25].mxu0  ;;  %v4586_v55 = vsel %vm2715_vm5, %v4469_v54, -inf }
 0x7f0   : > { %4587 = vmax.xlane.f32.xlu1 %v4586_v55  ;;  %v4472_v8 = vpop.f32.mrb[26].mxu0 }
 0x7f1   : > { %v7882_v35 = vpop.f32.mrb[27].mxu0 }
 0x7f3   : > { %v4415_v16 = vpop.f32.mrb[20].mxu1 }
 0x7f4   : > { %v7875_v13 = vpop.f32.mrb[21].mxu1  ;;  %v4583_v53 = vsel %vm2715_vm5, %v4415_v16, -inf }
 0x7f5   : > { %v4418_v52 = vpop.f32.mrb[22].mxu1  ;;  %4584 = vmax.xlane.f32.xlu0 %v4583_v53 }
 0x7f6   : > { %v7876_v30 = vpop.f32.mrb[23].mxu1  ;;  %v9988_v12 = vpop.f32.mrb[28].mxu0 }
 0x7f7   : > { %v7893_v5 = vpop.f32.mrb[29].mxu0  ;;  %v4592_v1 = vsel %vm2715_vm5, %v9988_v12, -inf }
 0x7f8   : > { %v4580_v28 = vpop.f32.mrb[30].mxu0 }
 0x7f9   : > { %4593 = vmax.xlane.f32.xlu0 %v4592_v1  ;;  %v7894_v31 = vpop.f32.mrb[31].mxu0 }
 0x7fb   : > { %v4523_v34 = vpop.f32.mrb[24].mxu1 }
 0x7fc   : > { %v7887_v14 = vpop.f32.mrb[25].mxu1  ;;  %v4589_v3 = vsel %vm2715_vm5, %v4523_v34, -inf }
 0x7fd   : > { %v4526_v20 = vpop.f32.mrb[26].mxu1  ;;  %4590 = vmax.xlane.f32.xlu1 %v4589_v3 }
 0x7fe   : > { %v7888_v37 = vpop.f32.mrb[27].mxu1 }
 0x81a   : > { %v4879_v7 = vpop.trf.xlu1 }
 0x81c   : > { %v4895_v58 = vpop.trf.xlu0 }
 0x81e   : > { %v4927_v49 = vpop.trf.xlu1 }
 0x820   : > { %v4911_v26 = vpop.trf.xlu0 }
 0x822   : > { %v4959_v56 = vpop.trf.xlu1 }
 0x823   : > { %v5024_v6 = vcombine.low %v4895_v58, %v4959_v56 }
 0x824   : > { %v4943_v22 = vpop.trf.xlu0 }
 0x825   : > { %v4999_v62 = vcombine.low %v4879_v7, %v4943_v22  ;;  %v5031_v43 = vrot.slane %v5024_v6, %v9178_v39  ;;  %v10797_v22 = vld [vmem:[#allocation48_spill] sm:$0xff] }
 0x826   : > { %5869 = vxpose.xlu0.c.b16.start.end [1/1] (short) (narrow) %v5815_v51, 16  ;;  %v4991_v59 = vpop.trf.xlu1 }
 0x827   : > { %v5032_v48 = vcombine.low %v4927_v49, %v4991_v59  ;;  %v5006_v27 = vrot.slane %v4999_v62, %v9178_v39 }
 0x828   : > { %v4975_v32 = vpop.trf.xlu0 }
 0x829   : > { %v5039_v0 = vrot.slane %v5032_v48, %v9178_v39  ;;  %v5007_v63 = vcombine.low %v4911_v26, %v4975_v32 }
 0x82a   : > { %5885 = vxpose.xlu1.c.b16.start.end [1/1] (short) (narrow) %v5819_v40, 16 }
 0x82b   : > { %v5040_v38 = vcombine.low %v5031_v43, %v5039_v0  ;;  %v5014_v21 = vrot.slane %v5007_v63, %v9178_v39 }
 0x82c   : > { %v10023_v28 = vpop.trf.xlu1  ;;  %v10025_v31 = vpop.trf.xlu0 }
 0x82d   : > { %v9998_v60 = vrot.slane %v5040_v38, %v9182_v44  ;;  %v5015_v61 = vcombine.low %v5006_v27, %v5014_v21 }
 0x82f   : > { %v10002_v51 = vcombine.high %v9998_v60, %v10792_v9  ;;  %v5053_v55 = vshrl.u32 %v9998_v60, 16  ;;  %v10006_v40 = vrot.slane %v5015_v61, %v9182_v44 }
 0x831   : > { %v5059_v8 = vshrl.u32 %v10002_v51, 16  ;;  %v10011_v35 = vcombine.high %v10006_v40, %v10792_v9  ;;  %v5051_v13 = vpack.i.b16 %v9998_v60, %v10006_v40  ;;  %v5052_v53 = vshrl.u32 %v10006_v40, 16 }
 0x833   : > { %v5058_v52 = vshrl.u32 %v10011_v35, 16  ;;  %v10017_v30 = vpack.i.b16 %v5053_v55, %v5052_v53  ;;  %v5057_v5 = vpack.i.b16 %v10002_v51, %v10011_v35 }
 0x835   : > { %v10021_v1 = vpack.i.b16 %v5059_v8, %v5058_v52 }
 0x87d   : > { %v4588_v14 = vpop.xlane.xlu1 %4587 }
 0x87e   : > { %v4596_v3 = vsub.f32 %v4469_v54, %v4588_v14 }
 0x880   : > { %v4601_v20 = vmul.f32 1.442695, %v4596_v3 }
 0x882   : > { %8153 = vpow2.f32 %v4601_v20  ;;  %v4585_v37 = vpop.xlane.xlu0 %4584 }
 0x883   : > { %v4595_v7 = vsub.f32 %v4415_v16, %v4585_v37 }
 0x885   : > { %v4599_v58 = vmul.f32 1.442695, %v4595_v7 }
 0x886   : > { %v4594_v54 = vpop.xlane.xlu0 %4593 }
 0x887   : > { %8155 = vpow2.f32 %v4599_v58  ;;  %v4598_v62 = vsub.f32 %v9988_v12, %v4594_v54 }
 0x889   : > { %v4605_v59 = vmul.f32 1.442695, %v4598_v62 }
 0x88a   : > { %v4591_v16 = vpop.xlane.xlu1 %4590 }
 0x88b   : > { %v4597_v43 = vsub.f32 %v4523_v34, %v4591_v16  ;;  %8157 = vpow2.f32 %v4605_v59 }
 0x88c   : > { %v8154_v49 = vpop.eup %8153  ;;  %v10054_v34 = vpop.trf.xlu0 }
 0x88d   : > { %v4610_v26 = vsel %vm2715_vm5, %v8154_v49, 0.0  ;;  %v4603_v48 = vmul.f32 1.442695, %v4597_v43 }
 0x88e   : > { %4611 = vadd.xlane.f32.xlu1 %v4610_v26 }
 0x88f   : > { %8159 = vpow2.f32 %v4603_v48 }
 0x890   : > { %v10052_v12 = vpop.trf.xlu1 }
 0x891   : > { %v8156_v56 = vpop.eup %8155 }
 0x892   : > { %v4607_v6 = vsel %vm2715_vm5, %v8156_v56, 0.0 }
 0x893   : > { %4608 = vadd.xlane.f32.xlu0 %v4607_v6 }
 0x895   : > { %v10034_v32 = vpop.eup %8157 }
 0x896   : > { %v4616_v27 = vsel %vm2715_vm5, %v10034_v32, 0.0 }
 0x899   : > { %v10038_v0 = vpop.eup %8159 }
 0x89a   : > { %v4613_v63 = vsel %vm2715_vm5, %v10038_v0, 0.0 }
 0x89f   : > { %1599 = vrot.lane.b32.xlu1 %v10797_v22, %s8672_s17  ;;  %s7267_s17 = sshll.u32 %s9721_s10, 4  ;;  %s10404_s17 = int_to_ptr.vmem [resolvable:$true] %s7267_s17 }
 0x8a0   : > { %s8401_s28 = scalar_lea.vmem %s10404_s17, 256 }
 0x8a1   : > { %p8402_p1 = scmp.ne.s32.totalorder %s10404_s17, %s8401_s28 }
 0x8a3   : > { %p8403_p0 = pnand %p8402_p1, %p10809_p4 }
 0x8a5   : > { %p8404_p8 = pneg %p8403_p0 }
 0x8a9   : > { %1597 = vrot.lane.b32.xlu0 %v10797_v22, %s8673_s3 }
 0x8c3   : > { %4617 = vadd.xlane.f32.xlu1 %v4616_v27 }
 0x8c8   : > { %4614 = vadd.xlane.f32.xlu0 %v4613_v63 }
 0x8f0   : > { %5917 = vxpose.xlu1.c.b16.start.end [1/1] (short) (narrow) %v9975_v10, 16 }
 0x8f4   : > { %5949 = vxpose.xlu1.c.b16.start.end [1/1] (short) (narrow) %v9980_v2, 16  ;;  %v10798_v2 = vld [vmem:[#allocation49_spill] sm:$0xff] }
 0x8f5   : > { %5901 = vxpose.xlu0.c.b16.start.end [1/1] (short) (narrow) %v5823_v42, 16  ;;  %v1641_v21 = vrot.slane %v10798_v2, %v9178_v39 }
 0x8f9   : > { %5933 = vxpose.xlu0.c.b16.start.end [1/1] (short) (narrow) %v5831_v50, 16 }
 0x902   : > { %2154 = vrot.lane.b32.xlu0 %v9875_v33, %s8670_s23  ;;  %v1607_v33 = vrot.slane %v10797_v22, %v9178_v39 }
 0x91b   : > { %v4612_v38 = vpop.xlane.xlu1 %4611 }
 0x91c   : > { %8161 = vrcp.f32 %v4612_v38 }
 0x91f   : > { %v1600_v10 = vpop.permute.xlu1 %1599 }
 0x920   : > { %v1649_v41 = vrot.slane %v1600_v10, %v9178_v39  ;;  %v4609_v19 = vpop.xlane.xlu0 %4608 }
 0x921   : > { %8163 = vrcp.f32 %v4609_v19 }
 0x922   : > { %v1650_v42 = vcombine.low %v1641_v21, %v1649_v41  ;;  %v1651_v36 = vcombine.high %v1641_v21, %v1649_v41 }
 0x924   : > { %v1658_v29 = vrot.slane %v1650_v42, %v9182_v44  ;;  %v1598_v50 = vpop.permute.xlu0 %1597  ;;  %v1665_v8 = vrot.slane %v1651_v36, %v9182_v44 }
 0x925   : > { %v1615_v61 = vrot.slane %v1598_v50, %v9178_v39 }
 0x926   : > { %v8162_v55 = vpop.eup %8161  ;;  %v1666_v53 = vcombine.high %v1658_v29, %v10792_v9  ;;  %v1667_v58 = vcombine.high %v1665_v8, %v10792_v9  ;;  %v1673_v26 = vshrl.u32 %v1658_v29, 16  ;;  %v1689_v22 = vshrl.u32 %v1665_v8, 16 }
 0x927   : > { %v1616_v52 = vcombine.low %v1607_v33, %v1615_v61  ;;  %v1617_v14 = vcombine.high %v1607_v33, %v1615_v61  ;;  %v4624_v3 = vmul.f32 %v8162_v55, %v8154_v49 }
 0x928   : > { %v1681_v6 = vshrl.u32 %v1666_v53, 16  ;;  %v1697_v41 = vshrl.u32 %v1667_v58, 16 }
 0x929   : > { %v1624_v20 = vrot.slane %v1616_v52, %v9182_v44  ;;  %v1631_v37 = vrot.slane %v1617_v14, %v9182_v44  ;;  %v4628_v7 = vpack.c.bf16 %v4624_v3, %v4624_v3 }
 0x92b   : > { %v8164_v54 = vpop.eup %8163  ;;  %v1632_v62 = vcombine.high %v1624_v20, %v10792_v9  ;;  %v1633_v16 = vcombine.high %v1631_v37, %v10792_v9  ;;  %v1670_v59 = vpack.i.b16 %v1658_v29, %v1624_v20  ;;  %v1672_v43 = vshrl.u32 %v1624_v20, 16  ;;  %4632 = vst.msk [vmem:[%s10071_s20 + $0x4] sm:$0xf] %vm2973_vm6, %v4628_v7 }
 0x92c   : > { %v1686_v49 = vpack.i.b16 %v1665_v8, %v1631_v37  ;;  %v1688_v48 = vshrl.u32 %v1631_v37, 16  ;;  %v5111_v27 = vsel %vm2715_vm5, %v4628_v7, 0  ;;  %v4623_v63 = vmul.f32 %v8164_v54, %v8156_v56 }
 0x92d   : > { %v1674_v38 = vpack.i.b16 %v1673_v26, %v1672_v43  ;;  %v1678_v10 = vpack.i.b16 %v1666_v53, %v1632_v62  ;;  %v1680_v2 = vshrl.u32 %v1632_v62, 16  ;;  %v1694_v21 = vpack.i.b16 %v1667_v58, %v1633_v16  ;;  %1921 = vst.msk [vmem:[#allocation4] sm:$0x3] %vm1904_vm3, %v1670_v59  ;;  %7902 = vmatpush3.bf16.xpose.msra.mxu0 %v5111_v27 }
 0x92e   : > { %v1690_v19 = vpack.i.b16 %v1689_v22, %v1688_v48  ;;  %v1696_v42 = vshrl.u32 %v1633_v16, 16  ;;  %1925 = vst.msk [vmem:[#allocation4 + $0x8] sm:$0x3] %vm1904_vm3, %v1686_v49  ;;  %v4627_v36 = vpack.c.bf16 %v4623_v63, %v4623_v63  ;;  %7913 = vmatprep.subr.bf16.mxu0 %v10796_v46 }
 0x92f   : > { %v1682_v29 = vpack.i.b16 %v1681_v6, %v1680_v2  ;;  %1922 = vst.msk [vmem:[#allocation4 + $0x2] sm:$0x3] %vm1904_vm3, %v1674_v38  ;;  %1923 = vst.msk [vmem:[#allocation4 + $0x4] sm:$0x3] %vm1904_vm3, %v1678_v10 }
 0x930   : > { %1927 = vst.msk [vmem:[#allocation4 + $0xc] sm:$0x3] %vm1904_vm3, %v1694_v21  ;;  %v1698_v56 = vpack.i.b16 %v1697_v41, %v1696_v42  ;;  %1926 = vst.msk [vmem:[#allocation4 + $0xa] sm:$0x3] %vm1904_vm3, %v1690_v19  ;;  %v5065_v50 = vsel %vm2715_vm5, %v4627_v36, 0 }
 0x931   : > { %4631 = vst.msk [vmem:[%s10071_s20] sm:$0xf] %vm2973_vm6, %v4627_v36  ;;  %7896 = vmatpush3.bf16.xpose.msra.mxu1 %v5065_v50 }
 0x932   : > { %1924 = vst.msk [vmem:[#allocation4 + $0x6] sm:$0x3] %vm1904_vm3, %v1682_v29  ;;  %1928 = vst.msk [vmem:[#allocation4 + $0xe] sm:$0x3] %vm1904_vm3, %v1698_v56  ;;  %7907 = vmatprep.subr.bf16.mxu1 %v10796_v46 }
 0x934   : > { %7904 = vmatmul.mubr.msk.bf16.vlgmr.msra.gmra.mrb[32].mxu0 %vm2715_vm5, %v10017_v30 }
 0x935   : > { %7915 = vmatprep.mubr.msk.bf16.mxu0 %vm8663_vm0, %v10796_v46 }
 0x937   : > { %v10107_v3 = vld.sshfl [vmem:[#allocation4 + $0x8] sm:$0x33 pattern:$0x73516240] }
 0x938   : > { %7898 = vmatmul.mubr.msk.bf16.vlgmr.msra.gmra.mrb[28].mxu1 %vm2715_vm5, %v5051_v13  ;;  %v10105_v13 = vld.sshfl [vmem:[#allocation4] sm:$0x33 pattern:$0x73516240]  ;;  %v5600_v48 = vshrl.u32 %v10107_v3, 16  ;;  %v5575_v42 = vcombine.high %v10107_v3, %v10792_v9 }
 0x939   : > { %7909 = vmatprep.mubr.msk.bf16.mxu1 %vm8663_vm0, %v10796_v46  ;;  %v10100_v53 = vld.sshfl [vmem:[#allocation4 + $0x2] sm:$0x33 pattern:$0x73516240]  ;;  %v5588_v49 = vshrl.u32 %v10105_v13, 16  ;;  %v5557_v19 = vcombine.high %v10105_v13, %v10792_v9 }
 0x93a   : > { %v10102_v30 = vld.sshfl [vmem:[#allocation4 + $0xa] sm:$0x33 pattern:$0x73516240]  ;;  %v5589_v62 = vshrl.u32 %v10100_v53, 16 }
 0x93b   : > { %v5601_v16 = vshrl.u32 %v10102_v30, 16  ;;  %v5584_v2 = vcombine.high %v10102_v30, %v10792_v9 }
 0x93c   : > { %v5590_v38 = vpack.i.b16 %v5589_v62, %v5588_v49  ;;  %v10800_v49 = vld [vmem:[#allocation52_spill] sm:$0xff] }
 0x93d   : > { %v5602_v10 = vpack.i.b16 %v5601_v16, %v5600_v48 }
 0x950   : > { %v4618_v33 = vpop.xlane.xlu1 %4617 }
 0x951   : > { %8165 = vrcp.f32 %v4618_v33  ;;  %v6081_v33 = vcombine.low %v5590_v38, %v5602_v10  ;;  %v10802_v38 = vld [vmem:[#allocation51_spill] sm:$0xff] }
 0x955   : > { %v4615_v61 = vpop.xlane.xlu0 %4614 }
 0x956   : > { %8167 = vrcp.f32 %v4615_v61  ;;  %v5925_v55 = vpop.trf.xlu1 }
 0x957   : > { %v5990_v8 = vcombine.low %v10023_v28, %v5925_v55  ;;  %v5607_v55 = vshrl.u32 %v5584_v2, 16 }
 0x959   : > { %v5997_v37 = vrot.slane %v5990_v8, %v9178_v39 }
 0x95a   : > { %v5957_v52 = vpop.trf.xlu1 }
 0x95b   : > { %v8166_v14 = vpop.eup %8165  ;;  %v5998_v60 = vcombine.low %v10052_v12, %v5957_v52  ;;  %v5909_v40 = vpop.trf.xlu0 }
 0x95c   : > { %v4626_v20 = vmul.f32 %v8166_v14, %v10034_v32  ;;  %v5965_v7 = vcombine.low %v10025_v31, %v5909_v40  ;;  %v5587_v40 = vpack.i.b16 %v10100_v53, %v10105_v13 }
 0x95d   : > { %v6005_v28 = vrot.slane %v5998_v60, %v9178_v39 }
 0x95e   : > { %v4630_v58 = vpack.c.bf16 %v4626_v20, %v4626_v20  ;;  %v5972_v59 = vrot.slane %v5965_v7, %v9178_v39  ;;  %v5606_v7 = vshrl.u32 %v5575_v42, 16 }
 0x95f   : > { %v6006_v26 = vcombine.low %v5997_v37, %v6005_v28  ;;  %v5941_v6 = vpop.trf.xlu0  ;;  %v5594_v28 = vshrl.u32 %v5557_v19, 16 }
 0x960   : > { %v8168_v22 = vpop.eup %8167  ;;  %v5973_v54 = vcombine.low %v10054_v34, %v5941_v6  ;;  %4634 = vst.msk [vmem:[%s10071_s20 + $0xc] sm:$0xf] %vm2973_vm6, %v4630_v58  ;;  %v5203_v12 = vsel %vm2715_vm5, %v4630_v58, 0  ;;  %v5605_v6 = vpack.i.b16 %v5584_v2, %v5575_v42 }
 0x961   : > { %7914 = vmatpush3.bf16.xpose.msra.mxu0 %v5203_v12  ;;  %v4625_v32 = vmul.f32 %v8168_v22, %v10038_v0  ;;  %v6013_v31 = vrot.slane %v6006_v26, %v9182_v44  ;;  %v5566_v0 = vcombine.high %v10100_v53, %v10792_v9  ;;  %v6088_v26 = vrot.slane %v6081_v33, %v9178_v39 }
 0x962   : > { %v5980_v43 = vrot.slane %v5973_v54, %v9178_v39  ;;  %7925 = vmatprep.subr.bf16.mxu0 %v10796_v46  ;;  %v10799_v54 = vld [vmem:[#allocation50_spill] sm:$0xff] }
 0x963   : > { %v4629_v34 = vpack.c.bf16 %v4625_v32, %v4625_v32  ;;  %v6014_v41 = vcombine.high %v6013_v31, %v10792_v9  ;;  %v6019_v29 = vshrl.u32 %v6013_v31, 16  ;;  %v5595_v61 = vshrl.u32 %v5566_v0, 16 }
 0x964   : > { %v5981_v27 = vcombine.low %v5972_v59, %v5980_v43 }
 0x965   : > { %4633 = vst.msk [vmem:[%s10071_s20 + $0x8] sm:$0xf] %vm2973_vm6, %v4629_v34  ;;  %v5157_v63 = vsel %vm2715_vm5, %v4629_v34, 0  ;;  %v6025_v14 = vshrl.u32 %v6014_v41, 16  ;;  %v5596_v53 = vpack.i.b16 %v5595_v61, %v5594_v28 }
 0x966   : > { %v5988_v21 = vrot.slane %v5981_v27, %v9182_v44  ;;  %7908 = vmatpush3.bf16.xpose.msra.mxu1 %v5157_v63 }
 0x967   : > { %7919 = vmatprep.subr.bf16.mxu1 %v10796_v46 }
 0x968   : > { %7916 = vmatmul.mubr.msk.bf16.vlgmr.msra.gmra.mrb[36].mxu0 %vm2715_vm5, %v10021_v1  ;;  %v6018_v36 = vshrl.u32 %v5988_v21, 16  ;;  %v6017_v56 = vpack.i.b16 %v6013_v31, %v5988_v21  ;;  %v5989_v50 = vcombine.high %v5988_v21, %v10792_v9  ;;  %v5599_v1 = vpack.i.b16 %v10102_v30, %v10107_v3 }
 0x969   : > { %7927 = vmatprep.mubr.msk.bf16.mxu0 %vm8663_vm0, %v10796_v46  ;;  %v5608_v30 = vpack.i.b16 %v5607_v55, %v5606_v7  ;;  %v5593_v3 = vpack.i.b16 %v5566_v0, %v5557_v19  ;;  %v10801_v0 = vld [vmem:[#allocation53_spill] sm:$0xff] }
 0x96a   : > { %v6020_v8 = vpack.i.b16 %v6019_v29, %v6018_v36  ;;  %v6024_v52 = vshrl.u32 %v5989_v50, 16  ;;  %v6023_v60 = vpack.i.b16 %v6014_v41, %v5989_v50  ;;  %v6039_v58 = vsel %vm2719_vm4, %v6017_v56, 0 }
 0x96b   : > { %v6027_v13 = vcombine.low %v5587_v40, %v5599_v1  ;;  %v6189_v35 = vcombine.low %v5596_v53, %v5608_v30  ;;  %v6135_v16 = vcombine.low %v5593_v3, %v5605_v6 }
 0x96c   : > { %v6093_v20 = vsel %vm2719_vm4, %v6020_v8, 0  ;;  %v6026_v37 = vpack.i.b16 %v6025_v14, %v6024_v52  ;;  %v6147_v32 = vsel %vm2719_vm4, %v6023_v60, 0  ;;  %v7711_v8 = vld [vmem:[%s658_s15] ss:$0 sm:$0xff]  ;;  %s10285_s15 = scalar_lea.vmem [#allocation30], %s9709_s13  ;;  %s8678_s13 = smov [#allocation27]  }
 0x96d   : > { %7910 = vmatmul.mubr.msk.bf16.vlgmr.msra.gmra.mrb[32].mxu1 %vm2715_vm5, %v5057_v5  ;;  %7926 = vmatpush3.bf16.msra.mxu0 %v6093_v20  ;;  %v6034_v5 = vrot.slane %v6027_v13, %v9178_v39  ;;  %v6196_v62 = vrot.slane %v6189_v35, %v9178_v39  ;;  %v6142_v31 = vrot.slane %v6135_v16, %v9178_v39  ;;  %s8405_s10 = sshll.u32 %s8678_s13, 4  ;;  %s8406_s10 = int_to_ptr.vmem [resolvable:$false] %s8405_s10 }
 0x96e   : > { %7920 = vmatpush3.bf16.msra.mxu1 %v6039_v58  ;;  %7937 = vmatprep.subr.bf16.mxu0 %v10796_v46  ;;  %v6201_v51 = vsel %vm2719_vm4, %v6026_v37, 0  ;;  %p8408_p6 = scmp.lt.s32.totalorder %s10404_s17, %s8406_s10 }
 0x96f   : > { %7921 = vmatprep.mubr.msk.bf16.mxu1 %vm8663_vm0, %v10796_v46  ;;  %7931 = vmatprep.subr.bf16.mxu1 %v10796_v46 }
 0x970   : > { %7928 = vmatmul.mubr.msk.bf16.vlgmr.msra.gmra.mrb[40].mxu0 %vm2715_vm5, %v6088_v26 }
 0x971   : > { %7938 = vmatpush3.bf16.msra.mxu0 %v6201_v51  ;;  %7939 = vmatprep.mubr.msk.bf16.mxu0 %vm8663_vm0, %v10796_v46 }
 0x972   : > { %7949 = vmatprep.subr.bf16.mxu0 %v10796_v46 }
 0x974   : > { %v2155_v22 = vpop.permute.xlu0 %2154 }
 0x975   : > { %v2171_v12 = vsel %vm1945_vm2, %v10799_v54, %v2155_v22  ;;  %7922 = vmatmul.mubr.msk.bf16.vlgmr.msra.gmra.mrb[36].mxu1 %vm2715_vm5, %v6034_v5 }
 0x976   : > { %2194 = vst.msk [vmem:[#allocation10] sm:$0x3] %vm1904_vm3, %v2171_v12  ;;  %7932 = vmatpush3.bf16.msra.mxu1 %v6147_v32  ;;  %7933 = vmatprep.mubr.msk.bf16.mxu1 %vm8663_vm0, %v10796_v46 }
 0x977   : > { %7943 = vmatprep.subr.bf16.mxu1 %v10796_v46 }
 0x978   : > { %7940 = vmatmul.mubr.msk.bf16.vlgmr.msra.gmra.mrb[44].mxu0 %vm2715_vm5, %v6196_v62 }
 0x979   : > { %7951 = vmatprep.mubr.msk.bf16.mxu0 %vm8663_vm0, %v10796_v46 }
 0x97d   : > { %7934 = vmatmul.mubr.msk.bf16.vlgmr.msra.gmra.mrb[40].mxu1 %vm2715_vm5, %v6142_v31  ;;  %v6295_v59 = vld [vmem:[#allocation10] sm:$0x3] }
 0x97e   : > { %6303 = vxpose.xlu1.c.b16.start.end [1/1] (short) (narrow) %v6295_v59, 16  ;;  %7945 = vmatprep.mubr.msk.bf16.mxu1 %vm8663_vm0, %v10796_v46 }
 0x982   : > { %2156 = vrot.lane.b32.xlu1 %v9881_v4, %s8670_s23 }
 0x986   : > { %2158 = vrot.lane.b32.xlu1 %v9883_v11, %s8670_s23 }
 0x98a   : > { %2162 = vrot.lane.b32.xlu1 %v9877_v24, %s8670_s23 }
 0x9e4   : > { %v10188_v43 = vpop.trf.xlu1 }
 0x9f4   : > { %v2157_v34 = vpop.permute.xlu1 %2156 }
 0x9f5   : > { %v2174_v48 = vsel %vm1945_vm2, %v10800_v49, %v2157_v34 }
 0x9f6   : > { %2195 = vst.msk [vmem:[#allocation10 + $0x2] sm:$0x3] %vm1904_vm3, %v2174_v48  ;;  %v10803_v48 = vld [vmem:[#allocation56_spill] sm:$0xff] }
 0x9f8   : > { %v2159_v27 = vpop.permute.xlu1 %2158 }
 0x9f9   : > { %v2177_v63 = vsel %vm1945_vm2, %v10801_v0, %v2159_v27 }
 0x9fa   : > { %2196 = vst.msk [vmem:[#allocation10 + $0x4] sm:$0x3] %vm1904_vm3, %v2177_v63 }
 0x9fc   : > { %v2163_v4 = vpop.permute.xlu1 %2162 }
 0x9fd   : > { %v2183_v11 = vsel %vm1945_vm2, %v10802_v38, %v2163_v4  ;;  %v6296_v16 = vld [vmem:[#allocation10 + $0x2] sm:$0x3]  ;;  %v10804_v4 = vld [vmem:[#allocation55_spill] sm:$0xff] }
 0x9fe   : > { %2198 = vst.msk [vmem:[#allocation10 + $0x8] sm:$0x3] %vm1904_vm3, %v2183_v11 }
 0xa01   : > { %v6297_v34 = vld [vmem:[#allocation10 + $0x4] sm:$0x3] }
 0xa05   : > { %v6299_v0 = vld [vmem:[#allocation10 + $0x8] sm:$0x3] }
 0xa07   : > { %v10199_v24 = vpop.f32.mrb[32].mxu0 }
 0xa08   : > { %v7905_v10 = vpop.f32.mrb[33].mxu0 }
 0xa09   : > { %v5150_v2 = vpop.f32.mrb[34].mxu0  ;;  %v10805_v10 = vld [vmem:[#allocation54_spill] sm:$0xff] }
 0xa0a   : > { %v7906_v21 = vpop.f32.mrb[35].mxu0 }
 0xa0b   : > { %v10201_v41 = vpop.f32.mrb[28].mxu1 }
 0xa0c   : > { %v7899_v19 = vpop.f32.mrb[29].mxu1 }
 0xa0d   : > { %v5104_v42 = vpop.f32.mrb[30].mxu1  ;;  %v10806_v19 = vld [vmem:[#allocation57_spill] sm:$0xff] }
 0xa0e   : > { %v7900_v36 = vpop.f32.mrb[31].mxu1 }
 0xa3b   : > { %v10203_v29 = vpop.f32.mrb[36].mxu0 }
 0xa3c   : > { %v7917_v56 = vpop.f32.mrb[37].mxu0 }
 0xa3d   : > { %v5242_v50 = vpop.f32.mrb[38].mxu0 }
 0xa3e   : > { %v7918_v33 = vpop.f32.mrb[39].mxu0 }
 0xa40   : > { %v10205_v61 = vpop.f32.mrb[32].mxu1 }
 0xa41   : > { %v7911_v55 = vpop.f32.mrb[33].mxu1 }
 0xa42   : > { %v5196_v52 = vpop.f32.mrb[34].mxu1 }
 0xa43   : > { %v7912_v14 = vpop.f32.mrb[35].mxu1  ;;  %v6129_v60 = vpop.f32.mrb[40].mxu0 }
 0xa44   : > { %v10209_v40 = vadd.f32 %v7711_v8, %v6129_v60  ;;  %v7929_v1 = vpop.f32.mrb[41].mxu0 }
 0xa45   : > { %v6132_v20 = vpop.f32.mrb[42].mxu0 }
 0xa46   : > { %v7930_v37 = vpop.f32.mrb[43].mxu0  ;;  %v6246_v28 = vsel %vm2715_vm5, %v10209_v40, -inf }
 0xa47   : > { %6247 = vmax.xlane.f32.xlu1 %v6246_v28 }
 0xa48   : > { %v6075_v7 = vpop.f32.mrb[36].mxu1 }
 0xa49   : > { %v10213_v58 = vadd.f32 %v7711_v8, %v6075_v7  ;;  %v7923_v26 = vpop.f32.mrb[37].mxu1 }
 0xa4a   : > { %v6078_v53 = vpop.f32.mrb[38].mxu1 }
 0xa4b   : > { %v7924_v30 = vpop.f32.mrb[39].mxu1  ;;  %v6237_v13 = vpop.f32.mrb[44].mxu0  ;;  %v6243_v51 = vsel %vm2715_vm5, %v10213_v58, -inf }
 0xa4c   : > { %6244 = vmax.xlane.f32.xlu0 %v6243_v51  ;;  %v7941_v35 = vpop.f32.mrb[45].mxu0  ;;  %v10221_v62 = vadd.f32 %v7711_v8, %v6237_v13 }
 0xa4d   : > { %v6240_v5 = vpop.f32.mrb[46].mxu0 }
 0xa4e   : > { %v7942_v3 = vpop.f32.mrb[47].mxu0  ;;  %v6252_v31 = vsel %vm2715_vm5, %v10221_v62, -inf }
 0xa50   : > { %v6183_v6 = vpop.f32.mrb[40].mxu1 }
 0xa51   : > { %v10217_v22 = vadd.f32 %v7711_v8, %v6183_v6  ;;  %v7935_v54 = vpop.f32.mrb[41].mxu1 }
 0xa52   : > { %v6186_v12 = vpop.f32.mrb[42].mxu1 }
 0xa53   : > { %v7936_v32 = vpop.f32.mrb[43].mxu1 }
 0xa58   : > { %2166 = vrot.lane.b32.xlu1 %v9885_v47, %s8670_s23  ;;  %v6249_v47 = vsel %vm2715_vm5, %v10217_v22, -inf }
 0xa79   : > { %6319 = vxpose.xlu0.c.b16.start.end [1/1] (short) (narrow) %v6296_v16, 16 }
 0xa7c   : > { %6253 = vmax.xlane.f32.xlu1 %v6252_v31 }
 0xa82   : > { %2160 = vrot.lane.b32.xlu0 %v9896_v57, %s8670_s23 }
 0xa86   : > { %2164 = vrot.lane.b32.xlu0 %v9888_v23, %s8670_s23 }
 0xa8a   : > { %2168 = vrot.lane.b32.xlu0 %v9909_v15, %s8670_s23 }
 0xaa9   : > { %6250 = vmax.xlane.f32.xlu0 %v6249_v47 }
 0xad4   : > { %v10233_v59 = vpop.xlane.xlu1 %6247 }
 0xad6   : > { %6335 = vxpose.xlu0.c.b16.start.end [1/1] (short) (narrow) %v6297_v34, 16 }
 0xad8   : > { %v2167_v49 = vpop.permute.xlu1 %2166 }
 0xad9   : > { %v2189_v27 = vsel %vm1945_vm2, %v10803_v48, %v2167_v49  ;;  %v6245_v57 = vpop.xlane.xlu0 %6244 }
 0xada   : > { %2200 = vst.msk [vmem:[#allocation10 + $0xc] sm:$0x3] %vm1904_vm3, %v2189_v27  ;;  %6367 = vxpose.xlu0.c.b16.start.end [1/1] (short) (narrow) %v6299_v0, 16  ;;  %v6255_v34 = vsub.f32 %v10213_v58, %v6245_v57  ;;  %v6256_v0 = vsub.f32 %v10209_v40, %v10233_v59 }
 0xadc   : > { %v6261_v58 = vmul.f32 1.442695, %v6256_v0 }
 0xadf   : > { %v6327_v15 = vpop.trf.xlu0 }
 0xae1   : > { %v6301_v23 = vld [vmem:[#allocation10 + $0xc] sm:$0x3] }
 0xae2   : > { %6399 = vxpose.xlu0.c.b16.start.end [1/1] (short) (narrow) %v6301_v23, 16 }
 0xaf4   : > { %v2161_v63 = vpop.permute.xlu0 %2160 }
 0xaf5   : > { %v2180_v38 = vsel %vm1945_vm2, %v10804_v4, %v2161_v63  ;;  %v6259_v4 = vmul.f32 1.442695, %v6255_v34 }
 0xaf6   : > { %2197 = vst.msk [vmem:[#allocation10 + $0x6] sm:$0x3] %vm1904_vm3, %v2180_v38 }
 0xaf7   : > { %8169 = vpow2.f32 %v6259_v4 }
 0xaf8   : > { %v2165_v11 = vpop.permute.xlu0 %2164  ;;  %8171 = vpow2.f32 %v6261_v58 }
 0xaf9   : > { %v2186_v2 = vsel %vm1945_vm2, %v10805_v10, %v2165_v11 }
 0xafa   : > { %2199 = vst.msk [vmem:[#allocation10 + $0xa] sm:$0x3] %vm1904_vm3, %v2186_v2 }
 0xafc   : > { %v2169_v21 = vpop.permute.xlu0 %2168 }
 0xafd   : > { %v2192_v42 = vsel %vm1945_vm2, %v10806_v19, %v2169_v21  ;;  %v6298_v36 = vld [vmem:[#allocation10 + $0x6] sm:$0x3] }
 0xafe   : > { %2201 = vst.msk [vmem:[#allocation10 + $0xe] sm:$0x3] %vm1904_vm3, %v2192_v42  ;;  %6351 = vxpose.xlu1.c.b16.start.end [1/1] (short) (narrow) %v6298_v36, 16 }
 0xb01   : > { %v6300_v56 = vld [vmem:[#allocation10 + $0xa] sm:$0x3]  ;;  %v8170_v42 = vpop.eup %8169 }
 0xb02   : > { %6383 = vxpose.xlu1.c.b16.start.end [1/1] (short) (narrow) %v6300_v56, 16  ;;  %v6267_v36 = vsel %vm2715_vm5, %v8170_v42, 0.0 }
 0xb05   : > { %v6302_v50 = vld [vmem:[#allocation10 + $0xe] sm:$0x3] }
 0xb06   : > { %6415 = vxpose.xlu1.c.b16.start.end [1/1] (short) (narrow) %v6302_v50, 16 }
 0xb09   : > { %v6254_v52 = vpop.xlane.xlu1 %6253 }
 0xb0a   : > { %v6258_v57 = vsub.f32 %v10221_v62, %v6254_v52 }
 0xb0c   : > { %v6265_v59 = vmul.f32 1.442695, %v6258_v57 }
 0xb36   : > { %v6251_v33 = vpop.xlane.xlu0 %6250 }
 0xb37   : > { %v6257_v38 = vsub.f32 %v10217_v22, %v6251_v33  ;;  %v8172_v22 = vpop.eup %8171 }
 0xb38   : > { %v6270_v62 = vsel %vm2715_vm5, %v8172_v22, 0.0 }
 0xb39   : > { %v6263_v19 = vmul.f32 1.442695, %v6257_v38 }
 0xb3b   : > { %8173 = vpow2.f32 %v6263_v19 }
 0xb3c   : > { %v6343_v55 = vpop.trf.xlu0  ;;  %8175 = vpow2.f32 %v6265_v59 }
 0xb40   : > { %v6375_v8 = vpop.trf.xlu0 }
 0xb41   : > { %v6431_v20 = vcombine.low %v10188_v43, %v6375_v8 }
 0xb43   : > { %v6438_v7 = vrot.slane %v6431_v20, %v9178_v39 }
 0xb45   : > { %v8174_v56 = vpop.eup %8173 }
 0xb46   : > { %v10265_v50 = vpop.eup %8175  ;;  %v6273_v33 = vsel %vm2715_vm5, %v8174_v56, 0.0 }
 0xb48   : > { %v6407_v14 = vpop.trf.xlu0 }
 0xb49   : > { %v6439_v60 = vcombine.low %v6343_v55, %v6407_v14  ;;  %v6276_v55 = vsel %vm2715_vm5, %v10265_v50, 0.0 }
 0xb4b   : > { %v6446_v37 = vrot.slane %v6439_v60, %v9178_v39 }
 0xb4d   : > { %v6447_v53 = vcombine.low %v6438_v7, %v6446_v37  ;;  %v6448_v43 = vcombine.high %v6438_v7, %v6446_v37 }
 0xb4f   : > { %v6455_v5 = vrot.slane %v6447_v53, %v9182_v44  ;;  %v6462_v23 = vrot.slane %v6448_v43, %v9182_v44 }
 0xb51   : > { %v6503_v12 = vshrl.u32 %v6455_v5, 16  ;;  %v6463_v31 = vcombine.high %v6455_v5, %v10792_v9  ;;  %v6519_v21 = vshrl.u32 %v6462_v23, 16  ;;  %v6464_v52 = vcombine.high %v6462_v23, %v10792_v9 }
 0xb53   : > { %v6511_v63 = vshrl.u32 %v6463_v31, 16 }
 0xb64   : > { %v6359_v1 = vpop.trf.xlu1 }
 0xb68   : > { %v6391_v28 = vpop.trf.xlu1 }
 0xb69   : > { %v6465_v26 = vcombine.low %v6327_v15, %v6391_v28 }
 0xb6b   : > { %v6472_v51 = vrot.slane %v6465_v26, %v9178_v39 }
 0xb6c   : > { %v6423_v30 = vpop.trf.xlu1 }
 0xb6d   : > { %v6473_v13 = vcombine.low %v6359_v1, %v6423_v30  ;;  %v6527_v1 = vshrl.u32 %v6464_v52, 16 }
 0xb6f   : > { %v6480_v35 = vrot.slane %v6473_v13, %v9178_v39 }
 0xb71   : > { %v6481_v3 = vcombine.low %v6472_v51, %v6480_v35  ;;  %v6482_v6 = vcombine.high %v6472_v51, %v6480_v35 }
 0xb73   : > { %v6489_v54 = vrot.slane %v6481_v3, %v9182_v44  ;;  %v6496_v49 = vrot.slane %v6482_v6, %v9182_v44 }
 0xb75   : > { %v6501_v32 = vpack.i.b16 %v6489_v54, %v6455_v5  ;;  %v6504_v16 = vshrl.u32 %v6489_v54, 16  ;;  %v6497_v47 = vcombine.high %v6489_v54, %v10792_v9  ;;  %v6520_v10 = vshrl.u32 %v6496_v49, 16 }
 0xb76   : > { %v6517_v2 = vpack.i.b16 %v6496_v49, %v6462_v23  ;;  %v6498_v8 = vcombine.high %v6496_v49, %v10792_v9 }
 0xb77   : > { %6531 = vxpose.xlu0.c.b16.start.end [1/1] (short) (narrow) %v6501_v32, 16  ;;  %v6505_v48 = vpack.i.b16 %v6504_v16, %v6503_v12  ;;  %v6512_v27 = vshrl.u32 %v6497_v47, 16  ;;  %v6509_v15 = vpack.i.b16 %v6497_v47, %v6463_v31  ;;  %v6521_v40 = vpack.i.b16 %v6520_v10, %v6519_v21 }
 0xb78   : > { %v6528_v14 = vshrl.u32 %v6498_v8, 16  ;;  %v6525_v60 = vpack.i.b16 %v6498_v8, %v6464_v52 }
 0xb79   : > { %6547 = vxpose.xlu1.c.b16.start.end [1/1] (short) (narrow) %v6505_v48, 16  ;;  %v6513_v11 = vpack.i.b16 %v6512_v27, %v6511_v63 }
 0xb7a   : > { %v6529_v20 = vpack.i.b16 %v6528_v14, %v6527_v1 }
 0xb7b   : > { %6563 = vxpose.xlu0.c.b16.start.end [1/1] (short) (narrow) %v6509_v15, 16 }
 0xb7d   : > { %6579 = vxpose.xlu1.c.b16.start.end [1/1] (short) (narrow) %v6513_v11, 16 }
 0xb7f   : > { %6595 = vxpose.xlu0.c.b16.start.end [1/1] (short) (narrow) %v6517_v2, 16 }
 0xb81   : > { %6611 = vxpose.xlu1.c.b16.start.end [1/1] (short) (narrow) %v6521_v40, 16 }
 0xb8c   : > { %6268 = vadd.xlane.f32.xlu0 %v6267_v36 }
 0xb8e   : > { %6271 = vadd.xlane.f32.xlu1 %v6270_v62 }
 0xb90   : > { %6274 = vadd.xlane.f32.xlu0 %v6273_v33 }
 0xb92   : > { %6277 = vadd.xlane.f32.xlu1 %v6276_v55 }
 0xbbd   : > { %6627 = vxpose.xlu0.c.b16.start.end [1/1] (short) (narrow) %v6525_v60, 16 }
 0xbbf   : > { %6643 = vxpose.xlu1.c.b16.start.end [1/1] (short) (narrow) %v6529_v20, 16 }
 0xbc1   : > { %5245 = vxpose.xlu0.b32.start.end [1/1] (short) (narrow) %v10201_v41, 8 }
 0xbc5   : > { %5309 = vxpose.xlu0.b32.start.end [1/1] (short) (narrow) %v10205_v61, 8 }
 0xbc9   : > { %5277 = vxpose.xlu1.b32.start.end [1/1] (short) (narrow) %v10199_v24, 8  ;;  %5341 = vxpose.xlu0.b32.start.end [1/1] (short) (narrow) %v10203_v29, 8 }
 0xbcd   : > { %3588 = vxpose.xlu1.b32.start.end [1/1] (short) (narrow) %v9946_v17, 8  ;;  %3620 = vxpose.xlu0.b32.start.end [1/1] (short) (narrow) %v9936_v45, 8 }
 0xbd1   : > { %3652 = vxpose.xlu1.b32.start.end [1/1] (short) (narrow) %v9984_v25, 8  ;;  %3684 = vxpose.xlu0.b32.start.end [1/1] (short) (narrow) %v9982_v18, 8 }
 0xbdd   : > { %v6539_v37 = vpop.trf.xlu0 }
 0xbdf   : > { %v6555_v28 = vpop.trf.xlu1 }
 0xbe1   : > { %v6571_v7 = vpop.trf.xlu0 }
 0xbe3   : > { %v6587_v26 = vpop.trf.xlu1 }
 0xbe5   : > { %v6603_v53 = vpop.trf.xlu0 }
 0xbe6   : > { %v6659_v17 = vcombine.low %v6539_v37, %v6603_v53 }
 0xbe7   : > { %v6619_v41 = vpop.trf.xlu1 }
 0xbe8   : > { %v6684_v13 = vcombine.low %v6555_v28, %v6619_v41  ;;  %v6666_v3 = vrot.slane %v6659_v17, %v9178_v39 }
 0xbea   : > { %v6691_v16 = vrot.slane %v6684_v13, %v9178_v39 }
 0xc19   : > { %v6269_v30 = vpop.xlane.xlu0 %6268 }
 0xc1a   : > { %8177 = vrcp.f32 %v6269_v30 }
 0xc1b   : > { %v6272_v61 = vpop.xlane.xlu1 %6271 }
 0xc1c   : > { %8179 = vrcp.f32 %v6272_v61 }
 0xc1d   : > { %v6275_v24 = vpop.xlane.xlu0 %6274 }
 0xc1e   : > { %8181 = vrcp.f32 %v6275_v24 }
 0xc1f   : > { %v6278_v29 = vpop.xlane.xlu1 %6277 }
 0xc20   : > { %8183 = vrcp.f32 %v6278_v29 }
 0xc23   : > { %v6635_v45 = vpop.trf.xlu0 }
 0xc24   : > { %v8178_v25 = vpop.eup %8177  ;;  %v6667_v18 = vcombine.low %v6571_v7, %v6635_v45 }
 0xc25   : > { %v6651_v51 = vpop.trf.xlu1  ;;  %v6283_v35 = vmul.f32 %v8178_v25, %v8170_v42 }
 0xc26   : > { %v8180_v5 = vpop.eup %8179  ;;  %v6674_v6 = vrot.slane %v6667_v18, %v9178_v39  ;;  %v6692_v54 = vcombine.low %v6587_v26, %v6651_v51 }
 0xc27   : > { %v6287_v43 = vpack.c.bf16 %v6283_v35, %v6283_v35  ;;  %v6284_v12 = vmul.f32 %v8180_v5, %v8172_v22 }
 0xc28   : > { %v8182_v32 = vpop.eup %8181  ;;  %v6675_v31 = vcombine.low %v6666_v3, %v6674_v6  ;;  %v6699_v47 = vrot.slane %v6692_v54, %v9178_v39 }
 0xc29   : > { %6291 = vst.msk [vmem:[%s10285_s15] sm:$0xf] %vm2973_vm6, %v6287_v43  ;;  %v6725_v34 = vsel %vm2715_vm5, %v6287_v43, 0  ;;  %v6288_v49 = vpack.c.bf16 %v6284_v12, %v6284_v12  ;;  %v6285_v48 = vmul.f32 %v8182_v32, %v8174_v56 }
 0xc2a   : > { %v8184_v27 = vpop.eup %8183  ;;  %v6682_v0 = vrot.slane %v6675_v31, %v9182_v44  ;;  %v6700_v23 = vcombine.low %v6691_v16, %v6699_v47  ;;  %7944 = vmatpush3.bf16.xpose.msra.mxu1 %v6725_v34 }
 0xc2b   : > { %6292 = vst.msk [vmem:[%s10285_s15 + $0x4] sm:$0xf] %vm2973_vm6, %v6288_v49  ;;  %v6771_v15 = vsel %vm2715_vm5, %v6288_v49, 0  ;;  %7955 = vmatprep.subr.bf16.mxu1 %v10796_v46  ;;  %v6289_v63 = vpack.c.bf16 %v6285_v48, %v6285_v48  ;;  %v6286_v4 = vmul.f32 %v8184_v27, %v10265_v50 }
 0xc2c   : > { %v6707_v38 = vrot.slane %v6700_v23, %v9182_v44  ;;  %7950 = vmatpush3.bf16.xpose.msra.mxu0 %v6771_v15  ;;  %v6712_v10 = vshrl.u32 %v6682_v0, 16  ;;  %v6683_v40 = vcombine.high %v6682_v0, %v10792_v9 }
 0xc2d   : > { %6293 = vst.msk [vmem:[%s10285_s15 + $0x8] sm:$0xf] %vm2973_vm6, %v6289_v63  ;;  %7961 = vmatprep.subr.bf16.mxu0 %v10796_v46  ;;  %v6290_v11 = vpack.c.bf16 %v6286_v4, %v6286_v4  ;;  %v6817_v19 = vsel %vm2715_vm5, %v6289_v63, 0 }
 0xc2e   : > { %v6711_v58 = vpack.i.b16 %v6707_v38, %v6682_v0  ;;  %v6713_v57 = vshrl.u32 %v6707_v38, 16  ;;  %v6708_v21 = vcombine.high %v6707_v38, %v10792_v9  ;;  %v6718_v22 = vshrl.u32 %v6683_v40, 16 }
 0xc2f   : > { %6294 = vst.msk [vmem:[%s10285_s15 + $0xc] sm:$0xf] %vm2973_vm6, %v6290_v11  ;;  %v6863_v59 = vsel %vm2715_vm5, %v6290_v11, 0 }
 0xc30   : > { %v6714_v2 = vpack.i.b16 %v6713_v57, %v6712_v10  ;;  %v6719_v42 = vshrl.u32 %v6708_v21, 16  ;;  %v6717_v36 = vpack.i.b16 %v6708_v21, %v6683_v40 }
 0xc31   : > { %7946 = vmatmul.mubr.msk.bf16.vlgmr.msra.gmra.mrb[44].mxu1 %vm2715_vm5, %v6711_v58 }
 0xc32   : > { %7956 = vmatpush3.bf16.xpose.msra.mxu1 %v6817_v19  ;;  %7957 = vmatprep.mubr.msk.bf16.mxu1 %vm8663_vm0, %v10796_v46  ;;  %v6720_v56 = vpack.i.b16 %v6719_v42, %v6718_v22 }
 0xc33   : > { %7952 = vmatmul.mubr.msk.bf16.vlgmr.msra.gmra.mrb[48].mxu0 %vm2715_vm5, %v6714_v2 }
 0xc34   : > { %7962 = vmatpush3.bf16.xpose.msra.mxu0 %v6863_v59  ;;  %7963 = vmatprep.mubr.msk.bf16.mxu0 %vm8663_vm0, %v10796_v46 }
 0xc39   : > { %7958 = vmatmul.mubr.msk.bf16.vlgmr.msra.gmra.mrb[48].mxu1 %vm2715_vm5, %v6717_v36 }
 0xc3b   : > { %7964 = vmatmul.mubr.msk.bf16.vlgmr.msra.gmra.mrb[52].mxu0 %vm2715_vm5, %v6720_v56 }
 0xc41   : > { %v5261_v62 = vpop.trf.xlu0 }
 0xc45   : > { %v5325_v50 = vpop.trf.xlu0 }
 0xc46   : > { %v5373_v14 = vcombine.low %v5261_v62, %v5325_v50  ;;  %v5374_v37 = vcombine.high %v5261_v62, %v5325_v50 }
 0xc48   : > { %v5381_v30 = vrot.slane %v5373_v14, %v9178_v39  ;;  %v5388_v24 = vrot.slane %v5374_v37, %v9178_v39 }
 0xc49   : > { %v5293_v33 = vpop.trf.xlu1  ;;  %v5357_v9 = vpop.trf.xlu0 }
 0xc4a   : > { %v5389_v60 = vcombine.low %v5293_v33, %v5357_v9  ;;  %v5390_v28 = vcombine.high %v5293_v33, %v5357_v9 }
 0xc4c   : > { %v5397_v61 = vrot.slane %v5389_v60, %v9178_v39  ;;  %v5404_v29 = vrot.slane %v5390_v28, %v9178_v39 }
 0xc4d   : > { %v3604_v8 = vpop.trf.xlu1  ;;  %v3636_v1 = vpop.trf.xlu0 }
 0xc4e   : > { %v5405_v18 = vcombine.low %v5381_v30, %v5397_v61  ;;  %v5406_v51 = vcombine.high %v5381_v30, %v5397_v61  ;;  %v5421_v3 = vcombine.low %v5388_v24, %v5404_v29  ;;  %v5422_v6 = vcombine.high %v5388_v24, %v5404_v29 }
 0xc50   : > { %v5413_v49 = vrot.slane %v5405_v18, %v9182_v44  ;;  %v5420_v48 = vrot.slane %v5406_v51, %v9182_v44  ;;  %v5429_v27 = vrot.slane %v5421_v3, %v9182_v44  ;;  %v5436_v0 = vrot.slane %v5422_v6, %v9182_v44 }
 0xc51   : > { %v3668_v17 = vpop.trf.xlu1  ;;  %v3700_v45 = vpop.trf.xlu0 }
 0xc52   : > { %v3716_v54 = vcombine.low %v3604_v8, %v3668_v17  ;;  %v3732_v43 = vcombine.low %v3636_v1, %v3700_v45  ;;  %v3717_v16 = vcombine.high %v3604_v8, %v3668_v17  ;;  %v3733_v31 = vcombine.high %v3636_v1, %v3700_v45 }
 0xc53   : > { %v5441_v38 = vcombine.low %v5413_v49, %v5420_v48  ;;  %v7709_v11 = vcombine.high %v5413_v49, %v5420_v48  ;;  %v5457_v10 = vcombine.low %v5429_v27, %v5436_v0  ;;  %v7710_v58 = vcombine.high %v5429_v27, %v5436_v0 }
 0xc54   : > { %v3724_v23 = vrot.slane %v3716_v54, %v9178_v39  ;;  %v3740_v15 = vrot.slane %v3732_v43, %v9178_v39  ;;  %v3731_v63 = vrot.slane %v3717_v16, %v9178_v39  ;;  %v3747_v4 = vrot.slane %v3733_v31, %v9178_v39 }
 0xc55   : > { %v5448_v40 = vrot.slane %v5441_v38, %v9178_v39  ;;  %v5456_v59 = vrot.slane %v7709_v11, %v9178_v39  ;;  %v5464_v42 = vrot.slane %v5457_v10, %v9178_v39  ;;  %v5472_v22 = vrot.slane %v7710_v58, %v9178_v39 }
 0xc56   : > { %v3748_v57 = vcombine.low %v3724_v23, %v3740_v15  ;;  %v3749_v2 = vcombine.high %v3724_v23, %v3740_v15  ;;  %v3764_v21 = vcombine.low %v3731_v63, %v3747_v4  ;;  %v3765_v19 = vcombine.high %v3731_v63, %v3747_v4 }
 0xc57   : > { %v5489_v8 = vcombine.low %v5464_v42, %v5472_v22 }
 0xc58   : > { %v3756_v36 = vrot.slane %v3748_v57, %v9182_v44  ;;  %v3763_v56 = vrot.slane %v3749_v2, %v9182_v44  ;;  %v3772_v62 = vrot.slane %v3764_v21, %v9182_v44  ;;  %v3779_v50 = vrot.slane %v3765_v19, %v9182_v44 }
 0xc5a   : > { %v3784_v33 = vcombine.low %v3756_v36, %v3763_v56  ;;  %v7699_v9 = vcombine.high %v3756_v36, %v3763_v56  ;;  %v7700_v14 = vcombine.high %v3772_v62, %v3779_v50 }
 0xc5c   : > { %v3791_v60 = vrot.slane %v3784_v33, %v9178_v39  ;;  %v3799_v1 = vrot.slane %v7699_v9, %v9178_v39  ;;  %v3815_v28 = vrot.slane %v7700_v14, %v9178_v39 }
 0xc5e   : > { %v3817_v61 = vcombine.high %v3791_v60, %v3799_v1 }
 0xc60   : > { %v3831_v17 = vrot.slane %v3817_v61, %v9182_v44 }
 0xd04   : > { %v6761_v55 = vpop.f32.mrb[44].mxu1 }
 0xd05   : > { %6905 = vxpose.xlu1.b32.start.end [1/1] (short) (narrow) %v6761_v55, 8  ;;  %v7947_v52 = vpop.f32.mrb[45].mxu1  ;;  %v5473_v55 = vcombine.low %v5448_v40, %v5456_v59 }
 0xd06   : > { %v6764_v46 = vpop.f32.mrb[46].mxu1  ;;  %v6807_v20 = vpop.f32.mrb[48].mxu0  ;;  %v3800_v52 = vcombine.low %v3772_v62, %v3779_v50 }
 0xd07   : > { %v7948_v7 = vpop.f32.mrb[47].mxu1  ;;  %6937 = vxpose.xlu0.b32.start.end [1/1] (short) (narrow) %v6807_v20, 8  ;;  %v7953_v26 = vpop.f32.mrb[49].mxu0  ;;  %v10337_v46 = vrot.slane %v5473_v55, %v9182_v44  ;;  %v10340_v20 = vrot.slane %v5489_v8, %v9182_v44 }
 0xd08   : > { %v6810_v53 = vpop.f32.mrb[50].mxu0  ;;  %v3807_v37 = vrot.slane %v3800_v52, %v9178_v39  ;;  %v5474_v7 = vcombine.high %v5448_v40, %v5456_v59  ;;  %v5490_v26 = vcombine.high %v5464_v42, %v5472_v22 }
 0xd09   : > { %v7954_v41 = vpop.f32.mrb[51].mxu0  ;;  %v5506_v53 = vcombine.high %v10337_v46, %v10340_v20 }
 0xd0a   : > { %v5488_v41 = vrot.slane %v5474_v7, %v9182_v44  ;;  %v5504_v30 = vrot.slane %v5490_v26, %v9182_v44  ;;  %v3833_v24 = vcombine.high %v3807_v37, %v3815_v28 }
 0xd0c   : > { %v6853_v25 = vpop.f32.mrb[48].mxu1  ;;  %v5507_v29 = vcombine.low %v5488_v41, %v5504_v30  ;;  %v3847_v45 = vrot.slane %v3833_v24, %v9182_v44  ;;  %v5508_v3 = vcombine.high %v5488_v41, %v5504_v30 }
 0xd0d   : > { %6969 = vxpose.xlu1.b32.start.end [1/1] (short) (narrow) %v6853_v25, 8  ;;  %v7959_v13 = vpop.f32.mrb[49].mxu1  ;;  %v3816_v25 = vcombine.low %v3791_v60, %v3799_v1 }
 0xd0e   : > { %v6856_v35 = vpop.f32.mrb[50].mxu1  ;;  %v6899_v5 = vpop.f32.mrb[52].mxu0  ;;  %v3832_v13 = vcombine.low %v3807_v37, %v3815_v28  ;;  %v3850_v18 = vcombine.low %v3831_v17, %v3847_v45  ;;  %v3851_v6 = vcombine.high %v3831_v17, %v3847_v45 }
 0xd0f   : > { %v7960_v12 = vpop.f32.mrb[51].mxu1  ;;  %7001 = vxpose.xlu0.b32.start.end [1/1] (short) (narrow) %v6899_v5, 8  ;;  %v7965_v32 = vpop.f32.mrb[53].mxu0  ;;  %v10353_v51 = vrot.slane %v3816_v25, %v9182_v44 }
 0xd10   : > { %v6902_v47 = vpop.f32.mrb[54].mxu0  ;;  %v10356_v35 = vrot.slane %v3832_v13, %v9182_v44 }
 0xd11   : > { %v7966_v34 = vpop.f32.mrb[55].mxu0 }
 0xd12   : > { %v3849_v5 = vcombine.high %v10353_v51, %v10356_v35 }
 0xd2b   : > { %5510 = vrot.lane.b32.xlu1 %v5506_v53, %s8675_s24 }
 0xd2f   : > { %5514 = vrot.lane.b32.xlu1 %v5507_v29, %s10733_s11 }
 0xd33   : > { %3857 = vrot.lane.b32.xlu1 %v3850_v18, %s10733_s11 }
 0xd38   : > { %3853 = vrot.lane.b32.xlu0 %v3849_v5, %s8675_s24 }
 0xd3c   : > { %5518 = vrot.lane.b32.xlu0 %v5508_v3, %s10732_s6 }
 0xd40   : > { %3861 = vrot.lane.b32.xlu0 %v3851_v6, %s10732_s6 }
 0xd85   : > { %v6921_v54 = vpop.trf.xlu1 }
 0xd87   : > { %v6953_v43 = vpop.trf.xlu0 }
 0xd8d   : > { %v6985_v12 = vpop.trf.xlu1 }
 0xd8e   : > { %v7033_v32 = vcombine.low %v6921_v54, %v6985_v12  ;;  %v7034_v16 = vcombine.high %v6921_v54, %v6985_v12 }
 0xd8f   : > { %v7017_v31 = vpop.trf.xlu0 }
 0xd90   : > { %v7049_v47 = vcombine.low %v6953_v43, %v7017_v31  ;;  %v7050_v34 = vcombine.high %v6953_v43, %v7017_v31  ;;  %v7041_v49 = vrot.slane %v7033_v32, %v9178_v39  ;;  %v7048_v48 = vrot.slane %v7034_v16, %v9178_v39 }
 0xd92   : > { %v7057_v27 = vrot.slane %v7049_v47, %v9178_v39  ;;  %v7064_v0 = vrot.slane %v7050_v34, %v9178_v39 }
 0xd94   : > { %v7065_v23 = vcombine.low %v7041_v49, %v7057_v27  ;;  %v7066_v15 = vcombine.high %v7041_v49, %v7057_v27  ;;  %v7081_v63 = vcombine.low %v7048_v48, %v7064_v0  ;;  %v7082_v4 = vcombine.high %v7048_v48, %v7064_v0 }
 0xd96   : > { %v7073_v38 = vrot.slane %v7065_v23, %v9182_v44  ;;  %v7080_v11 = vrot.slane %v7066_v15, %v9182_v44  ;;  %v7089_v10 = vrot.slane %v7081_v63, %v9182_v44  ;;  %v7096_v58 = vrot.slane %v7082_v4, %v9182_v44 }
 0xd98   : > { %v7101_v57 = vcombine.low %v7073_v38, %v7080_v11  ;;  %v7720_v2 = vcombine.high %v7073_v38, %v7080_v11  ;;  %v7117_v21 = vcombine.low %v7089_v10, %v7096_v58  ;;  %v7721_v19 = vcombine.high %v7089_v10, %v7096_v58 }
 0xd9a   : > { %v7108_v40 = vrot.slane %v7101_v57, %v9178_v39  ;;  %v7116_v59 = vrot.slane %v7720_v2, %v9178_v39  ;;  %v7124_v42 = vrot.slane %v7117_v21, %v9178_v39  ;;  %v7132_v22 = vrot.slane %v7721_v19, %v9178_v39 }
 0xd9c   : > { %v7133_v36 = vcombine.low %v7108_v40, %v7116_v59  ;;  %v7149_v56 = vcombine.low %v7124_v42, %v7132_v22  ;;  %v7134_v62 = vcombine.high %v7108_v40, %v7116_v59  ;;  %v7150_v50 = vcombine.high %v7124_v42, %v7132_v22 }
 0xd9e   : > { %v10377_v33 = vrot.slane %v7133_v36, %v9182_v44  ;;  %v10380_v9 = vrot.slane %v7149_v56, %v9182_v44  ;;  %v10386_v8 = vrot.slane %v7134_v62, %v9182_v44  ;;  %v10389_v39 = vrot.slane %v7150_v50, %v9182_v44 }
 0xda0   : > { %v7166_v55 = vcombine.high %v10377_v33, %v10380_v9  ;;  %v7165_v52 = vcombine.low %v10377_v33, %v10380_v9  ;;  %v7167_v44 = vcombine.low %v10386_v8, %v10389_v39 }
 0xda2   : > { %7170 = vrot.lane.b32.xlu1 %v7166_v55, %s8675_s24  ;;  %s8407_s24 = scalar_lea.vmem %s8406_s10, 512 }
 0xda3   : > { %p8409_p2 = scmp.lt.s32.totalorder %s8407_s24, %s8401_s28 }
 0xda5   : > { %p8410_p12 = por %p8409_p2, %p8408_p6 }
 0xda7   : > { %p8411_p10 = pnand %p8410_p12, %p8404_p8 }
 0xda9   : > { %8414 = shalt.err (!%p8411_p10)
}
 0xdaa   : > { %s8415_s3 = scalar_lea.hbm %s10402_s18, 256  ;;  %s8419_s13 = scalar_lea.hbm %s10808_s9, 512 }
 0xdab   : > { %p8416_p7 = scmp.ne.s32.totalorder %s10402_s18, %s8415_s3  ;;  %p8420_p3 = scmp.lt.u32.totalorder %s10402_s18, %s10808_s9 }
 0xdac   : > { %p8421_p13 = scmp.lt.u32.totalorder %s8419_s13, %s8415_s3  ;;  %p8423_p1 = scmp.lt.u32.totalorder %s8415_s3, %s10402_s18 }
 0xdad   : > { %p8417_p5 = pnand %p8416_p7, %p10809_p4 }
 0xdae   : > { %p8422_p9 = por %p8421_p13, %p8420_p3 }
 0xdaf   : > { %p8418_p11 = pneg %p8417_p5 }
 0xdb0   : > { %p8424_p0 = por %p8423_p1, %p8422_p9 }
 0xdb2   : > { %p8425_p8 = pnand %p8424_p0, %p8418_p11 }
 0xdb4   : > { %8428 = shalt.err (!%p8425_p8)
}
 0xdb5   : > { %s8679_s28 = smov 64   ;;  %v10438_v14 = vpop.permute.xlu1 %5510  ;;  %s10810_s11 = smov 16   ;;  %v7168_v60 = vcombine.high %v10386_v8, %v10389_v39 }
 0xdb6   : > { %7990 = dma.vmem_to_hbm [thread:$0]  (%p10809_p4), %s10404_s17, 256, %s10402_s18, %s7201_s19, %s8679_s28, %s8679_s28, %s8670_s23  }
 0xdb7   : > { %7174 = vrot.lane.b32.xlu1 %v7167_v44, %s10810_s11  ;;  %s10811_s3 = sld [smem:[#allocation69_spill]]  ;;  %s10454_s13 = sshll.u32 %s10793_s29, 7 }
 0xdb8   : > { %s8429_s17 = scalar_lea.vmem %s10442_s30, 256  ;;  %s8680_s20 = smov [#allocation29]  }
 0xdb9   : > { %p8430_p6 = scmp.ne.s32.totalorder %s10442_s30, %s8429_s17  ;;  %s8433_s18 = sshll.u32 %s8680_s20, 4  ;;  %s8434_s18 = int_to_ptr.vmem [resolvable:$false] %s8433_s18 }
 0xdba   : > { %s8435_s10 = scalar_lea.vmem %s8434_s18, 512  ;;  %p8436_p10 = scmp.lt.s32.totalorder %s10442_s30, %s8434_s18 }
 0xdbb   : > { %p8431_p2 = pnand %p8430_p6, %p10809_p4  ;;  %p8437_p7 = scmp.lt.s32.totalorder %s8435_s10, %s8429_s17 }
 0xdbd   : > { %s10449_s21 = scalar_lea.hbm %s10811_s3, %s10394_s14  ;;  %p8432_p12 = pneg %p8431_p2 }
 0xdbe   : > { %p8438_p5 = por %p8437_p7, %p8436_p10 }
 0xdc0   : > { %p8439_p11 = pnand %p8438_p5, %p8432_p12 }
 0xdc2   : > { %8442 = shalt.err (!%p8439_p11)
}
 0xdc3   : > { %s8443_s29 = scalar_lea.hbm %s10449_s21, 256  ;;  %s8447_s24 = scalar_lea.hbm %s10811_s3, 512 }
 0xdc4   : > { %p8444_p3 = scmp.ne.s32.totalorder %s10449_s21, %s8443_s29  ;;  %p8448_p1 = scmp.lt.u32.totalorder %s10449_s21, %s10811_s3 }
 0xdc5   : > { %p8449_p0 = scmp.lt.u32.totalorder %s8447_s24, %s8443_s29  ;;  %p8451_p6 = scmp.lt.u32.totalorder %s8443_s29, %s10449_s21 }
 0xdc6   : > { %p8445_p13 = pnand %p8444_p3, %p10809_p4 }
 0xdc7   : > { %p8450_p8 = por %p8449_p0, %p8448_p1 }
 0xdc8   : > { %p8446_p9 = pneg %p8445_p13 }
 0xdc9   : > { %p8452_p2 = por %p8451_p6, %p8450_p8 }
 0xdcb   : > { %p8453_p12 = pnand %p8452_p2, %p8446_p9 }
 0xdcd   : > { %8456 = shalt.err (!%p8453_p12)
}
 0xdce   : > { %7991 = dma.vmem_to_hbm [thread:$0]  (%p10809_p4), %s10442_s30, 256, %s10449_s21, %s7201_s19, %s8679_s28, %s8679_s28, %s8670_s23   ;;  %v3854_v1 = vpop.permute.xlu0 %3853  ;;  %v5505_v37 = vcombine.low %v10337_v46, %v10340_v20  ;;  %vm3865_vm7 = vcmask 130048   ;;  %v5515_v28 = vpop.permute.xlu1 %5514  ;;  %vm3867_vm8 = vcmask 195584  }
 0xdcf   : > { %s10812_s17 = smov 24   ;;  %s10813_s11 = sld [smem:[#allocation70_spill]] }
 0xdd0   : > { %7178 = vrot.lane.b32.xlu1 %v7168_v60, %s10812_s17  ;;  %s7301_s24 = sshll.u32 %s10285_s15, 4  ;;  %s10734_s20 = scalar_lea.vmem [#allocation24], %s10407_s27  ;;  %s10497_s24 = int_to_ptr.vmem [resolvable:$true] %s7301_s24 }
 0xdd1   : > { %s10495_s18 = sshll.u32 %s10734_s20, 4  ;;  %s7211_s30 = scalar_lea.sflag [#allocation31], %s9061_s16  ;;  %s10538_s18 = int_to_ptr.vmem [resolvable:$true] %s10495_s18 }
 0xdd2   : > { %s8457_s19 = scalar_lea.vmem %s10497_s24, 256  ;;  %s8681_s15 = smov [#allocation30]  }
 0xdd3   : > { %p8458_p10 = scmp.ne.s32.totalorder %s10497_s24, %s8457_s19 }
 0xdd5   : > { %s10487_s6 = scalar_lea.hbm %s10813_s11, %s10394_s14  ;;  %p8459_p7 = pnand %p8458_p10, %p10809_p4 }
 0xdd6   : > { %s8461_s14 = sshll.u32 %s8681_s15, 4  ;;  %s8462_s14 = int_to_ptr.vmem [resolvable:$false] %s8461_s14 }
 0xdd7   : > { %p8460_p5 = pneg %p8459_p7  ;;  %s8463_s21 = scalar_lea.vmem %s8462_s14, 512 }
 0xdd8   : > { %p8464_p11 = scmp.lt.s32.totalorder %s10497_s24, %s8462_s14  ;;  %p8465_p3 = scmp.lt.s32.totalorder %s8463_s21, %s8457_s19 }
 0xdda   : > { %p8466_p13 = por %p8465_p3, %p8464_p11 }
 0xddc   : > { %p8467_p9 = pnand %p8466_p13, %p8460_p5 }
 0xdde   : > { %8470 = shalt.err (!%p8467_p9)
}
 0xddf   : > { %s8471_s17 = scalar_lea.hbm %s10487_s6, 256  ;;  %s8475_s15 = scalar_lea.hbm %s10813_s11, 512 }
 0xde0   : > { %p8472_p1 = scmp.ne.s32.totalorder %s10487_s6, %s8471_s17  ;;  %p8476_p6 = scmp.lt.u32.totalorder %s10487_s6, %s10813_s11 }
 0xde1   : > { %p8477_p2 = scmp.lt.u32.totalorder %s8475_s15, %s8471_s17  ;;  %p8479_p10 = scmp.lt.u32.totalorder %s8471_s17, %s10487_s6 }
 0xde2   : > { %p8473_p0 = pnand %p8472_p1, %p10809_p4 }
 0xde3   : > { %p8478_p12 = por %p8477_p2, %p8476_p6 }
 0xde4   : > { %p8474_p8 = pneg %p8473_p0 }
 0xde5   : > { %p8480_p7 = por %p8479_p10, %p8478_p12 }
 0xde7   : > { %p8481_p5 = pnand %p8480_p7, %p8474_p8 }
 0xde9   : > { %8484 = shalt.err (!%p8481_p5)
}
 0xdea   : > { %7992 = dma.vmem_to_hbm [thread:$0]  (%p10809_p4), %s10497_s24, 256, %s10487_s6, %s7211_s30, %s8679_s28, %s8679_s28, %s8670_s23   ;;  %v5521_v46 = vsel %vm2715_vm5, %v5505_v37, %v10438_v14  ;;  %v3848_v20 = vcombine.low %v10353_v51, %v10356_v35  ;;  %v5519_v26 = vpop.permute.xlu0 %5518  ;;  %v3858_v41 = vpop.permute.xlu1 %3857 }
 0xdeb   : > { %v5522_v7 = vsel %vm3865_vm7, %v5521_v46, %v5515_v28  ;;  %s10814_s21 = sld [smem:[#allocation66_spill]]  ;;  %s725_s23 = scalar_lea.vmem [#allocation23], %s10407_s27 }
 0xdec   : > { %v3864_v53 = vsel %vm2715_vm5, %v3848_v20, %v3854_v1  ;;  %v5523_v30 = vsel %vm3867_vm8, %v5522_v7, %v5519_v26  ;;  %s10545_s28 = sshll.u32 %s725_s23, 4  ;;  %s10816_s6 = scalar_lea.vmem [#allocation24], %s10407_s27  ;;  %s10582_s28 = int_to_ptr.vmem [resolvable:$true] %s10545_s28 }
 0xded   : > { %5524 = vst.msk [vmem:[%s10816_s6] sm:$0xff] %vm793_vm1, %v5523_v30  ;;  %s7191_s24 = scalar_lea.sflag [#allocation25], %s9073_s0  ;;  %s8485_s30 = scalar_lea.vmem %s10538_s18, 128 }
 0xdee   : > { %p8486_p11 = scmp.ne.s32.totalorder %s10538_s18, %s8485_s30  ;;  %s8682_s29 = smov [#allocation24]  }
 0xdef   : > { %s8489_s15 = sshll.u32 %s8682_s29, 4  ;;  %s8490_s15 = int_to_ptr.vmem [resolvable:$false] %s8489_s15 }
 0xdf0   : > { %p8487_p3 = pnand %p8486_p11, %p10809_p4  ;;  %s8491_s14 = scalar_lea.vmem %s8490_s15, 256 }
 0xdf1   : > { %s10815_s17 = smov %s10814_s21  ;;  %s10535_s10 = scalar_lea.hbm %s10814_s21, %s10454_s13 }
 0xdf2   : > { %p8488_p13 = pneg %p8487_p3  ;;  %p8492_p9 = scmp.lt.s32.totalorder %s10538_s18, %s8490_s15 }
 0xdf3   : > { %p8493_p1 = scmp.lt.s32.totalorder %s8491_s14, %s8485_s30 }
 0xdf5   : > { %p8494_p0 = por %p8493_p1, %p8492_p9 }
 0xdf7   : > { %p8495_p8 = pnand %p8494_p0, %p8488_p13 }
 0xdf9   : > { %8498 = shalt.err (!%p8495_p8)
}
 0xdfa   : > { %s8499_s20 = scalar_lea.hbm %s10535_s10, 128  ;;  %s8503_s6 = scalar_lea.hbm %s10815_s17, 256 }
 0xdfb   : > { %p8500_p6 = scmp.ne.s32.totalorder %s10535_s10, %s8499_s20  ;;  %p8504_p10 = scmp.lt.u32.totalorder %s10535_s10, %s10815_s17 }
 0xdfc   : > { %p8505_p7 = scmp.lt.u32.totalorder %s8503_s6, %s8499_s20  ;;  %p8507_p11 = scmp.lt.u32.totalorder %s8499_s20, %s10535_s10 }
 0xdfd   : > { %p8501_p2 = pnand %p8500_p6, %p10809_p4 }
 0xdfe   : > { %p8506_p5 = por %p8505_p7, %p8504_p10 }
 0xdff   : > { %p8502_p12 = pneg %p8501_p2 }
 0xe00   : > { %p8508_p3 = por %p8507_p11, %p8506_p5 }
 0xe02   : > { %p8509_p13 = pnand %p8508_p3, %p8502_p12 }
 0xe04   : > { %8512 = shalt.err (!%p8509_p13)
}
 0xe05   : > { %7988 = dma.vmem_to_hbm [thread:$0]  (%p10809_p4), %s10538_s18, 128, %s10535_s10, %s7191_s24   ;;  %v3866_v61 = vsel %vm3865_vm7, %v3864_v53, %v3858_v41  ;;  %v3862_v24 = vpop.permute.xlu0 %3861 }
 0xe06   : > { %s10817_s20 = sld [smem:[#allocation65_spill]]  ;;  %v3868_v29 = vsel %vm3867_vm8, %v3866_v61, %v3862_v24  ;;  %s7186_s21 = scalar_lea.sflag [#allocation13], %s9061_s16 }
 0xe07   : > { %3870 = vst.msk [vmem:[%s725_s23] sm:$0xff] %vm793_vm1, %v3868_v29  ;;  %s8513_s18 = scalar_lea.vmem %s10582_s28, 128  ;;  %s8683_s10 = smov [#allocation23]  }
 0xe08   : > { %p8514_p9 = scmp.ne.s32.totalorder %s10582_s28, %s8513_s18  ;;  %s8517_s6 = sshll.u32 %s8683_s10, 4  ;;  %s8518_s6 = int_to_ptr.vmem [resolvable:$false] %s8517_s6 }
 0xe09   : > { %s8519_s29 = scalar_lea.vmem %s8518_s6, 256  ;;  %p8520_p8 = scmp.lt.s32.totalorder %s10582_s28, %s8518_s6 }
 0xe0a   : > { %p8515_p1 = pnand %p8514_p9, %p10809_p4  ;;  %p8521_p6 = scmp.lt.s32.totalorder %s8519_s29, %s8513_s18 }
 0xe0c   : > { %s10579_s19 = scalar_lea.hbm %s10817_s20, %s10454_s13  ;;  %p8516_p0 = pneg %p8515_p1 }
 0xe0d   : > { %p8522_p2 = por %p8521_p6, %p8520_p8 }
 0xe0f   : > { %p8523_p12 = pnand %p8522_p2, %p8516_p0 }
 0xe11   : > { %8526 = shalt.err (!%p8523_p12)
}
 0xe12   : > { %s8527_s16 = scalar_lea.hbm %s10579_s19, 128  ;;  %s8531_s30 = scalar_lea.hbm %s10817_s20, 256 }
 0xe13   : > { %p8528_p10 = scmp.ne.s32.totalorder %s10579_s19, %s8527_s16  ;;  %p8532_p11 = scmp.lt.u32.totalorder %s10579_s19, %s10817_s20 }
 0xe14   : > { %p8533_p3 = scmp.lt.u32.totalorder %s8531_s30, %s8527_s16  ;;  %p8535_p9 = scmp.lt.u32.totalorder %s8527_s16, %s10579_s19 }
 0xe15   : > { %p8529_p7 = pnand %p8528_p10, %p10809_p4 }
 0xe16   : > { %p8534_p13 = por %p8533_p3, %p8532_p11 }
 0xe17   : > { %p8530_p5 = pneg %p8529_p7 }
 0xe18   : > { %p8536_p1 = por %p8535_p9, %p8534_p13 }
 0xe1a   : > { %p8537_p0 = pnand %p8536_p1, %p8530_p5 }
 0xe1c   : > { %8540 = shalt.err (!%p8537_p0)
}
 0xe1d   : > { %7987 = dma.vmem_to_hbm [thread:$0]  (%p10809_p4), %s10582_s28, 128, %s10579_s19, %s7186_s21   ;;  %v7171_v17 = vpop.permute.xlu1 %7170 }
 0xe1e   : > { %s739_s18 = scalar_lea.vmem [#allocation26], %s10407_s27  ;;  %v7181_v25 = vsel %vm2715_vm5, %v7165_v52, %v7171_v17  ;;  %s10818_s23 = sld [smem:[#allocation67_spill]] }
 0xe1f   : > { %s7253_s6 = sshll.u32 %s739_s18, 4  ;;  %s8684_s28 = smov [#allocation26]   ;;  %s10622_s6 = int_to_ptr.vmem [resolvable:$true] %s7253_s6 }
 0xe20   : > { %s8541_s27 = scalar_lea.vmem %s10622_s6, 128  ;;  %s8545_s19 = sshll.u32 %s8684_s28, 4  ;;  %s8546_s19 = int_to_ptr.vmem [resolvable:$false] %s8545_s19 }
 0xe21   : > { %p8542_p8 = scmp.ne.s32.totalorder %s10622_s6, %s8541_s27  ;;  %s8547_s21 = scalar_lea.vmem %s8546_s19, 256 }
 0xe22   : > { %p8548_p12 = scmp.lt.s32.totalorder %s10622_s6, %s8546_s19  ;;  %p8549_p10 = scmp.lt.s32.totalorder %s8547_s21, %s8541_s27 }
 0xe23   : > { %p8543_p6 = pnand %p8542_p8, %p10809_p4 }
 0xe24   : > { %s10819_s15 = smov %s10818_s23  ;;  %s10620_s30 = scalar_lea.hbm %s10818_s23, %s10454_s13 }
 0xe25   : > { %p8544_p2 = pneg %p8543_p6  ;;  %p8550_p7 = por %p8549_p10, %p8548_p12 }
 0xe27   : > { %p8551_p5 = pnand %p8550_p7, %p8544_p2 }
 0xe29   : > { %v7175_v45 = vpop.permute.xlu1 %7174 }
 0xe2a   : > { %v7182_v13 = vsel %vm3865_vm7, %v7181_v25, %v7175_v45 }
 0xe42   : > { %v7179_v18 = vpop.permute.xlu1 %7178 }
 0xe43   : > { %v7183_v51 = vsel %vm3867_vm8, %v7182_v13, %v7179_v18 }
 0xe44   : > { %7184 = vst.msk [vmem:[%s739_s18] sm:$0xff] %vm793_vm1, %v7183_v51 }
 0xe45   : > { %8554 = shalt.err (!%p8551_p5)
}
 0xe46   : > { %s8555_s13 = scalar_lea.hbm %s10620_s30, 128  ;;  %s8559_s18 = scalar_lea.hbm %s10819_s15, 256 }
 0xe47   : > { %p8556_p11 = scmp.ne.s32.totalorder %s10620_s30, %s8555_s13  ;;  %p8560_p9 = scmp.lt.u32.totalorder %s10620_s30, %s10819_s15 }
 0xe48   : > { %p8561_p1 = scmp.lt.u32.totalorder %s8559_s18, %s8555_s13  ;;  %p8563_p8 = scmp.lt.u32.totalorder %s8555_s13, %s10620_s30 }
 0xe49   : > { %p8557_p3 = pnand %p8556_p11, %p10809_p4 }
 0xe4a   : > { %p8562_p0 = por %p8561_p1, %p8560_p9 }
 0xe4b   : > { %p8558_p13 = pneg %p8557_p3 }
 0xe4c   : > { %p8564_p6 = por %p8563_p8, %p8562_p0 }
 0xe4e   : > { %p8565_p2 = pnand %p8564_p6, %p8558_p13 }
 0xe50   : > { %8568 = shalt.err (!%p8565_p2)
}
 0xe51   : > { %7989 = dma.vmem_to_hbm [thread:$0]  (%p10809_p4), %s10622_s6, 128, %s10620_s30, %s7191_s24  }
 0xe52 PF: > { %s10820_s23 = sld [smem:[#allocation41_spill]]  ;;  %s10821_s27 = sld [smem:[#allocation44_spill]] }
 0xe53   : > { %p10823_p10 = scmp.ge.s32.totalorder %s8651_s26, 2 }
 0xe58   : > { %s7316_s28 = sand.u32 1, %s10820_s23   ;;  %p10822_p12 = scmp.ne.s32.totalorder %s10821_s27, 0 }
 0xe59   : > { %s7317_s19 = scalar_lea.sflag [#allocation13], %s7316_s28 }
 0xe5a   : > { %p8023_p7 = pnand %p10823_p10, %p10822_p12 }
 0xe5c   : > { %8614 = dma.done.wait (!%p8023_p7), %s7317_s19, 128  }
 0xe5d   : > { %8616 = vsyncadd (!%p8023_p7), %s7317_s19, 4294967168  ;;  %s10824_s21 = sadd.s32 4294967294, %s8651_s26  }
 0xe5e   : > { %s7325_s13 = sand.u32 1, %s10824_s21  }
 0xe5f   : > { %s7326_s12 = scalar_lea.sflag [#allocation25], %s7325_s13 }
 0xe60   : > { %8618 = dma.done.wait (!%p8023_p7), %s7326_s12, 256  }
 0xe61   : > { %8620 = vsyncadd (!%p8023_p7), %s7326_s12, 4294967040  ;;  %s7344_s0 = scalar_lea.sflag [#allocation28], %s7325_s13 }
 0xe62   : > { %8622 = dma.done.wait (!%p8023_p7), %s7344_s0, 512  }
 0xe63   : > { %8624 = vsyncadd (!%p8023_p7), %s7344_s0, 4294966784  ;;  %s7362_s24 = scalar_lea.sflag [#allocation31], %s7316_s28 }
 0xe64   : > { %8626 = dma.done.wait (!%p8023_p7), %s7362_s24, 256  }
 0xe65   : > { %8628 = vsyncadd (!%p8023_p7), %s7362_s24, 4294967040  ;;  %s49_s26 = sadd.s32 1, %s8651_s26   ;;  %s10825_s6 = sld [smem:[#allocation42_spill]] }
 0xe66   : > { %p46_p4 = scmp.ge.s32.totalorder %s49_s26, 4   ;;  %s10826_s23 = sld [smem:[#allocation47_spill]] }
 0xe67   : > { %s10827_s30 = sld [smem:[#allocation45_spill]]  ;;  %s10828_s21 = smov %s8635_s22 }
 0xe68   : > { %s10830_s24 = smov %s8647_s25  ;;  %48 = sbr.rel (!%p46_p4) target bundleno = 31 (0x1f), region = 249 }
 0xe6b   : > { %s10829_s22 = smov %s10825_s6 }
 0xe6d   : > { %s10831_s25 = smov %s10827_s30 }
 0xe6f   :  { %7367 = vsyncpa [#allocation12], 1 }
 0xe70   :  { %7369 = vsyncpa [#allocation12 + $0x1], 1 }
 0xe71   :  { %7370 = vsyncpa [#allocation15], 1 }
 0xe72   :  { %7372 = vsyncpa [#allocation15 + $0x1], 1 }
 0xe73   :  { %7373 = vsyncpa [#allocation18], 1 }
 0xe74   :  { %7375 = vsyncpa [#allocation18 + $0x1], 1 }
 0xe75   :  { %7376 = vsyncpa [#allocation21], 1 }
 0xe76   :  { %7377 = vsyncpa [#allocation13], 1 }
 0xe77   :  { %7379 = vsyncpa [#allocation13 + $0x1], 1 }
 0xe78   :  { %7380 = vsyncpa [#allocation25], 1 }
 0xe79   :  { %7382 = vsyncpa [#allocation25 + $0x1], 1 }
 0xe7a   :  { %7383 = vsyncpa [#allocation28], 1 }
 0xe7b   :  { %7385 = vsyncpa [#allocation28 + $0x1], 1 }
 0xe7c   :  { %7386 = vsyncpa [#allocation31], 1 }
 0xe7d   :  { %7388 = vsyncpa [#allocation31 + $0x1], 1 }

</bundles_post_ra>
